<compile_context>
chip_gen: v7x
topology: tpu7x:2x2x1
jax: 0.10.0
libtpu: 0.0.40
codegen_flags: <defaults>
</compile_context>

<pallas_src>
import functools

import jax
import jax.numpy as jnp
from jax import lax
from jax.experimental import pallas as pl
from jax.experimental.pallas import tpu as pltpu


# ----------------------------- Pallas kernel -----------------------------

def _conv3x3_bn_kernel(x_ref, w_ref, b_ref, *rest, H, W, relu, res_channels):
    """Fused 3x3 conv (stride 1, pad 1) + folded BN [+ identity] [+ ReLU].

    Padded-flat layout (per image): row r = y_p*(W+2) + x_p for padded coords
    (y_p, x_p); rows [(H+2)*(W+2), (H+3)*(W+2)) are an extra zero margin.
    The conv is accumulated as nine shifted-slab matmuls
        slab[p] = sum_{ky,kx} x_flat[p + ky*(W+2) + kx] @ W[ky,kx]
    (p = y*(W+2) + x') and written back at row p + (W+3) of the same layout,
    with every padding / margin / garbage row forced to exactly zero so the
    output feeds straight into the next conv.
    """
    if res_channels:
        r_ref, o_ref = rest
    else:
        (o_ref,) = rest

    Wrow = W + 2
    L = H * Wrow                    # slab rows
    head = W + 3                    # flat-row offset of output pixel (0, 0)
    P = x_ref.shape[1]              # (H + 3) * (W + 2)
    cin = x_ref.shape[2]
    cout = o_ref.shape[2]
    tail = P - head - L

    # Whole padded-flat image -> f32 value (unpacked) so the nine row-shifted
    # slices below stay on the cheap, well-supported path.
    xv = x_ref[0].astype(jnp.float32)                        # (P, cin)

    acc = None
    for ky in range(3):
        for kx in range(3):
            off = ky * Wrow + kx                             # static offset
            lhs = xv[off:off + L, :].astype(jnp.bfloat16)    # (L, cin)
            t = ky * 3 + kx
            w_tap = w_ref[t * cin:(t + 1) * cin, :]          # (cin, cout) bf16
            d = jnp.dot(lhs, w_tap, preferred_element_type=jnp.float32)
            acc = d if acc is None else acc + d              # (L, cout) f32

    slab = acc + b_ref[...]                                  # folded-BN bias

    if res_channels:
        r_slab = r_ref[0].astype(jnp.float32)[head:head + L, :]
        if res_channels == cout:
            slab = slab + r_slab
        else:
            # Zero-extend the identity (cat(x, zeros)) in-register via an
            # exact 0/1 selector matmul (avoids any minor-dim concat).
            sel = (lax.broadcasted_iota(jnp.int32, (res_channels, cout), 0) ==
                   lax.broadcasted_iota(jnp.int32, (res_channels, cout), 1)
                   ).astype(jnp.bfloat16)
            slab = slab + jnp.dot(r_slab.astype(jnp.bfloat16), sel,
                                  preferred_element_type=jnp.float32)

    if relu:
        slab = jnp.maximum(slab, 0.0)

    # Zero the per-row garbage columns (x' >= W) so every padding position of
    # the output layout is exactly zero.
    col = lax.broadcasted_iota(jnp.int32, (L, cout), 0) % Wrow
    slab = jnp.where(col < W, slab, 0.0)

    full = jnp.concatenate(
        [jnp.zeros((head, cout), jnp.float32),
         slab,
         jnp.zeros((tail, cout), jnp.float32)], axis=0)      # (P, cout)

    o_ref[0] = full.astype(o_ref.dtype)


# ----------------------------- wrapper -----------------------------

def _conv3x3_bn(x_flat, w_mat, bias, *, H, W, relu, residual=None,
                out_dtype=jnp.bfloat16):
    """x_flat: (N, (H+3)*(W+2), Cin) bf16 padded-flat activations."""
    N, P, cin = x_flat.shape
    K, cout = w_mat.shape
    assert K == 9 * cin
    res_ch = 0 if residual is None else residual.shape[-1]

    kernel = functools.partial(_conv3x3_bn_kernel, H=H, W=W, relu=relu,
                               res_channels=res_ch)
    in_specs = [
        pl.BlockSpec((1, P, cin), lambda n: (n, 0, 0)),   # one image per step
        pl.BlockSpec((K, cout), lambda n: (0, 0)),        # VMEM-resident weights
        pl.BlockSpec((1, cout), lambda n: (0, 0)),        # VMEM-resident bias
    ]
    args = [x_flat, w_mat, bias]
    if residual is not None:
        in_specs.append(pl.BlockSpec((1, P, res_ch), lambda n: (n, 0, 0)))
        args.append(residual)

    return pl.pallas_call(
        kernel,
        out_shape=jax.ShapeDtypeStruct((N, P, cout), out_dtype),
        grid=(N,),
        in_specs=in_specs,
        out_specs=pl.BlockSpec((1, P, cout), lambda n: (n, 0, 0)),
        compiler_params=pltpu.CompilerParams(
            dimension_semantics=("parallel",)),
    )(*args)


@functools.partial(jax.jit, static_argnames=("stride",))
def resblock_forward(x_nchw, params, *, stride=1):
    """PyTorch ResBlock.forward (NCHW in / NCHW out), Pallas kernels inside."""
    if stride != 1:
        # TODO(synk): strided conv1 needs a downsampled identity, which the
        # reference module itself does not define; only stride=1 is supported.
        raise NotImplementedError("ResBlock Pallas kernel supports stride=1")
    (w1, b1), (w2, b2) = params
    N, cin, H, W = x_nchw.shape
    cout = w2.shape[1]
    if cout not in (cin, 2 * cin):
        raise ValueError("ResBlock identity needs out_c == in_c or 2*in_c")

    Wrow, P = W + 2, (H + 3) * (W + 2)
    # NCHW -> NHWC, zero pad (+1 top / +2 bottom rows, +1 left/right cols),
    # flatten, cast to bf16.  XLA fuses this into a single pass over x.
    x_nhwc = jnp.transpose(x_nchw, (0, 2, 3, 1))
    x_flat = jnp.pad(x_nhwc, ((0, 0), (1, 2), (1, 1), (0, 0)))
    x_flat = x_flat.astype(jnp.bfloat16).reshape(N, P, cin)

    # conv1 + BN + ReLU (bf16 intermediate, already in padded-flat layout)
    h = _conv3x3_bn(x_flat, w1, b1, H=H, W=W, relu=True,
                    out_dtype=jnp.bfloat16)
    # conv2 + BN + identity-add + ReLU (identity zero-extended in-kernel)
    out = _conv3x3_bn(h, w2, b2, H=H, W=W, relu=True,
                      residual=x_flat, out_dtype=jnp.float32)

    out = out.reshape(N, H + 3, Wrow, cout)[:, 1:H + 1, 1:W + 1, :]
    return jnp.transpose(out, (0, 3, 1, 2))                  # -> NCHW


# ----------------------------- parameters -----------------------------

def _make_conv_bn_params(key, cin, cout, k=3):
    k1, k2, k3, k4, k5 = jax.random.split(key, 5)
    w = jax.random.normal(k1, (cout, cin, k, k), jnp.float32) / jnp.sqrt(
        float(cin * k * k))
    gamma = 1.0 + 0.1 * jax.random.normal(k2, (cout,), jnp.float32)
    beta = 0.1 * jax.random.normal(k3, (cout,), jnp.float32)
    rmean = 0.1 * jax.random.normal(k4, (cout,), jnp.float32)
    rvar = 1.0 + 0.1 * jnp.abs(jax.random.normal(k5, (cout,), jnp.float32))
    eps = 1e-5
    # BN folded in inference mode: y = conv(x) * scale + bias
    scale = gamma / jnp.sqrt(rvar + eps)
    bias = beta - rmean * scale
    # (Cout,Cin,KH,KW) -> (KH*KW*Cin, Cout), row order (ky, kx, cin) matching
    # the kernel's tap ordering; BN scale folded into the weight columns.
    w_mat = jnp.transpose(w, (2, 3, 1, 0)).reshape(k * k * cin, cout)
    folded = ((w_mat * scale[None, :]).astype(jnp.bfloat16),
              bias.reshape(1, cout).astype(jnp.float32))
    raw = (w, gamma, beta, rmean, rvar, eps)
    return folded, raw


def make_resblock_params(key, in_c, out_c):
    k1, k2 = jax.random.split(key)
    f1, r1 = _make_conv_bn_params(k1, in_c, out_c)
    f2, r2 = _make_conv_bn_params(k2, out_c, out_c)
    return (f1, f2), (r1, r2)


# ------------------- pure-JAX reference (self-check only) -------------------

def _ref_conv_bn(x, raw, stride, relu):
    w, gamma, beta, rmean, rvar, eps = raw
    y = lax.conv_general_dilated(x, w, (stride, stride), ((1, 1), (1, 1)),
                                 dimension_numbers=("NCHW", "OIHW", "NCHW"))
    scale = gamma / jnp.sqrt(rvar + eps)
    y = (y * scale[None, :, None, None]
         + (beta - rmean * scale)[None, :, None, None])
    return jnp.maximum(y, 0.0) if relu else y


def ref_resblock(x, raw_params, stride=1):
    r1, r2 = raw_params
    out = _ref_conv_bn(x, r1, stride, relu=True)
    out = _ref_conv_bn(out, r2, 1, relu=False)
    identity = (x if out.shape[1] == x.shape[1]
                else jnp.concatenate([x, jnp.zeros_like(x)], axis=1))
    return jnp.maximum(out + identity, 0.0)


# ----------------------------- main -----------------------------

if __name__ == "__main__":
    key = jax.random.PRNGKey(0)
    pkey, xkey, pkey2, xkey2 = jax.random.split(key, 4)

    # case 1: in_channel == out_channel (identity = x)
    params, raw = make_resblock_params(pkey, 32, 32)
    x = jax.random.normal(xkey, (2, 32, 16, 16), jnp.float32)
    out = resblock_forward(x, params, stride=1)
    jax.block_until_ready(out)
    assert out.shape == (2, 32, 16, 16), out.shape
    err = float(jnp.max(jnp.abs(out - ref_resblock(x, raw, stride=1))))
    assert err < 1e-1, f"mismatch vs reference (case 1): {err}"

    # case 2: out_channel == 2 * in_channel (identity = cat(x, zeros))
    params2, raw2 = make_resblock_params(pkey2, 16, 32)
    x2 = jax.random.normal(xkey2, (2, 16, 16, 16), jnp.float32)
    out2 = resblock_forward(x2, params2, stride=1)
    jax.block_until_ready(out2)
    assert out2.shape == (2, 32, 16, 16), out2.shape
    err2 = float(jnp.max(jnp.abs(out2 - ref_resblock(x2, raw2, stride=1))))
    assert err2 < 1e-1, f"mismatch vs reference (case 2): {err2}"

    print("KERNEL_OK")
</pallas_src>

<mosaic_0001>
module attributes {stable_mosaic.version = 11 : i64} {
  func.func @_conv3x3_bn_kernel(%arg0: i32, %arg1: memref<1x342x32xbf16, #tpu.memory_space<vmem>>, %arg2: memref<288x32xbf16, #tpu.memory_space<vmem>>, %arg3: memref<1x32xf32, #tpu.memory_space<vmem>>, %arg4: memref<1x342x32xbf16, #tpu.memory_space<vmem>>) attributes {dimension_semantics = [#tpu.dimension_semantics<parallel>], iteration_bounds = array<i64: 2>, scalar_prefetch = 0 : i64, scratch_operands = 0 : i64, tpu.core_type = #tpu.core_type<tc>, window_params = [{transform_indices = @transform_0, window_bounds = array<i64: 1, 342, 32>}, {pipeline_mode = #tpu.pipeline_mode<synchronous>, transform_indices = @transform_1, window_bounds = array<i64: 288, 32>}, {pipeline_mode = #tpu.pipeline_mode<synchronous>, transform_indices = @transform_2, window_bounds = array<i64: 1, 32>}, {transform_indices = @transform_3, window_bounds = array<i64: 1, 342, 32>}]} {
    %c0 = arith.constant 0 : index
    %c0_0 = arith.constant 0 : index
    %c0_1 = arith.constant 0 : index
    %0 = vector.load %arg1[%c0, %c0_0, %c0_1] : memref<1x342x32xbf16, #tpu.memory_space<vmem>>, vector<1x342x32xbf16>
    %1 = vector.shape_cast %0 : vector<1x342x32xbf16> to vector<342x32xbf16>
    %2 = arith.extf %1 : vector<342x32xbf16> to vector<342x32xf32>
    %3 = vector.extract_strided_slice %2 {offsets = [0, 0], sizes = [288, 32], strides = [1, 1]} : vector<342x32xf32> to vector<288x32xf32>
    %4 = arith.truncf %3 : vector<288x32xf32> to vector<288x32xbf16>
    %c0_2 = arith.constant 0 : index
    %c0_3 = arith.constant 0 : index
    %5 = vector.load %arg2[%c0_2, %c0_3] : memref<288x32xbf16, #tpu.memory_space<vmem>>, vector<32x32xbf16>
    %cst = arith.constant dense<0.000000e+00> : vector<288x32xf32>
    %6 = tpu.matmul %4, %5, %cst {dimension_numbers = #tpu.dot_dimension_numbers<[1], [0], [0], [1], [0, 0, 1, 1], [], []>} : vector<288x32xbf16>, vector<32x32xbf16>, vector<288x32xf32> -> vector<288x32xf32>
    %7 = vector.extract_strided_slice %2 {offsets = [1, 0], sizes = [288, 32], strides = [1, 1]} : vector<342x32xf32> to vector<288x32xf32>
    %8 = arith.truncf %7 : vector<288x32xf32> to vector<288x32xbf16>
    %c32 = arith.constant 32 : index
    %c0_4 = arith.constant 0 : index
    %9 = vector.load %arg2[%c32, %c0_4] : memref<288x32xbf16, #tpu.memory_space<vmem>>, vector<32x32xbf16>
    %cst_5 = arith.constant dense<0.000000e+00> : vector<288x32xf32>
    %10 = tpu.matmul %8, %9, %cst_5 {dimension_numbers = #tpu.dot_dimension_numbers<[1], [0], [0], [1], [0, 0, 1, 1], [], []>} : vector<288x32xbf16>, vector<32x32xbf16>, vector<288x32xf32> -> vector<288x32xf32>
    %11 = arith.addf %6, %10 : vector<288x32xf32>
    %12 = vector.extract_strided_slice %2 {offsets = [2, 0], sizes = [288, 32], strides = [1, 1]} : vector<342x32xf32> to vector<288x32xf32>
    %13 = arith.truncf %12 : vector<288x32xf32> to vector<288x32xbf16>
    %c64 = arith.constant 64 : index
    %c0_6 = arith.constant 0 : index
    %14 = vector.load %arg2[%c64, %c0_6] : memref<288x32xbf16, #tpu.memory_space<vmem>>, vector<32x32xbf16>
    %cst_7 = arith.constant dense<0.000000e+00> : vector<288x32xf32>
    %15 = tpu.matmul %13, %14, %cst_7 {dimension_numbers = #tpu.dot_dimension_numbers<[1], [0], [0], [1], [0, 0, 1, 1], [], []>} : vector<288x32xbf16>, vector<32x32xbf16>, vector<288x32xf32> -> vector<288x32xf32>
    %16 = arith.addf %11, %15 : vector<288x32xf32>
    %17 = vector.extract_strided_slice %2 {offsets = [18, 0], sizes = [288, 32], strides = [1, 1]} : vector<342x32xf32> to vector<288x32xf32>
    %18 = arith.truncf %17 : vector<288x32xf32> to vector<288x32xbf16>
    %c96 = arith.constant 96 : index
    %c0_8 = arith.constant 0 : index
    %19 = vector.load %arg2[%c96, %c0_8] : memref<288x32xbf16, #tpu.memory_space<vmem>>, vector<32x32xbf16>
    %cst_9 = arith.constant dense<0.000000e+00> : vector<288x32xf32>
    %20 = tpu.matmul %18, %19, %cst_9 {dimension_numbers = #tpu.dot_dimension_numbers<[1], [0], [0], [1], [0, 0, 1, 1], [], []>} : vector<288x32xbf16>, vector<32x32xbf16>, vector<288x32xf32> -> vector<288x32xf32>
    %21 = arith.addf %16, %20 : vector<288x32xf32>
    %22 = vector.extract_strided_slice %2 {offsets = [19, 0], sizes = [288, 32], strides = [1, 1]} : vector<342x32xf32> to vector<288x32xf32>
    %23 = arith.truncf %22 : vector<288x32xf32> to vector<288x32xbf16>
    %c128 = arith.constant 128 : index
    %c0_10 = arith.constant 0 : index
    %24 = vector.load %arg2[%c128, %c0_10] : memref<288x32xbf16, #tpu.memory_space<vmem>>, vector<32x32xbf16>
    %cst_11 = arith.constant dense<0.000000e+00> : vector<288x32xf32>
    %25 = tpu.matmul %23, %24, %cst_11 {dimension_numbers = #tpu.dot_dimension_numbers<[1], [0], [0], [1], [0, 0, 1, 1], [], []>} : vector<288x32xbf16>, vector<32x32xbf16>, vector<288x32xf32> -> vector<288x32xf32>
    %26 = arith.addf %21, %25 : vector<288x32xf32>
    %27 = vector.extract_strided_slice %2 {offsets = [20, 0], sizes = [288, 32], strides = [1, 1]} : vector<342x32xf32> to vector<288x32xf32>
    %28 = arith.truncf %27 : vector<288x32xf32> to vector<288x32xbf16>
    %c160 = arith.constant 160 : index
    %c0_12 = arith.constant 0 : index
    %29 = vector.load %arg2[%c160, %c0_12] : memref<288x32xbf16, #tpu.memory_space<vmem>>, vector<32x32xbf16>
    %cst_13 = arith.constant dense<0.000000e+00> : vector<288x32xf32>
    %30 = tpu.matmul %28, %29, %cst_13 {dimension_numbers = #tpu.dot_dimension_numbers<[1], [0], [0], [1], [0, 0, 1, 1], [], []>} : vector<288x32xbf16>, vector<32x32xbf16>, vector<288x32xf32> -> vector<288x32xf32>
    %31 = arith.addf %26, %30 : vector<288x32xf32>
    %32 = vector.extract_strided_slice %2 {offsets = [36, 0], sizes = [288, 32], strides = [1, 1]} : vector<342x32xf32> to vector<288x32xf32>
    %33 = arith.truncf %32 : vector<288x32xf32> to vector<288x32xbf16>
    %c192 = arith.constant 192 : index
    %c0_14 = arith.constant 0 : index
    %34 = vector.load %arg2[%c192, %c0_14] : memref<288x32xbf16, #tpu.memory_space<vmem>>, vector<32x32xbf16>
    %cst_15 = arith.constant dense<0.000000e+00> : vector<288x32xf32>
    %35 = tpu.matmul %33, %34, %cst_15 {dimension_numbers = #tpu.dot_dimension_numbers<[1], [0], [0], [1], [0, 0, 1, 1], [], []>} : vector<288x32xbf16>, vector<32x32xbf16>, vector<288x32xf32> -> vector<288x32xf32>
    %36 = arith.addf %31, %35 : vector<288x32xf32>
    %37 = vector.extract_strided_slice %2 {offsets = [37, 0], sizes = [288, 32], strides = [1, 1]} : vector<342x32xf32> to vector<288x32xf32>
    %38 = arith.truncf %37 : vector<288x32xf32> to vector<288x32xbf16>
    %c224 = arith.constant 224 : index
    %c0_16 = arith.constant 0 : index
    %39 = vector.load %arg2[%c224, %c0_16] : memref<288x32xbf16, #tpu.memory_space<vmem>>, vector<32x32xbf16>
    %cst_17 = arith.constant dense<0.000000e+00> : vector<288x32xf32>
    %40 = tpu.matmul %38, %39, %cst_17 {dimension_numbers = #tpu.dot_dimension_numbers<[1], [0], [0], [1], [0, 0, 1, 1], [], []>} : vector<288x32xbf16>, vector<32x32xbf16>, vector<288x32xf32> -> vector<288x32xf32>
    %41 = arith.addf %36, %40 : vector<288x32xf32>
    %42 = vector.extract_strided_slice %2 {offsets = [38, 0], sizes = [288, 32], strides = [1, 1]} : vector<342x32xf32> to vector<288x32xf32>
    %43 = arith.truncf %42 : vector<288x32xf32> to vector<288x32xbf16>
    %c256 = arith.constant 256 : index
    %c0_18 = arith.constant 0 : index
    %44 = vector.load %arg2[%c256, %c0_18] : memref<288x32xbf16, #tpu.memory_space<vmem>>, vector<32x32xbf16>
    %cst_19 = arith.constant dense<0.000000e+00> : vector<288x32xf32>
    %45 = tpu.matmul %43, %44, %cst_19 {dimension_numbers = #tpu.dot_dimension_numbers<[1], [0], [0], [1], [0, 0, 1, 1], [], []>} : vector<288x32xbf16>, vector<32x32xbf16>, vector<288x32xf32> -> vector<288x32xf32>
    %46 = arith.addf %41, %45 : vector<288x32xf32>
    %c0_20 = arith.constant 0 : index
    %c0_21 = arith.constant 0 : index
    %47 = vector.load %arg3[%c0_20, %c0_21] : memref<1x32xf32, #tpu.memory_space<vmem>>, vector<1x32xf32>
    %48 = vector.broadcast %47 : vector<1x32xf32> to vector<288x32xf32>
    %49 = arith.addf %46, %48 : vector<288x32xf32>
    %cst_22 = arith.constant 0.000000e+00 : f32
    %50 = vector.broadcast %cst_22 : f32 to vector<288x32xf32>
    %51 = arith.maximumf %49, %50 : vector<288x32xf32>
    %52 = tpu.iota {dimensions = array<i32: 0>} : vector<288x32xi32>
    %c18_i32 = arith.constant 18 : i32
    %c0_i32 = arith.constant 0 : i32
    %53 = arith.cmpi eq, %c18_i32, %c0_i32 : i32
    %c1_i32 = arith.constant 1 : i32
    %54 = arith.select %53, %c1_i32, %c18_i32 : i32
    %55 = vector.broadcast %54 : i32 to vector<288x32xi32>
    %56 = arith.remsi %52, %55 : vector<288x32xi32>
    %c0_i32_23 = arith.constant 0 : i32
    %57 = vector.broadcast %c0_i32_23 : i32 to vector<288x32xi32>
    %58 = arith.cmpi ne, %56, %57 : vector<288x32xi32>
    %c0_i32_24 = arith.constant 0 : i32
    %59 = vector.broadcast %c0_i32_24 : i32 to vector<288x32xi32>
    %60 = arith.cmpi slt, %56, %59 : vector<288x32xi32>
    %c0_i32_25 = arith.constant 0 : i32
    %61 = arith.cmpi slt, %54, %c0_i32_25 : i32
    %62 = vector.broadcast %61 : i1 to vector<288x32xi1>
    %63 = vector.broadcast %62 : vector<288x32xi1> to vector<288x32xi1>
    %64 = arith.xori %60, %63 : vector<288x32xi1>
    %65 = arith.andi %64, %58 : vector<288x32xi1>
    %66 = vector.broadcast %54 : i32 to vector<288x32xi32>
    %67 = arith.addi %56, %66 : vector<288x32xi32>
    %68 = arith.select %65, %67, %56 : vector<288x32xi1>, vector<288x32xi32>
    %c16_i32 = arith.constant 16 : i32
    %69 = vector.broadcast %c16_i32 : i32 to vector<288x32xi32>
    %70 = arith.cmpi slt, %68, %69 : vector<288x32xi32>
    %cst_26 = arith.constant 0.000000e+00 : f32
    %71 = vector.broadcast %cst_26 : f32 to vector<288x32xf32>
    %72 = arith.select %70, %51, %71 : vector<288x32xi1>, vector<288x32xf32>
    %cst_27 = arith.constant 0.000000e+00 : f32
    %73 = vector.broadcast %cst_27 : f32 to vector<19x32xf32>
    %cst_28 = arith.constant 0.000000e+00 : f32
    %74 = vector.broadcast %cst_28 : f32 to vector<35x32xf32>
    %75 = tpu.concatenate %73, %72, %74 in 0 : vector<19x32xf32>, vector<288x32xf32>, vector<35x32xf32> -> vector<342x32xf32>
    %76 = arith.truncf %75 : vector<342x32xf32> to vector<342x32xbf16>
    %c0_29 = arith.constant 0 : index
    %c0_30 = arith.constant 0 : index
    %c0_31 = arith.constant 0 : index
    %77 = vector.load %arg4[%c0_29, %c0_30, %c0_31] : memref<1x342x32xbf16, #tpu.memory_space<vmem>>, vector<1x342x32xbf16>
    %78 = vector.shape_cast %77 : vector<1x342x32xbf16> to vector<342x32xbf16>
    %79 = vector.shape_cast %76 : vector<342x32xbf16> to vector<1x342x32xbf16>
    tpu.vector_store %arg4[%c0_29, %c0_30, %c0_31], %79 {strides = array<i32>} : memref<1x342x32xbf16, #tpu.memory_space<vmem>>, vector<1x342x32xbf16>,
    return
  }
  func.func @transform_0(%arg0: i32) -> (i32, i32, i32) {
    %c0_i32 = arith.constant 0 : i32
    %c0_i32_0 = arith.constant 0 : i32
    %c0_i32_1 = arith.constant 0 : i32
    return %arg0, %c0_i32, %c0_i32_0 : i32, i32, i32
  }
  func.func @transform_1(%arg0: i32) -> (i32, i32) {
    %c0_i32 = arith.constant 0 : i32
    %c0_i32_0 = arith.constant 0 : i32
    %c0_i32_1 = arith.constant 0 : i32
    return %c0_i32, %c0_i32_0 : i32, i32
  }
  func.func @transform_2(%arg0: i32) -> (i32, i32) {
    %c0_i32 = arith.constant 0 : i32
    %c0_i32_0 = arith.constant 0 : i32
    %c0_i32_1 = arith.constant 0 : i32
    return %c0_i32, %c0_i32_0 : i32, i32
  }
  func.func @transform_3(%arg0: i32) -> (i32, i32, i32) {
    %c0_i32 = arith.constant 0 : i32
    %c0_i32_0 = arith.constant 0 : i32
    %c0_i32_1 = arith.constant 0 : i32
    return %arg0, %c0_i32, %c0_i32_0 : i32, i32, i32
  }
}

module attributes {stable_mosaic.version = 11 : i64} {
  func.func @_conv3x3_bn_kernel(%arg0: i32, %arg1: memref<1x342x32xbf16, #tpu.memory_space<vmem>>, %arg2: memref<288x32xbf16, #tpu.memory_space<vmem>>, %arg3: memref<1x32xf32, #tpu.memory_space<vmem>>, %arg4: memref<1x342x32xbf16, #tpu.memory_space<vmem>>, %arg5: memref<1x342x32xf32, #tpu.memory_space<vmem>>) attributes {dimension_semantics = [#tpu.dimension_semantics<parallel>], iteration_bounds = array<i64: 2>, scalar_prefetch = 0 : i64, scratch_operands = 0 : i64, tpu.core_type = #tpu.core_type<tc>, window_params = [{transform_indices = @transform_0, window_bounds = array<i64: 1, 342, 32>}, {pipeline_mode = #tpu.pipeline_mode<synchronous>, transform_indices = @transform_1, window_bounds = array<i64: 288, 32>}, {pipeline_mode = #tpu.pipeline_mode<synchronous>, transform_indices = @transform_2, window_bounds = array<i64: 1, 32>}, {transform_indices = @transform_3, window_bounds = array<i64: 1, 342, 32>}, {transform_indices = @transform_4, window_bounds = array<i64: 1, 342, 32>}]} {
    %c0 = arith.constant 0 : index
    %c0_0 = arith.constant 0 : index
    %c0_1 = arith.constant 0 : index
    %0 = vector.load %arg1[%c0, %c0_0, %c0_1] : memref<1x342x32xbf16, #tpu.memory_space<vmem>>, vector<1x342x32xbf16>
    %1 = vector.shape_cast %0 : vector<1x342x32xbf16> to vector<342x32xbf16>
    %2 = arith.extf %1 : vector<342x32xbf16> to vector<342x32xf32>
    %3 = vector.extract_strided_slice %2 {offsets = [0, 0], sizes = [288, 32], strides = [1, 1]} : vector<342x32xf32> to vector<288x32xf32>
    %4 = arith.truncf %3 : vector<288x32xf32> to vector<288x32xbf16>
    %c0_2 = arith.constant 0 : index
    %c0_3 = arith.constant 0 : index
    %5 = vector.load %arg2[%c0_2, %c0_3] : memref<288x32xbf16, #tpu.memory_space<vmem>>, vector<32x32xbf16>
    %cst = arith.constant dense<0.000000e+00> : vector<288x32xf32>
    %6 = tpu.matmul %4, %5, %cst {dimension_numbers = #tpu.dot_dimension_numbers<[1], [0], [0], [1], [0, 0, 1, 1], [], []>} : vector<288x32xbf16>, vector<32x32xbf16>, vector<288x32xf32> -> vector<288x32xf32>
    %7 = vector.extract_strided_slice %2 {offsets = [1, 0], sizes = [288, 32], strides = [1, 1]} : vector<342x32xf32> to vector<288x32xf32>
    %8 = arith.truncf %7 : vector<288x32xf32> to vector<288x32xbf16>
    %c32 = arith.constant 32 : index
    %c0_4 = arith.constant 0 : index
    %9 = vector.load %arg2[%c32, %c0_4] : memref<288x32xbf16, #tpu.memory_space<vmem>>, vector<32x32xbf16>
    %cst_5 = arith.constant dense<0.000000e+00> : vector<288x32xf32>
    %10 = tpu.matmul %8, %9, %cst_5 {dimension_numbers = #tpu.dot_dimension_numbers<[1], [0], [0], [1], [0, 0, 1, 1], [], []>} : vector<288x32xbf16>, vector<32x32xbf16>, vector<288x32xf32> -> vector<288x32xf32>
    %11 = arith.addf %6, %10 : vector<288x32xf32>
    %12 = vector.extract_strided_slice %2 {offsets = [2, 0], sizes = [288, 32], strides = [1, 1]} : vector<342x32xf32> to vector<288x32xf32>
    %13 = arith.truncf %12 : vector<288x32xf32> to vector<288x32xbf16>
    %c64 = arith.constant 64 : index
    %c0_6 = arith.constant 0 : index
    %14 = vector.load %arg2[%c64, %c0_6] : memref<288x32xbf16, #tpu.memory_space<vmem>>, vector<32x32xbf16>
    %cst_7 = arith.constant dense<0.000000e+00> : vector<288x32xf32>
    %15 = tpu.matmul %13, %14, %cst_7 {dimension_numbers = #tpu.dot_dimension_numbers<[1], [0], [0], [1], [0, 0, 1, 1], [], []>} : vector<288x32xbf16>, vector<32x32xbf16>, vector<288x32xf32> -> vector<288x32xf32>
    %16 = arith.addf %11, %15 : vector<288x32xf32>
    %17 = vector.extract_strided_slice %2 {offsets = [18, 0], sizes = [288, 32], strides = [1, 1]} : vector<342x32xf32> to vector<288x32xf32>
    %18 = arith.truncf %17 : vector<288x32xf32> to vector<288x32xbf16>
    %c96 = arith.constant 96 : index
    %c0_8 = arith.constant 0 : index
    %19 = vector.load %arg2[%c96, %c0_8] : memref<288x32xbf16, #tpu.memory_space<vmem>>, vector<32x32xbf16>
    %cst_9 = arith.constant dense<0.000000e+00> : vector<288x32xf32>
    %20 = tpu.matmul %18, %19, %cst_9 {dimension_numbers = #tpu.dot_dimension_numbers<[1], [0], [0], [1], [0, 0, 1, 1], [], []>} : vector<288x32xbf16>, vector<32x32xbf16>, vector<288x32xf32> -> vector<288x32xf32>
    %21 = arith.addf %16, %20 : vector<288x32xf32>
    %22 = vector.extract_strided_slice %2 {offsets = [19, 0], sizes = [288, 32], strides = [1, 1]} : vector<342x32xf32> to vector<288x32xf32>
    %23 = arith.truncf %22 : vector<288x32xf32> to vector<288x32xbf16>
    %c128 = arith.constant 128 : index
    %c0_10 = arith.constant 0 : index
    %24 = vector.load %arg2[%c128, %c0_10] : memref<288x32xbf16, #tpu.memory_space<vmem>>, vector<32x32xbf16>
    %cst_11 = arith.constant dense<0.000000e+00> : vector<288x32xf32>
    %25 = tpu.matmul %23, %24, %cst_11 {dimension_numbers = #tpu.dot_dimension_numbers<[1], [0], [0], [1], [0, 0, 1, 1], [], []>} : vector<288x32xbf16>, vector<32x32xbf16>, vector<288x32xf32> -> vector<288x32xf32>
    %26 = arith.addf %21, %25 : vector<288x32xf32>
    %27 = vector.extract_strided_slice %2 {offsets = [20, 0], sizes = [288, 32], strides = [1, 1]} : vector<342x32xf32> to vector<288x32xf32>
    %28 = arith.truncf %27 : vector<288x32xf32> to vector<288x32xbf16>
    %c160 = arith.constant 160 : index
    %c0_12 = arith.constant 0 : index
    %29 = vector.load %arg2[%c160, %c0_12] : memref<288x32xbf16, #tpu.memory_space<vmem>>, vector<32x32xbf16>
    %cst_13 = arith.constant dense<0.000000e+00> : vector<288x32xf32>
    %30 = tpu.matmul %28, %29, %cst_13 {dimension_numbers = #tpu.dot_dimension_numbers<[1], [0], [0], [1], [0, 0, 1, 1], [], []>} : vector<288x32xbf16>, vector<32x32xbf16>, vector<288x32xf32> -> vector<288x32xf32>
    %31 = arith.addf %26, %30 : vector<288x32xf32>
    %32 = vector.extract_strided_slice %2 {offsets = [36, 0], sizes = [288, 32], strides = [1, 1]} : vector<342x32xf32> to vector<288x32xf32>
    %33 = arith.truncf %32 : vector<288x32xf32> to vector<288x32xbf16>
    %c192 = arith.constant 192 : index
    %c0_14 = arith.constant 0 : index
    %34 = vector.load %arg2[%c192, %c0_14] : memref<288x32xbf16, #tpu.memory_space<vmem>>, vector<32x32xbf16>
    %cst_15 = arith.constant dense<0.000000e+00> : vector<288x32xf32>
    %35 = tpu.matmul %33, %34, %cst_15 {dimension_numbers = #tpu.dot_dimension_numbers<[1], [0], [0], [1], [0, 0, 1, 1], [], []>} : vector<288x32xbf16>, vector<32x32xbf16>, vector<288x32xf32> -> vector<288x32xf32>
    %36 = arith.addf %31, %35 : vector<288x32xf32>
    %37 = vector.extract_strided_slice %2 {offsets = [37, 0], sizes = [288, 32], strides = [1, 1]} : vector<342x32xf32> to vector<288x32xf32>
    %38 = arith.truncf %37 : vector<288x32xf32> to vector<288x32xbf16>
    %c224 = arith.constant 224 : index
    %c0_16 = arith.constant 0 : index
    %39 = vector.load %arg2[%c224, %c0_16] : memref<288x32xbf16, #tpu.memory_space<vmem>>, vector<32x32xbf16>
    %cst_17 = arith.constant dense<0.000000e+00> : vector<288x32xf32>
    %40 = tpu.matmul %38, %39, %cst_17 {dimension_numbers = #tpu.dot_dimension_numbers<[1], [0], [0], [1], [0, 0, 1, 1], [], []>} : vector<288x32xbf16>, vector<32x32xbf16>, vector<288x32xf32> -> vector<288x32xf32>
    %41 = arith.addf %36, %40 : vector<288x32xf32>
    %42 = vector.extract_strided_slice %2 {offsets = [38, 0], sizes = [288, 32], strides = [1, 1]} : vector<342x32xf32> to vector<288x32xf32>
    %43 = arith.truncf %42 : vector<288x32xf32> to vector<288x32xbf16>
    %c256 = arith.constant 256 : index
    %c0_18 = arith.constant 0 : index
    %44 = vector.load %arg2[%c256, %c0_18] : memref<288x32xbf16, #tpu.memory_space<vmem>>, vector<32x32xbf16>
    %cst_19 = arith.constant dense<0.000000e+00> : vector<288x32xf32>
    %45 = tpu.matmul %43, %44, %cst_19 {dimension_numbers = #tpu.dot_dimension_numbers<[1], [0], [0], [1], [0, 0, 1, 1], [], []>} : vector<288x32xbf16>, vector<32x32xbf16>, vector<288x32xf32> -> vector<288x32xf32>
    %46 = arith.addf %41, %45 : vector<288x32xf32>
    %c0_20 = arith.constant 0 : index
    %c0_21 = arith.constant 0 : index
    %47 = vector.load %arg3[%c0_20, %c0_21] : memref<1x32xf32, #tpu.memory_space<vmem>>, vector<1x32xf32>
    %48 = vector.broadcast %47 : vector<1x32xf32> to vector<288x32xf32>
    %49 = arith.addf %46, %48 : vector<288x32xf32>
    %c0_22 = arith.constant 0 : index
    %c0_23 = arith.constant 0 : index
    %c0_24 = arith.constant 0 : index
    %50 = vector.load %arg4[%c0_22, %c0_23, %c0_24] : memref<1x342x32xbf16, #tpu.memory_space<vmem>>, vector<1x342x32xbf16>
    %51 = vector.shape_cast %50 : vector<1x342x32xbf16> to vector<342x32xbf16>
    %52 = arith.extf %51 : vector<342x32xbf16> to vector<342x32xf32>
    %53 = vector.extract_strided_slice %52 {offsets = [19, 0], sizes = [288, 32], strides = [1, 1]} : vector<342x32xf32> to vector<288x32xf32>
    %54 = arith.addf %49, %53 : vector<288x32xf32>
    %cst_25 = arith.constant 0.000000e+00 : f32
    %55 = vector.broadcast %cst_25 : f32 to vector<288x32xf32>
    %56 = arith.maximumf %54, %55 : vector<288x32xf32>
    %57 = tpu.iota {dimensions = array<i32: 0>} : vector<288x32xi32>
    %c18_i32 = arith.constant 18 : i32
    %c0_i32 = arith.constant 0 : i32
    %58 = arith.cmpi eq, %c18_i32, %c0_i32 : i32
    %c1_i32 = arith.constant 1 : i32
    %59 = arith.select %58, %c1_i32, %c18_i32 : i32
    %60 = vector.broadcast %59 : i32 to vector<288x32xi32>
    %61 = arith.remsi %57, %60 : vector<288x32xi32>
    %c0_i32_26 = arith.constant 0 : i32
    %62 = vector.broadcast %c0_i32_26 : i32 to vector<288x32xi32>
    %63 = arith.cmpi ne, %61, %62 : vector<288x32xi32>
    %c0_i32_27 = arith.constant 0 : i32
    %64 = vector.broadcast %c0_i32_27 : i32 to vector<288x32xi32>
    %65 = arith.cmpi slt, %61, %64 : vector<288x32xi32>
    %c0_i32_28 = arith.constant 0 : i32
    %66 = arith.cmpi slt, %59, %c0_i32_28 : i32
    %67 = vector.broadcast %66 : i1 to vector<288x32xi1>
    %68 = vector.broadcast %67 : vector<288x32xi1> to vector<288x32xi1>
    %69 = arith.xori %65, %68 : vector<288x32xi1>
    %70 = arith.andi %69, %63 : vector<288x32xi1>
    %71 = vector.broadcast %59 : i32 to vector<288x32xi32>
    %72 = arith.addi %61, %71 : vector<288x32xi32>
    %73 = arith.select %70, %72, %61 : vector<288x32xi1>, vector<288x32xi32>
    %c16_i32 = arith.constant 16 : i32
    %74 = vector.broadcast %c16_i32 : i32 to vector<288x32xi32>
    %75 = arith.cmpi slt, %73, %74 : vector<288x32xi32>
    %cst_29 = arith.constant 0.000000e+00 : f32
    %76 = vector.broadcast %cst_29 : f32 to vector<288x32xf32>
    %77 = arith.select %75, %56, %76 : vector<288x32xi1>, vector<288x32xf32>
    %cst_30 = arith.constant 0.000000e+00 : f32
    %78 = vector.broadcast %cst_30 : f32 to vector<19x32xf32>
    %cst_31 = arith.constant 0.000000e+00 : f32
    %79 = vector.broadcast %cst_31 : f32 to vector<35x32xf32>
    %80 = tpu.concatenate %78, %77, %79 in 0 : vector<19x32xf32>, vector<288x32xf32>, vector<35x32xf32> -> vector<342x32xf32>
    %c0_32 = arith.constant 0 : index
    %c0_33 = arith.constant 0 : index
    %c0_34 = arith.constant 0 : index
    %81 = vector.load %arg5[%c0_32, %c0_33, %c0_34] : memref<1x342x32xf32, #tpu.memory_space<vmem>>, vector<1x342x32xf32>
    %82 = vector.shape_cast %81 : vector<1x342x32xf32> to vector<342x32xf32>
    %83 = vector.shape_cast %80 : vector<342x32xf32> to vector<1x342x32xf32>
    tpu.vector_store %arg5[%c0_32, %c0_33, %c0_34], %83 {strides = array<i32>} : memref<1x342x32xf32, #tpu.memory_space<vmem>>, vector<1x342x32xf32>,
    return
  }
  func.func @transform_0(%arg0: i32) -> (i32, i32, i32) {
    %c0_i32 = arith.constant 0 : i32
    %c0_i32_0 = arith.constant 0 : i32
    %c0_i32_1 = arith.constant 0 : i32
    return %arg0, %c0_i32, %c0_i32_0 : i32, i32, i32
  }
  func.func @transform_1(%arg0: i32) -> (i32, i32) {
    %c0_i32 = arith.constant 0 : i32
    %c0_i32_0 = arith.constant 0 : i32
    %c0_i32_1 = arith.constant 0 : i32
    return %c0_i32, %c0_i32_0 : i32, i32
  }
  func.func @transform_2(%arg0: i32) -> (i32, i32) {
    %c0_i32 = arith.constant 0 : i32
    %c0_i32_0 = arith.constant 0 : i32
    %c0_i32_1 = arith.constant 0 : i32
    return %c0_i32, %c0_i32_0 : i32, i32
  }
  func.func @transform_3(%arg0: i32) -> (i32, i32, i32) {
    %c0_i32 = arith.constant 0 : i32
    %c0_i32_0 = arith.constant 0 : i32
    %c0_i32_1 = arith.constant 0 : i32
    return %arg0, %c0_i32, %c0_i32_0 : i32, i32, i32
  }
  func.func @transform_4(%arg0: i32) -> (i32, i32, i32) {
    %c0_i32 = arith.constant 0 : i32
    %c0_i32_0 = arith.constant 0 : i32
    %c0_i32_1 = arith.constant 0 : i32
    return %arg0, %c0_i32, %c0_i32_0 : i32, i32, i32
  }
}

</mosaic_0001>

<bundles_post_ra>
// kernel: resblock_forward.3
= control target key start
LH: loop header
LB: loop body
LE: loop exit
PB: predicated region body
PF: predicated region fallthrough
CT: control target
= control target key end

     0   :  { %s5733_s15 = smov 0   ;;  %s8534_s0 = inlined_call_operand.vmem [shape: bf16[2,342,32], index: 0, kind: input, shape index: {}]   ;;  %s8535_s1 = inlined_call_operand.vmem [shape: bf16[288,32], index: 1, kind: input, shape index: {}]   ;;  %s8536_s2 = inlined_call_operand.vmem [shape: f32[1,32], index: 2, kind: input, shape index: {}]   ;;  %s8537_s3 = inlined_call_operand.vmem [shape: bf16[2,342,32], index: 3, kind: input, shape index: {}]   ;;  %s8538_s4 = inlined_call_operand.vmem [shape: f32[2,342,32], index: 4, kind: output, shape index: {}]  }
   0x1 LB: > { %s4431_s16 = sadd.s32 4294967295, %s5705_s15   ;;  %p4435_p0 = scmp.ge.s32.totalorder %s5705_s15, 1  ;;  %s5705_s15 = sphi %s5733_s15, %s14_s15  }
   0x2   : > { %p172_p1 = scmp.lt.s32.totalorder %s5705_s15, 3 }
   0x4   : > { %p173_p2 = pnand %p4435_p0, %p172_p1 }
   0x6   : > { %176 = sbr.rel (%p173_p2) target bundleno = 603 (0x25b), region = 36 }
   0xd   : > { %v5744_v0 = vld [vmem:[%s8535_s1 + $0x40] sm:$0xff]   ;;  %p203_p3 = scmp.lt.s32.totalorder %s4431_s16, 1  ;;  %v5651_v1 = vld [vmem:[%s8535_s1 + $0x10] sm:$0xff]   ;;  %v5652_v2 = vld [vmem:[%s8535_s1 + $0x48] sm:$0xff]   ;;  %vm328_vm0 = vsmask.f32 7424 }
   0xe   : > { %5075 = vmatprep.subr.bf16.mxu0 %v5744_v0  ;;  %4915 = vmatprep.subr.bf16.mxu1 %v5651_v1  ;;  %v5653_v3 = vld [vmem:[%s8535_s1 + $0x18] sm:$0xff]   ;;  %v5763_v4 = vld [vmem:[%s8535_s1 + $0x50] sm:$0xff]   ;;  %v5659_v5 = vld [vmem:[%s8535_s1] sm:$0xff]   ;;  %vm1533_vm1 = vsmask.f32 6400  ;;  %vm8571_vm2 = vcmask 261120  }
   0xf   : > { %s9186_s16 = smov (!%p203_p3, %s4431_s16), 1  ;;  %5076 = vmatpush3.bf16.msra.mxu0 %v5744_v0  ;;  %4916 = vmatpush3.bf16.msra.mxu1 %v5651_v1  ;;  %v5664_v48 = vld [vmem:[%s8535_s1 + $0x58] sm:$0xff]   ;;  %vm1902_vm3 = vcmask 1045504   ;;  %vm2466_vm4 = vsmask.f32 5376  ;;  %vm969_vm5 = vcmask 1046528  }
  0x10   : > { %5077 = vmatprep.subr.bf16.mxu0 %v5652_v2  ;;  %s5567_s25 = smul.u32 172, %s9186_s16  ;;  %4917 = vmatprep.subr.bf16.mxu1 %v5653_v3  ;;  %vm8572_vm6 = vcmask 1044480  }
  0x12   : > { %s5773_s6 = scalar_lea.vmem %s8534_s0, %s5567_s25  ;;  %s6684_s14 = scalar_lea.vmem %s8537_s3, %s5567_s25 }
  0x13   : > { %5078 = vmatpush3.bf16.msra.mxu0 %v5652_v2  ;;  %4918 = vmatpush3.bf16.msra.mxu1 %v5653_v3  ;;  %v5776_v6 = vld [vmem:[%s5773_s6] sm:$0xff]   ;;  %v5779_v7 = vld [vmem:[%s5773_s6 + $0x8] sm:$0xff]   ;;  %v5783_v8 = vld [vmem:[%s5773_s6 + $0x10] sm:$0xff]   ;;  %s5568_s25 = smul.u32 344, %s9186_s16 }
  0x14   : > { %5115 = vmatprep.subr.bf16.mxu0 %v5763_v4  ;;  %4955 = vmatprep.subr.bf16.mxu1 %v5659_v5  ;;  %v330_v9 = vshrl.u32 %v5776_v6, 16  ;;  %v332_v10 = vshll.u32 %v5776_v6, 16  ;;  %v337_v11 = vshll.u32 %v5779_v7, 16  ;;  %v341_v12 = vshrl.u32 %v5779_v7, 16  ;;  %v5796_v15 = vld [vmem:[%s5773_s6 + $0x18] sm:$0xff]   ;;  %v5799_v16 = vld [vmem:[%s5773_s6 + $0x20] sm:$0xff]  }
  0x15   : > { %v5790_v13 = vshll.u32 %v5783_v8, 16  ;;  %v5793_v14 = vshrl.u32 %v5783_v8, 16  ;;  %v5805_v24 = vshll.u32 %v5796_v15, 16  ;;  %v5808_v28 = vshrl.u32 %v5796_v15, 16  ;;  %v5811_v29 = vld [vmem:[%s5773_s6 + $0x28] sm:$0xff]   ;;  %v5823_v38 = vld [vmem:[%s5773_s6 + $0x30] sm:$0xff]   ;;  %s7578_s18 = scalar_lea.vmem %s8538_s4, %s5568_s25 }
  0x16   : > { %v334_v17 = vrot.slane %v332_v10, 1  ;;  %v339_v18 = vrot.slane %v337_v11, 1  ;;  %v1534_v19 = vrot.slane %v341_v12, 1  ;;  %v1535_v20 = vrot.slane %v337_v11, 2  ;;  %v5833_v43 = vld [vmem:[%s5773_s6 + $0x38] sm:$0xff]   ;;  %v5864_v60 = vld [vmem:[%s5773_s6 + $0x40] sm:$0xff]  }
  0x17   : > { %v1537_v21 = vrot.slane %v5793_v14, 1  ;;  %v1538_v22 = vrot.slane %v5790_v13, 2  ;;  %v347_v23 = vrot.slane %v5790_v13, 1  ;;  %v1542_v31 = vrot.slane %v5805_v24, 2 }
  0x18   : > { %v335_v25 = vor.u32 %v334_v17, %v330_v9  ;;  %v343_v26 = vor.u32 %v341_v12, %v339_v18  ;;  %v1536_v27 = vor.u32 %v1535_v20, %v1534_v19  ;;  %v355_v33 = vrot.slane %v5805_v24, 1  ;;  %v5879_v9 = vld [vmem:[%s5773_s6 + $0x48] sm:$0xff]   ;;  %v5889_v17 = vld [vmem:[%s8535_s1 + $0x60] sm:$0xff]  }
  0x19   : > { %v1539_v30 = vor.u32 %v1538_v22, %v1537_v21  ;;  %v351_v32 = vor.u32 %v5793_v14, %v347_v23  ;;  %v1541_v36 = vrot.slane %v5808_v28, 1  ;;  %v5820_v37 = vshll.u32 %v5799_v16, 16 }
  0x1a   : > { %v340_v34 = vsel %vm328_vm0, %v335_v25, %v339_v18  ;;  %v348_v35 = vsel %vm328_vm0, %v343_v26, %v347_v23  ;;  %v5829_v41 = vshrl.u32 %v5799_v16, 16  ;;  %v359_v42 = vor.u32 %v5808_v28, %v355_v33  ;;  %v5902_v25 = vld [vmem:[%s5773_s6 + $0x50] sm:$0xff]   ;;  %v5671_v26 = vld [vmem:[%s8535_s1 + $0x8] sm:$0xff]  }
  0x1b   : > { %4919 = vmatprep.mubr.msk.bf16.mxu1 %vm8571_vm2, %v340_v34  ;;  %v1540_v39 = vsel %vm1533_vm1, %v1536_v27, %v1539_v30  ;;  %v356_v40 = vsel %vm328_vm0, %v351_v32, %v355_v33  ;;  %v1543_v44 = vor.u32 %v1542_v31, %v1541_v36  ;;  %v1546_v45 = vrot.slane %v5820_v37, 2 }
  0x1c   : > { %5079 = vmatprep.mubr.msk.bf16.mxu0 %vm8571_vm2, %v1540_v39  ;;  %4920 = vmatmul.mubr.msk.bf16.vlgmr.msra.gmra.mrb[0].mxu1 %vm8571_vm2, %v348_v35  ;;  %v363_v46 = vrot.slane %v5820_v37, 1  ;;  %v5840_v47 = vshll.u32 %v5811_v29, 16  ;;  %v1545_v49 = vrot.slane %v5829_v41, 1  ;;  %v5848_v50 = vshrl.u32 %v5811_v29, 16 }
  0x1d   : > { %4923 = vmatprep.mubr.msk.bf16.mxu1 %vm8571_vm2, %v356_v40  ;;  %4956 = vmatpush3.bf16.msra.mxu1 %v5659_v5  ;;  %v5851_v51 = vshll.u32 %v5823_v38, 16  ;;  %v5854_v52 = vshrl.u32 %v5823_v38, 16  ;;  %v1544_v53 = vsel %vm1533_vm1, %v1539_v30, %v1543_v44  ;;  %v5869_v62 = vshll.u32 %v5833_v43, 16 }
  0x1e   : > { %v1550_v54 = vrot.slane %v5840_v47, 2  ;;  %v367_v55 = vor.u32 %v5829_v41, %v363_v46  ;;  %5080 = vmatmul.mubr.msk.bf16.vlgmr.msra.gmra.mrb[0].mxu0 %vm8571_vm2, %v1544_v53  ;;  %v1547_v56 = vor.u32 %v1546_v45, %v1545_v49  ;;  %v1549_v57 = vrot.slane %v5848_v50, 1  ;;  %4957 = vmatprep.subr.bf16.mxu1 %v5671_v26  ;;  %v5933_v49 = vld [vmem:[%s5773_s6 + $0x58] sm:$0xff]  }
  0x1f   : > { %v371_v58 = vrot.slane %v5840_v47, 1  ;;  %v1553_v59 = vrot.slane %v5854_v52, 1  ;;  %5116 = vmatpush3.bf16.msra.mxu0 %v5763_v4  ;;  %v1554_v61 = vrot.slane %v5851_v51, 2  ;;  %v5872_v63 = vshrl.u32 %v5833_v43, 16 }
  0x20   : > { %v1548_v1 = vsel %vm1533_vm1, %v1543_v44, %v1547_v56  ;;  %v364_v2 = vsel %vm328_vm0, %v359_v42, %v363_v46  ;;  %v1551_v3 = vor.u32 %v1550_v54, %v1549_v57  ;;  %5117 = vmatprep.subr.bf16.mxu0 %v5664_v48  ;;  %v379_v10 = vrot.slane %v5851_v51, 1 }
  0x21   : > { %5083 = vmatprep.mubr.msk.bf16.mxu0 %vm8571_vm2, %v1548_v1  ;;  %v372_v5 = vsel %vm328_vm0, %v367_v55, %v371_v58  ;;  %v1555_v4 = vor.u32 %v1554_v61, %v1553_v59  ;;  %v1557_v11 = vrot.slane %v5872_v63, 1  ;;  %v5884_v12 = vshll.u32 %v5864_v60, 16  ;;  %4958 = vmatpush3.bf16.msra.mxu1 %v5671_v26  ;;  %v5945_v59 = vld [vmem:[%s8535_s1 + $0x20] sm:$0xff]  }
  0x22   : > { %v1552_v18 = vsel %vm1533_vm1, %v1547_v56, %v1551_v3  ;;  %v1558_v19 = vrot.slane %v5869_v62, 2  ;;  %v5895_v20 = vshrl.u32 %v5864_v60, 16  ;;  %v375_v22 = vor.u32 %v5848_v50, %v371_v58  ;;  %4995 = vmatprep.subr.bf16.mxu1 %v5945_v59 }
  0x23   : > { %5118 = vmatpush3.bf16.msra.mxu0 %v5664_v48  ;;  %v1556_v21 = vsel %vm1533_vm1, %v1551_v3, %v1555_v4  ;;  %v1562_v23 = vrot.slane %v5884_v12, 2  ;;  %v383_v27 = vor.u32 %v5854_v52, %v379_v10  ;;  %v387_v30 = vrot.slane %v5869_v62, 1 }
  0x24   : > { %4924 = vmatmul.mubr.msk.bf16.gmra.mrb[4].mxu1 %vm8571_vm2, %v364_v2  ;;  %5155 = vmatprep.subr.bf16.mxu0 %v5889_v17  ;;  %v1561_v31 = vrot.slane %v5895_v20, 1  ;;  %v1559_v32 = vor.u32 %v1558_v19, %v1557_v11  ;;  %v5914_v33 = vshll.u32 %v5879_v9, 16  ;;  %v5917_v34 = vshrl.u32 %v5879_v9, 16 }
  0x25   : > { %4927 = vmatprep.mubr.msk.bf16.mxu1 %vm8571_vm2, %v372_v5  ;;  %v380_v35 = vsel %vm328_vm0, %v375_v22, %v379_v10  ;;  %v5921_v39 = vshll.u32 %v5902_v25, 16  ;;  %v5924_v40 = vshrl.u32 %v5902_v25, 16  ;;  %v388_v42 = vsel %vm328_vm0, %v383_v27, %v387_v30  ;;  %v5959_v10 = vld [vmem:[%s5773_s6 + $0x88] sm:$0xff]  }
  0x26   : > { %5084 = vmatmul.mubr.msk.bf16.gmra.mrb[4].mxu0 %vm8571_vm2, %v1552_v18  ;;  %v1563_v36 = vor.u32 %v1562_v23, %v1561_v31  ;;  %v1560_v44 = vsel %vm1533_vm1, %v1555_v4, %v1559_v32  ;;  %v395_v45 = vrot.slane %v5884_v12, 1  ;;  %v1565_v46 = vrot.slane %v5917_v34, 1  ;;  %v5963_v18 = vld [vmem:[%s5773_s6 + $0x60] sm:$0xff]   ;;  %v255_v23 = vld [vmem:[%s5773_s6 + $0x90] sm:$0xf] }
  0x27   : > { %5087 = vmatprep.mubr.msk.bf16.mxu0 %vm8571_vm2, %v1556_v21  ;;  %v1566_v48 = vrot.slane %v5914_v33, 2  ;;  %v391_v54 = vor.u32 %v5872_v63, %v387_v30  ;;  %v1569_v55 = vrot.slane %v5924_v40, 1  ;;  %v1570_v56 = vrot.slane %v5921_v39, 2  ;;  %v5974_v30 = vld [vmem:[%s5773_s6 + $0x68] sm:$0xff]  }
  0x28   : > { %v1564_v53 = vsel %vm1533_vm1, %v1559_v32, %v1563_v36  ;;  %v399_v57 = vor.u32 %v5895_v20, %v395_v45  ;;  %v403_v58 = vrot.slane %v5914_v33, 1  ;;  %v5950_v1 = vshll.u32 %v5933_v49, 16 }
  0x29   : > { %v1567_v61 = vor.u32 %v1566_v48, %v1565_v46  ;;  %v5953_v2 = vshrl.u32 %v5933_v49, 16  ;;  %v396_v3 = vsel %vm328_vm0, %v391_v54, %v395_v45  ;;  %v1571_v5 = vor.u32 %v1570_v56, %v1569_v55 }
  0x2a   : > { %8650 = vst [vmem:[#allocation2_spill] sm:$0xff] %v5950_v1  ;;  %v404_v4 = vsel %vm328_vm0, %v399_v57, %v403_v58  ;;  %v411_v11 = vrot.slane %v5921_v39, 1  ;;  %v1574_v22 = vrot.slane %v5950_v1, 2  ;;  %v407_v27 = vor.u32 %v5917_v34, %v403_v58 }
  0x2b   : > { %8651 = vst [vmem:[#allocation3_spill] sm:$0xff] %v5953_v2  ;;  %v1568_v19 = vsel %vm1533_vm1, %v1563_v36, %v1567_v61  ;;  %v1573_v21 = vrot.slane %v5953_v2, 1  ;;  %v1572_v26 = vsel %vm1533_vm1, %v1567_v61, %v1571_v5  ;;  %v419_v32 = vrot.slane %v5950_v1, 1 }
  0x2c   : > { %4928 = vmatmul.mubr.msk.bf16.gmra.mrb[8].mxu1 %vm8571_vm2, %v380_v35  ;;  %v415_v31 = vor.u32 %v5924_v40, %v411_v11  ;;  %v5979_v35 = vshll.u32 %v5959_v10, 16  ;;  %v5982_v36 = vcombine.low %v255_v23, %v255_v23  ;;  %v5991_v45 = vshll.u32 %v5963_v18, 16 }
  0x2d   : > { %4931 = vmatprep.mubr.msk.bf16.mxu1 %vm8571_vm2, %v388_v42  ;;  %v5985_v42 = vshrl.u32 %v5959_v10, 16  ;;  %v412_v48 = vsel %vm328_vm0, %v407_v27, %v411_v11  ;;  %v1904_v54 = vrot.slane %v5783_v8, 2  ;;  %v6000_v57 = vshrl.u32 %v5963_v18, 16 }
  0x2e   : > { %5088 = vmatmul.mubr.msk.bf16.gmra.mrb[8].mxu0 %vm8571_vm2, %v1560_v44  ;;  %8652 = vst [vmem:[#allocation4_spill] sm:$0xff] %v5982_v36  ;;  %v5988_v44 = vor.u32 %v1574_v22, %v1573_v21  ;;  %8655 = vst [vmem:[#allocation7_spill] sm:$0xff] %v5991_v45  ;;  %v8539_v46 = vrot.slane %v5979_v35, 1  ;;  %v473_v55 = vshll.u32 %v5982_v36, 16  ;;  %v420_v56 = vsel %vm328_vm0, %v415_v31, %v419_v32 }
  0x2f   : > { %5091 = vmatprep.mubr.msk.bf16.mxu0 %vm8571_vm2, %v1564_v53  ;;  %8653 = vst [vmem:[#allocation5_spill] sm:$0xff] %v5985_v42  ;;  %v1903_v53 = vrot.slane %v5779_v7, 2  ;;  %8656 = vst [vmem:[#allocation8_spill] sm:$0xff] %v6000_v57  ;;  %v6003_v58 = vshll.u32 %v5974_v30, 16  ;;  %v427_v11 = vrot.slane %v5991_v45, 1  ;;  %v423_v22 = vor.u32 %v5953_v2, %v419_v32 }
  0x30   : > { %8654 = vst [vmem:[#allocation6_spill] sm:$0xff] %v5988_v44  ;;  %v471_v61 = vor.u32 %v5985_v42, %v8539_v46  ;;  %v6051_v46 = vld [vmem:[%s5773_s6 + $0x80] sm:$0xff]   ;;  %v5679_v42 = vld [vmem:[%s8535_s1 + $0x68] sm:$0xff]   ;;  %v2474_v2 = vrot.slane %v5829_v41, 2  ;;  %v2475_v36 = vrot.slane %v5820_v37, 3  ;;  %v1918_v37 = vrot.slane %v5879_v9, 2 }
  0x31   : > { %8657 = vst [vmem:[#allocation9_spill] sm:$0xff] %v6003_v58  ;;  %v1905_v21 = vsel %vm1902_vm3, %v1903_v53, %v1904_v54  ;;  %v431_v27 = vor.u32 %v6000_v57, %v427_v11  ;;  %v435_v31 = vrot.slane %v6003_v58, 1  ;;  %v428_v32 = vsel %vm328_vm0, %v423_v22, %v427_v11 }
  0x32   : > { %v6093_v45 = vshrl.u32 %v6051_v46, 16  ;;  %v2478_v41 = vrot.slane %v5848_v50, 2 }
  0x34   : > { %4932 = vmatmul.mubr.msk.bf16.gmra.mrb[12].mxu1 %vm8571_vm2, %v396_v3  ;;  %v475_v3 = vrot.slane %v473_v55, 1  ;;  %v1908_v55 = vrot.slane %v5799_v16, 2  ;;  %8665 = vst [vmem:[#allocation17_spill] sm:$0xff] %v6093_v45 }
  0x35   : > { %4935 = vmatprep.mubr.msk.bf16.mxu1 %vm8571_vm2, %v404_v4  ;;  %v1576_v4 = vsel %vm1533_vm1, %v1571_v5, %v5988_v44  ;;  %v6024_v5 = vld [vmem:[%s5773_s6 + $0x78] sm:$0xff]  }
  0x36   : > { %5092 = vmatmul.mubr.msk.bf16.gmra.mrb[12].mxu0 %vm8571_vm2, %v1568_v19  ;;  %v6013_v19 = vld [vmem:[%s5773_s6 + $0x70] sm:$0xff]  }
  0x37   : > { %5095 = vmatprep.mubr.msk.bf16.mxu0 %vm8571_vm2, %v1572_v26  ;;  %v6019_v26 = vsel %vm328_vm0, %v471_v61, %v475_v3  ;;  %v6030_v53 = vshll.u32 %v6013_v19, 16  ;;  %v436_v61 = vsel %vm328_vm0, %v431_v27, %v435_v31  ;;  %v6039_v3 = vshrl.u32 %v6013_v19, 16 }
  0x39   : > { %8658 = vst [vmem:[#allocation10_spill] sm:$0xff] %v6030_v53  ;;  %8660 = vst [vmem:[#allocation12_spill] sm:$0xff] %v6039_v3  ;;  %v443_v22 = vrot.slane %v6030_v53, 1  ;;  %v6068_v53 = vld [vmem:[%s5773_s6 + $0x98] sm:$0xf] }
  0x3c   : > { %4936 = vmatmul.mubr.msk.bf16.gmra.mrb[16].mxu1 %vm8571_vm2, %v412_v48  ;;  %v1906_v48 = vrot.slane %v5796_v15, 2 }
  0x3d   : > { %4939 = vmatprep.mubr.msk.bf16.mxu1 %vm8571_vm2, %v420_v56  ;;  %v6035_v56 = vshrl.u32 %v5974_v30, 16 }
  0x3e   : > { %5096 = vmatmul.mubr.msk.bf16.gmra.mrb[16].mxu0 %vm8571_vm2, %v1576_v4  ;;  %v6042_v4 = vshll.u32 %v6024_v5, 16  ;;  %v6047_v11 = vsel %vm1902_vm3, %v1904_v54, %v1906_v48  ;;  %v6055_v27 = vsel %vm1902_vm3, %v1906_v48, %v1908_v55  ;;  %v6076_v48 = vshll.u32 %v6051_v46, 16 }
  0x3f   : > { %5119 = vmatprep.mubr.msk.bf16.mxu0 %vm8571_vm2, %v1905_v21  ;;  %8659 = vst [vmem:[#allocation11_spill] sm:$0xff] %v6035_v56  ;;  %v256_v21 = vld [vmem:[%s5773_s6 + $0x94] sm:$0xf]  ;;  %v439_v44 = vor.u32 %v6035_v56, %v435_v31  ;;  %v1910_v31 = vrot.slane %v5811_v29, 2 }
  0x40   : > { %8661 = vst [vmem:[#allocation13_spill] sm:$0xff] %v6042_v4  ;;  %v451_v54 = vrot.slane %v6042_v4, 1  ;;  %v6063_v58 = vcombine.low %v255_v23, %v256_v21  ;;  %8663 = vst [vmem:[#allocation15_spill] sm:$0xff] %v6076_v48  ;;  %v1912_v21 = vrot.slane %v5823_v38, 2  ;;  %v459_v57 = vrot.slane %v6076_v48, 1 }
  0x41   : > { %v444_v23 = vsel %vm328_vm0, %v439_v44, %v443_v22  ;;  %v1916_v48 = vrot.slane %v5864_v60, 2 }
  0x42   : > { %8662 = vst [vmem:[#allocation14_spill] sm:$0xff] %v6063_v58 }
  0x44   : > { %4940 = vmatmul.mubr.msk.bf16.gmra.mrb[20].mxu1 %vm8571_vm2, %v428_v32  ;;  %v447_v32 = vor.u32 %v6039_v3, %v443_v22  ;;  %v6084_v3 = vshrl.u32 %v6024_v5, 16  ;;  %v6101_v22 = vsel %vm1902_vm3, %v1908_v55, %v1910_v31  ;;  %v463_v55 = vor.u32 %v6093_v45, %v459_v57 }
  0x45   : > { %4943 = vmatprep.mubr.msk.bf16.mxu1 %vm8571_vm2, %v436_v61  ;;  %v258_v61 = vld [vmem:[%s5773_s6 + $0x9c] sm:$0xf] }
  0x46   : > { %5120 = vmatmul.mubr.msk.bf16.vlgmr.msra.gmra.mrb[0].mxu0 %vm8571_vm2, %v6047_v11  ;;  %v6079_v4 = vcombine.low %v6068_v53, %v258_v61  ;;  %8664 = vst [vmem:[#allocation16_spill] sm:$0xff] %v6084_v3  ;;  %v452_v56 = vsel %vm328_vm0, %v447_v32, %v451_v54  ;;  %v6096_v61 = vrot.slane %v6063_v58, 2  ;;  %v6112_v58 = vsel %vm1902_vm3, %v1910_v31, %v1912_v21 }
  0x47   : > { %5156 = vmatpush3.bf16.msra.mxu0 %v5889_v17  ;;  %5123 = vmatprep.mubr.msk.bf16.mxu0 %vm8571_vm2, %v6055_v27  ;;  %v6089_v17 = vld [vmem:[%s8535_s1 + $0x70] sm:$0xff]   ;;  %v455_v1 = vor.u32 %v6084_v3, %v451_v54  ;;  %v2470_v31 = vrot.slane %v5808_v28, 2  ;;  %v2471_v54 = vrot.slane %v5805_v24, 3  ;;  %v8666_v3 = vrot.slane %v5979_v35, 1 }
  0x48   : > { %5157 = vmatprep.subr.bf16.mxu0 %v5679_v42  ;;  %v8560_v44 = vrot.slane %v6079_v4, 2 }
  0x4a   : > { %v6108_v32 = vsel %vm1902_vm3, %v6096_v61, %v8560_v44  ;;  %v460_v44 = vsel %vm328_vm0, %v455_v1, %v459_v57  ;;  %v2476_v1 = vor.u32 %v2475_v36, %v2474_v2  ;;  %v2479_v2 = vrot.slane %v5840_v47, 3 }
  0x4b   : > { %5158 = vmatpush3.bf16.msra.mxu0 %v5679_v42  ;;  %v2467_v42 = vrot.slane %v5793_v14, 2  ;;  %v468_v14 = vsel %vm328_vm0, %v463_v55, %v8666_v3  ;;  %v1920_v36 = vrot.slane %v5902_v25, 2  ;;  %v6160_v55 = vsel %vm1902_vm3, %v1916_v48, %v1918_v37 }
  0x4c   : > { %4944 = vmatmul.mubr.msk.bf16.gmra.mrb[24].mxu1 %vm8571_vm2, %v444_v23  ;;  %5195 = vmatprep.subr.bf16.mxu0 %v6089_v17  ;;  %v2468_v23 = vrot.slane %v5790_v13, 3  ;;  %v2472_v13 = vor.u32 %v2471_v54, %v2470_v31  ;;  %v5683_v31 = vld [vmem:[%s8535_s1 + $0x28] sm:$0xff]   ;;  %v2490_v54 = vrot.slane %v5895_v20, 2 }
  0x4d   : > { %4947 = vmatprep.mubr.msk.bf16.mxu1 %vm8571_vm2, %v452_v56  ;;  %v1914_v56 = vrot.slane %v5833_v43, 2  ;;  %v6168_v47 = vsel %vm1902_vm3, %v1918_v37, %v1920_v36  ;;  %v2494_v37 = vrot.slane %v5917_v34, 2 }
  0x4e   : > { %5124 = vmatmul.mubr.msk.bf16.gmra.mrb[4].mxu0 %vm8571_vm2, %v6101_v22  ;;  %v2469_v45 = vor.u32 %v2468_v23, %v2467_v42  ;;  %v6145_v3 = vsel %vm2466_vm4, %v2472_v13, %v2476_v1  ;;  %v1924_v23 = vrot.slane %v5963_v18, 2 }
  0x4f   : > { %5127 = vmatprep.mubr.msk.bf16.mxu0 %vm8571_vm2, %v6112_v58  ;;  %v6135_v28 = vsel %vm1902_vm3, %v1912_v21, %v1914_v56  ;;  %v6142_v57 = vsel %vm1902_vm3, %v1914_v56, %v1916_v48  ;;  %v2482_v21 = vrot.slane %v5854_v52, 2  ;;  %v2486_v52 = vrot.slane %v5872_v63, 2 }
  0x50   : > { %v6138_v24 = vsel %vm2466_vm4, %v2469_v45, %v2472_v13  ;;  %v2480_v45 = vor.u32 %v2479_v2, %v2478_v41  ;;  %v1922_v48 = vrot.slane %v5933_v49, 2  ;;  %v2495_v41 = vrot.slane %v5914_v33, 3 }
  0x51   : > { %v1928_v2 = vrot.slane %v6013_v19, 2 }
  0x52   : > { %v6163_v42 = vsel %vm2466_vm4, %v2476_v1, %v2480_v45  ;;  %v6197_v1 = vsel %vm1902_vm3, %v1922_v48, %v1924_v23 }
  0x54   : > { %4948 = vmatmul.mubr.msk.bf16.gmra.mrb[28].mxu1 %vm8571_vm2, %v460_v44  ;;  %v2483_v44 = vrot.slane %v5851_v51, 3 }
  0x55   : > { %4951 = vmatprep.mubr.msk.bf16.mxu1 %vm8571_vm2, %v468_v14  ;;  %v2491_v14 = vrot.slane %v5884_v12, 3  ;;  %v6203_v12 = vld [vmem:[%s8535_s1 + $0x30] sm:$0xff]  }
  0x56   : > { %5128 = vmatmul.mubr.msk.bf16.gmra.mrb[8].mxu0 %vm8571_vm2, %v6135_v28  ;;  %v2484_v50 = vor.u32 %v2483_v44, %v2482_v21  ;;  %v2499_v21 = vrot.slane %v5921_v39, 3 }
  0x57   : > { %5131 = vmatprep.mubr.msk.bf16.mxu0 %vm8571_vm2, %v6142_v57  ;;  %v2492_v13 = vor.u32 %v2491_v14, %v2490_v54 }
  0x58   : > { %v6173_v51 = vsel %vm2466_vm4, %v2480_v45, %v2484_v50  ;;  %v2498_v45 = vrot.slane %v5924_v40, 2  ;;  %v1930_v40 = vrot.slane %v6024_v5, 2 }
  0x5a   : > { %v6227_v34 = vor.u32 %v2499_v21, %v2498_v45  ;;  %v8667_v45 = vrot.slane %v6079_v4, 2 }
  0x5c   : > { %4952 = vmatmul.mubr.msk.bf16.gmra.mrb[32].mxu1 %vm8571_vm2, %v6019_v26  ;;  %v2487_v26 = vrot.slane %v5869_v62, 3  ;;  %v6192_v62 = vsel %vm1902_vm3, %v1920_v36, %v1922_v48  ;;  %v2496_v36 = vor.u32 %v2495_v41, %v2494_v37  ;;  %v989_v37 = vrot.slane %v5902_v25, 1 }
  0x5d   : > { %4959 = vmatprep.mubr.msk.bf16.mxu1 %vm8571_vm2, %v5776_v6  ;;  %v991_v41 = vrot.slane %v5933_v49, 1 }
  0x5e   : > { %5132 = vmatmul.mubr.msk.bf16.gmra.mrb[12].mxu0 %vm8571_vm2, %v6160_v55  ;;  %v2488_v56 = vor.u32 %v2487_v26, %v2486_v52  ;;  %v6220_v44 = vsel %vm2466_vm4, %v2492_v13, %v2496_v36  ;;  %v6236_v39 = vsel %vm2466_vm4, %v2496_v36, %v6227_v34  ;;  %v1932_v52 = vrot.slane %v6051_v46, 2 }
  0x5f   : > { %5135 = vmatprep.mubr.msk.bf16.mxu0 %vm8571_vm2, %v6168_v47  ;;  %v6247_v26 = vsel %vm1902_vm3, %v1928_v2, %v1930_v40  ;;  %v6411_v36 = vsel %vm969_vm5, %v989_v37, %v991_v41 }
  0x60   : > { %v6187_v63 = vsel %vm2466_vm4, %v2484_v50, %v2488_v56  ;;  %v6206_v20 = vsel %vm2466_vm4, %v2488_v56, %v2492_v13  ;;  %v6252_v48 = vsel %vm1902_vm3, %v1930_v40, %v1932_v52  ;;  %v5684_v13 = vld [vmem:[%s8535_s1 + $0x78] sm:$0xff]  }
  0x64   : > { %4960 = vmatmul.mubr.msk.bf16.vlgmr.msra.gmra.mrb[0].mxu1 %vm8571_vm2, %v5779_v7 }
  0x65   : > { %4963 = vmatprep.mubr.msk.bf16.mxu1 %vm8571_vm2, %v5783_v8  ;;  %4996 = vmatpush3.bf16.msra.mxu1 %v5945_v59  ;;  %v1926_v59 = vrot.slane %v5974_v30, 2 }
  0x66   : > { %4997 = vmatprep.subr.bf16.mxu1 %v5683_v31  ;;  %5136 = vmatmul.mubr.msk.bf16.gmra.mrb[16].mxu0 %vm8571_vm2, %v6192_v62 }
  0x67   : > { %5139 = vmatprep.mubr.msk.bf16.mxu0 %vm8571_vm2, %v6197_v1  ;;  %v6225_v33 = vsel %vm1902_vm3, %v1924_v23, %v1926_v59  ;;  %v6232_v50 = vsel %vm1902_vm3, %v1926_v59, %v1928_v2  ;;  %v1934_v23 = vrot.slane %v5959_v10, 2 }
  0x69   : > { %4998 = vmatpush3.bf16.msra.mxu1 %v5683_v31  ;;  %v6262_v56 = vsel %vm1902_vm3, %v1932_v52, %v1934_v23  ;;  %v6266_v31 = vcombine.low %v6068_v53, %v6068_v53  ;;  %v6272_v54 = vsel %vm1902_vm3, %v1934_v23, %v6096_v61  ;;  %v997_v52 = vrot.slane %v6013_v19, 1 }
  0x6a   : > { %5035 = vmatprep.subr.bf16.mxu1 %v6203_v12 }
  0x6b   : > { %v1938_v14 = vrot.slane %v6266_v31, 2 }
  0x6c   : > { %4964 = vmatmul.mubr.msk.bf16.gmra.mrb[4].mxu1 %vm8571_vm2, %v5796_v15 }
  0x6d   : > { %4967 = vmatprep.mubr.msk.bf16.mxu1 %vm8571_vm2, %v5799_v16  ;;  %v1939_v53 = vsel %vm1902_vm3, %v6096_v61, %v1938_v14  ;;  %v973_v61 = vrot.slane %v5783_v8, 1  ;;  %v977_v8 = vrot.slane %v5799_v16, 1  ;;  %v981_v16 = vrot.slane %v5823_v38, 1  ;;  %v8668_v14 = vld [vmem:[#allocation4_spill] sm:$0xff] }
  0x6e   : > { %5140 = vmatmul.mubr.msk.bf16.gmra.mrb[20].mxu0 %vm8571_vm2, %v6225_v33 }
  0x6f   : > { %5143 = vmatprep.mubr.msk.bf16.mxu0 %vm8571_vm2, %v6232_v50 }
  0x74   : > { %4968 = vmatmul.mubr.msk.bf16.gmra.mrb[8].mxu1 %vm8571_vm2, %v5811_v29 }
  0x75   : > { %4971 = vmatprep.mubr.msk.bf16.mxu1 %vm8571_vm2, %v5823_v38  ;;  %v985_v38 = vrot.slane %v5864_v60, 1 }
  0x76   : > { %5144 = vmatmul.mubr.msk.bf16.gmra.mrb[24].mxu0 %vm8571_vm2, %v6247_v26 }
  0x77   : > { %5147 = vmatprep.mubr.msk.bf16.mxu0 %vm8571_vm2, %v6252_v48 }
  0x7c   : > { %4972 = vmatmul.mubr.msk.bf16.gmra.mrb[12].mxu1 %vm8571_vm2, %v5833_v43 }
  0x7d   : > { %4975 = vmatprep.mubr.msk.bf16.mxu1 %vm8571_vm2, %v5864_v60 }
  0x7e   : > { %5148 = vmatmul.mubr.msk.bf16.gmra.mrb[28].mxu0 %vm8571_vm2, %v6262_v56 }
  0x7f   : > { %5151 = vmatprep.mubr.msk.bf16.mxu0 %vm8571_vm2, %v6272_v54 }
  0x84   : > { %4976 = vmatmul.mubr.msk.bf16.gmra.mrb[16].mxu1 %vm8571_vm2, %v5879_v9 }
  0x85   : > { %4979 = vmatprep.mubr.msk.bf16.mxu1 %vm8571_vm2, %v5902_v25 }
  0x86   : > { %5152 = vmatmul.mubr.msk.bf16.gmra.mrb[32].mxu0 %vm8571_vm2, %v1939_v53  ;;  %v1005_v53 = vrot.slane %v8668_v14, 1  ;;  %v8680_v14 = vld [vmem:[#allocation15_spill] sm:$0xff] }
  0x87   : > { %5159 = vmatprep.mubr.msk.bf16.mxu0 %vm8571_vm2, %v6047_v11  ;;  %v6303_v11 = vld [vmem:[%s8535_s1 + $0x80] sm:$0xff]  }
  0x8c   : > { %4980 = vmatmul.mubr.msk.bf16.gmra.mrb[20].mxu1 %vm8571_vm2, %v5933_v49 }
  0x8d   : > { %4983 = vmatprep.mubr.msk.bf16.mxu1 %vm8571_vm2, %v5963_v18 }
  0x8e   : > { %5160 = vmatmul.mubr.msk.bf16.vlgmr.msra.gmra.mrb[0].mxu0 %vm8571_vm2, %v6055_v27  ;;  %v970_v27 = vrot.slane %v5776_v6, 1  ;;  %v975_v6 = vrot.slane %v5796_v15, 1  ;;  %v979_v15 = vrot.slane %v5811_v29, 1  ;;  %v983_v29 = vrot.slane %v5833_v43, 1 }
  0x8f   : > { %5196 = vmatpush3.bf16.msra.mxu0 %v6089_v17  ;;  %5163 = vmatprep.mubr.msk.bf16.mxu0 %vm8571_vm2, %v6101_v22  ;;  %v971_v17 = vrot.slane %v5779_v7, 1  ;;  %v987_v43 = vrot.slane %v5879_v9, 1 }
  0x90   : > { %5197 = vmatprep.subr.bf16.mxu0 %v5684_v13  ;;  %v6338_v22 = vsel %vm969_vm5, %v973_v61, %v975_v6 }
  0x91   : > { %v6335_v7 = vsel %vm969_vm5, %v971_v17, %v973_v61  ;;  %v6408_v2 = vsel %vm969_vm5, %v987_v43, %v989_v37 }
  0x93   : > { %5198 = vmatpush3.bf16.msra.mxu0 %v5684_v13  ;;  %v8669_v13 = vld [vmem:[#allocation3_spill] sm:$0xff] }
  0x94   : > { %4984 = vmatmul.mubr.msk.bf16.gmra.mrb[24].mxu1 %vm8571_vm2, %v5974_v30  ;;  %5235 = vmatprep.subr.bf16.mxu0 %v6303_v11 }
  0x95   : > { %4987 = vmatprep.mubr.msk.bf16.mxu1 %vm8571_vm2, %v6013_v19 }
  0x96   : > { %5164 = vmatmul.mubr.msk.bf16.gmra.mrb[4].mxu0 %vm8571_vm2, %v6112_v58  ;;  %v972_v58 = vsel %vm969_vm5, %v970_v27, %v971_v17 }
  0x97   : > { %5167 = vmatprep.mubr.msk.bf16.mxu0 %vm8571_vm2, %v6135_v28  ;;  %v5689_v28 = vld [vmem:[%s8535_s1 + $0x38] sm:$0xff]  }
  0x9c   : > { %4988 = vmatmul.mubr.msk.bf16.gmra.mrb[28].mxu1 %vm8571_vm2, %v6024_v5 }
  0x9d   : > { %4991 = vmatprep.mubr.msk.bf16.mxu1 %vm8571_vm2, %v6051_v46 }
  0x9e   : > { %5168 = vmatmul.mubr.msk.bf16.gmra.mrb[8].mxu0 %vm8571_vm2, %v6142_v57  ;;  %v6355_v57 = vsel %vm969_vm5, %v975_v6, %v977_v8  ;;  %v8672_v6 = vld [vmem:[#allocation7_spill] sm:$0xff] }
  0x9f   : > { %5171 = vmatprep.mubr.msk.bf16.mxu0 %vm8571_vm2, %v6160_v55  ;;  %v6358_v55 = vsel %vm969_vm5, %v977_v8, %v979_v15 }
  0xa4   : > { %4992 = vmatmul.mubr.msk.bf16.gmra.mrb[32].mxu1 %vm8571_vm2, %v5959_v10 }
  0xa5   : > { %4999 = vmatprep.mubr.msk.bf16.mxu1 %vm8571_vm2, %v972_v58  ;;  %v8671_v58 = vld [vmem:[#allocation8_spill] sm:$0xff] }
  0xa6   : > { %5172 = vmatmul.mubr.msk.bf16.gmra.mrb[12].mxu0 %vm8571_vm2, %v6168_v47  ;;  %v6372_v47 = vsel %vm969_vm5, %v979_v15, %v981_v16  ;;  %v2506_v61 = vrot.slane %v8671_v58, 2 }
  0xa7   : > { %5175 = vmatprep.mubr.msk.bf16.mxu0 %vm8571_vm2, %v6192_v62  ;;  %v6388_v62 = vsel %vm969_vm5, %v983_v29, %v985_v38 }
  0xac   : > { %5000 = vmatmul.mubr.msk.bf16.vlgmr.msra.gmra.mrb[0].mxu1 %vm8571_vm2, %v6335_v7 }
  0xad   : > { %5003 = vmatprep.mubr.msk.bf16.mxu1 %vm8571_vm2, %v6338_v22  ;;  %5036 = vmatpush3.bf16.msra.mxu1 %v6203_v12  ;;  %v6396_v12 = vld [vmem:[%s5773_s6 + $0xa0] ss:$0 sps:$4 sm:$0xff]  }
  0xae   : > { %5037 = vmatprep.subr.bf16.mxu1 %v5689_v28  ;;  %5176 = vmatmul.mubr.msk.bf16.gmra.mrb[16].mxu0 %vm8571_vm2, %v6197_v1  ;;  %v6391_v1 = vsel %vm969_vm5, %v985_v38, %v987_v43  ;;  %v2229_v59 = vrot.slane %v6396_v12, 2 }
  0xaf   : > { %5179 = vmatprep.mubr.msk.bf16.mxu0 %vm8571_vm2, %v6225_v33  ;;  %v995_v33 = vrot.slane %v5974_v30, 1 }
  0xb0   : > { %v2230_v21 = vsel %vm1902_vm3, %v8667_v45, %v2229_v59  ;;  %v8677_v45 = vld [vmem:[#allocation16_spill] sm:$0xff] }
  0xb1   : > { %5038 = vmatpush3.bf16.msra.mxu1 %v5689_v28  ;;  %v2507_v28 = vrot.slane %v8672_v6, 3 }
  0xb2   : > { %5275 = vmatprep.subr.bf16.mxu1 %v5744_v0  ;;  %v6375_v0 = vsel %vm969_vm5, %v981_v16, %v983_v29  ;;  %v8674_v16 = vld [vmem:[#allocation9_spill] sm:$0xff] }
  0xb3   : > { %v2508_v29 = vor.u32 %v2507_v28, %v2506_v61 }
  0xb4   : > { %5004 = vmatmul.mubr.msk.bf16.gmra.mrb[4].mxu1 %vm8571_vm2, %v6355_v57 }
  0xb5   : > { %5007 = vmatprep.mubr.msk.bf16.mxu1 %vm8571_vm2, %v6358_v55 }
  0xb6   : > { %5180 = vmatmul.mubr.msk.bf16.gmra.mrb[20].mxu0 %vm8571_vm2, %v6232_v50 }
  0xb7   : > { %5183 = vmatprep.mubr.msk.bf16.mxu0 %vm8571_vm2, %v6247_v26  ;;  %v5690_v26 = vld [vmem:[%s8535_s1 + $0x88] sm:$0xff]  }
  0xbc   : > { %5008 = vmatmul.mubr.msk.bf16.gmra.mrb[8].mxu1 %vm8571_vm2, %v6372_v47 }
  0xbd   : > { %5011 = vmatprep.mubr.msk.bf16.mxu1 %vm8571_vm2, %v6375_v0 }
  0xbe   : > { %5184 = vmatmul.mubr.msk.bf16.gmra.mrb[24].mxu0 %vm8571_vm2, %v6252_v48  ;;  %v6446_v48 = vsel %vm969_vm5, %v995_v33, %v997_v52 }
  0xbf   : > { %5187 = vmatprep.mubr.msk.bf16.mxu0 %vm8571_vm2, %v6262_v56  ;;  %v6457_v56 = vrot.slane %v5959_v10, 1 }
  0xc4   : > { %5012 = vmatmul.mubr.msk.bf16.gmra.mrb[12].mxu1 %vm8571_vm2, %v6388_v62 }
  0xc5   : > { %5015 = vmatprep.mubr.msk.bf16.mxu1 %vm8571_vm2, %v6391_v1 }
  0xc6   : > { %5188 = vmatmul.mubr.msk.bf16.gmra.mrb[28].mxu0 %vm8571_vm2, %v6272_v54 }
  0xc7   : > { %5191 = vmatprep.mubr.msk.bf16.mxu0 %vm8571_vm2, %v6108_v32  ;;  %v993_v32 = vrot.slane %v5963_v18, 1 }
  0xc9   : > { %v6426_v50 = vsel %vm969_vm5, %v991_v41, %v993_v32  ;;  %v6429_v40 = vsel %vm969_vm5, %v993_v32, %v995_v33  ;;  %v8676_v41 = vld [vmem:[#allocation10_spill] sm:$0xff]  ;;  %v8678_v32 = vld [vmem:[#allocation13_spill] sm:$0xff]  ;;  %v5692_v33 = vld [vmem:[%s8535_s1 + $0x48] sm:$0xff]  }
  0xcc   : > { %5016 = vmatmul.mubr.msk.bf16.gmra.mrb[16].mxu1 %vm8571_vm2, %v6408_v2 }
  0xcd   : > { %5019 = vmatprep.mubr.msk.bf16.mxu1 %vm8571_vm2, %v6411_v36 }
  0xce   : > { %5192 = vmatmul.mubr.msk.bf16.gmra.mrb[32].mxu0 %vm8571_vm2, %v2230_v21  ;;  %v2518_v21 = vrot.slane %v8677_v45, 2 }
  0xcf   : > { %5199 = vmatprep.mubr.msk.bf16.mxu0 %vm8571_vm2, %v6138_v24  ;;  %v999_v24 = vrot.slane %v6024_v5, 1 }
  0xd1   : > { %v6449_v23 = vsel %vm969_vm5, %v997_v52, %v999_v24 }
  0xd4   : > { %5020 = vmatmul.mubr.msk.bf16.gmra.mrb[20].mxu1 %vm8571_vm2, %v6426_v50 }
  0xd5   : > { %5023 = vmatprep.mubr.msk.bf16.mxu1 %vm8571_vm2, %v6429_v40 }
  0xd6   : > { %5200 = vmatmul.mubr.msk.bf16.vlgmr.msra.gmra.mrb[0].mxu0 %vm8571_vm2, %v6145_v3  ;;  %v1001_v3 = vrot.slane %v6051_v46, 1 }
  0xd7   : > { %5236 = vmatpush3.bf16.msra.mxu0 %v6303_v11  ;;  %5203 = vmatprep.mubr.msk.bf16.mxu0 %vm8571_vm2, %v6163_v42  ;;  %v8670_v11 = vld [vmem:[#allocation2_spill] sm:$0xff] }
  0xd8   : > { %5237 = vmatprep.subr.bf16.mxu0 %v5690_v26  ;;  %v6464_v42 = vsel %vm969_vm5, %v999_v24, %v1001_v3  ;;  %v6468_v54 = vsel %vm969_vm5, %v1001_v3, %v6457_v56  ;;  %v2503_v27 = vrot.slane %v8670_v11, 3  ;;  %v8679_v24 = vld [vmem:[#allocation17_spill] sm:$0xff] }
  0xd9   : > { %v2522_v3 = vrot.slane %v8679_v24, 2 }
  0xdb   : > { %5238 = vmatpush3.bf16.msra.mxu0 %v5690_v26 }
  0xdc   : > { %5024 = vmatmul.mubr.msk.bf16.gmra.mrb[24].mxu1 %vm8571_vm2, %v6446_v48 }
  0xdd   : > { %5027 = vmatprep.mubr.msk.bf16.mxu1 %vm8571_vm2, %v6449_v23 }
  0xde   : > { %5204 = vmatmul.mubr.msk.bf16.gmra.mrb[4].mxu0 %vm8571_vm2, %v6173_v51  ;;  %v2502_v51 = vrot.slane %v8669_v13, 2 }
  0xdf   : > { %5207 = vmatprep.mubr.msk.bf16.mxu0 %vm8571_vm2, %v6187_v63  ;;  %v1006_v63 = vsel %vm969_vm5, %v6457_v56, %v1005_v53  ;;  %v2523_v53 = vrot.slane %v8680_v14, 3 }
  0xe0   : > { %v2504_v17 = vor.u32 %v2503_v27, %v2502_v51  ;;  %v8681_v51 = vld [vmem:[#allocation5_spill] sm:$0xff]  ;;  %v2527_v27 = vrot.slane %v5979_v35, 3 }
  0xe1   : > { %v2526_v11 = vrot.slane %v8681_v51, 2 }
  0xe2   : > { %v2505_v8 = vsel %vm2466_vm4, %v6227_v34, %v2504_v17  ;;  %v2509_v43 = vsel %vm2466_vm4, %v2504_v17, %v2508_v29  ;;  %v2515_v34 = vrot.slane %v8676_v41, 3 }
  0xe3   : > { %v2528_v28 = vor.u32 %v2527_v27, %v2526_v11  ;;  %v5696_v27 = vld [vmem:[%s5773_s6 + $0x28] sm:$0xff]  }
  0xe4   : > { %5028 = vmatmul.mubr.msk.bf16.gmra.mrb[28].mxu1 %vm8571_vm2, %v6464_v42 }
  0xe5   : > { %5031 = vmatprep.mubr.msk.bf16.mxu1 %vm8571_vm2, %v6468_v54 }
  0xe6   : > { %5208 = vmatmul.mubr.msk.bf16.gmra.mrb[8].mxu0 %vm8571_vm2, %v6206_v20  ;;  %v8673_v20 = vld [vmem:[#allocation11_spill] sm:$0xff] }
  0xe7   : > { %5211 = vmatprep.mubr.msk.bf16.mxu0 %vm8571_vm2, %v6220_v44  ;;  %v2510_v15 = vrot.slane %v8673_v20, 2  ;;  %v2511_v44 = vrot.slane %v8674_v16, 3 }
  0xe9   : > { %v2512_v38 = vor.u32 %v2511_v44, %v2510_v15 }
  0xeb   : > { %v2513_v59 = vsel %vm2466_vm4, %v2508_v29, %v2512_v38 }
  0xec   : > { %5032 = vmatmul.mubr.msk.bf16.gmra.mrb[32].mxu1 %vm8571_vm2, %v1006_v63  ;;  %v8682_v63 = vld [vmem:[#allocation14_spill] sm:$0xff] }
  0xed   : > { %5039 = vmatprep.mubr.msk.bf16.mxu1 %vm8571_vm2, %v6335_v7  ;;  %v8675_v7 = vld [vmem:[#allocation12_spill] sm:$0xff]  ;;  %v1602_v17 = vshrl.u32 %v8682_v63, 16  ;;  %v1605_v61 = vshll.u32 %v8682_v63, 16 }
  0xee   : > { %5212 = vmatmul.mubr.msk.bf16.gmra.mrb[12].mxu0 %vm8571_vm2, %v6236_v39  ;;  %v2514_v37 = vrot.slane %v8675_v7, 2  ;;  %v5691_v39 = vld [vmem:[%s8535_s1 + $0x40] sm:$0xff]  }
  0xef   : > { %5215 = vmatprep.mubr.msk.bf16.mxu0 %vm8571_vm2, %v2505_v8  ;;  %v2535_v8 = vshrl.u32 %v6079_v4, 16  ;;  %v2530_v44 = vrot.slane %v1602_v17, 2  ;;  %v2531_v29 = vrot.slane %v1605_v61, 3 }
  0xf4   : > { %5040 = vmatmul.mubr.msk.bf16.vlgmr.msra.gmra.mrb[0].mxu1 %vm8571_vm2, %v6338_v22  ;;  %v2519_v22 = vrot.slane %v8678_v32, 3 }
  0xf5   : > { %5043 = vmatprep.mubr.msk.bf16.mxu1 %vm8571_vm2, %v6355_v57  ;;  %5277 = vmatpush3.bf16.msra.mxu1 %v5691_v39  ;;  %v2516_v57 = vor.u32 %v2515_v34, %v2514_v37  ;;  %v2544_v34 = vshrl.u32 %v6396_v12, 16 }
  0xf6   : > { %5276 = vmatprep.subr.bf16.mxu1 %v5692_v33  ;;  %5216 = vmatmul.mubr.msk.bf16.gmra.mrb[16].mxu0 %vm8571_vm2, %v2509_v43  ;;  %v2520_v52 = vor.u32 %v2519_v22, %v2518_v21  ;;  %v2537_v43 = vrot.slane %v2535_v8, 2 }
  0xf7   : > { %5219 = vmatprep.mubr.msk.bf16.mxu0 %vm8571_vm2, %v2513_v59  ;;  %v2517_v26 = vsel %vm2466_vm4, %v2512_v38, %v2516_v57  ;;  %v2547_v59 = vshll.u32 %v6396_v12, 16  ;;  %v2546_v21 = vrot.slane %v2544_v34, 2 }
  0xf8   : > { %v2521_v13 = vsel %vm2466_vm4, %v2516_v57, %v2520_v52 }
  0xf9   : > { %5278 = vmatpush3.bf16.msra.mxu1 %v5692_v33  ;;  %v2549_v22 = vrot.slane %v2547_v59, 3  ;;  %v8683_v59 = vld [vmem:[#allocation6_spill] sm:$0xff] }
  0xfb   : > { %v2550_v57 = vor.u32 %v2549_v22, %v2546_v21  ;;  %v1586_v21 = vrot.slane %v8676_v41, 2  ;;  %v1589_v41 = vrot.slane %v8677_v45, 1  ;;  %v2859_v45 = vrot.slane %v6013_v19, 3 }
  0xfc   : > { %5044 = vmatmul.mubr.msk.bf16.gmra.mrb[4].mxu1 %vm8571_vm2, %v6358_v55  ;;  %v2524_v55 = vor.u32 %v2523_v53, %v2522_v3  ;;  %v5694_v3 = vld [vmem:[%s5773_s6 + $0x18] sm:$0xff]  }
  0xfd   : > { %5047 = vmatprep.mubr.msk.bf16.mxu1 %vm8571_vm2, %v6372_v47  ;;  %v2538_v47 = vshll.u32 %v6079_v4, 16 }
  0xfe   : > { %5220 = vmatmul.mubr.msk.bf16.gmra.mrb[20].mxu0 %vm8571_vm2, %v2517_v26  ;;  %v2525_v15 = vsel %vm2466_vm4, %v2520_v52, %v2524_v55  ;;  %v2529_v38 = vsel %vm2466_vm4, %v2524_v55, %v2528_v28  ;;  %v5693_v52 = vld [vmem:[%s5773_s6 + $0x10] sm:$0xff]   ;;  %v2841_v55 = vrot.slane %v5696_v27, 3  ;;  %v1607_v27 = vrot.slane %v1605_v61, 2 }
  0xff   : > { %5223 = vmatprep.mubr.msk.bf16.mxu0 %vm8571_vm2, %v2521_v13  ;;  %v2540_v37 = vrot.slane %v2538_v47, 3  ;;  %v2836_v26 = vrot.slane %v5693_v52, 3  ;;  %v5695_v13 = vld [vmem:[%s5773_s6 + $0x20] sm:$0xff]   ;;  %v5698_v47 = vld [vmem:[%s5773_s6 + $0x38] sm:$0xff]  }
 0x100   : > { %v2839_v11 = vrot.slane %v5695_v13, 3 }
 0x101   : > { %v2541_v39 = vor.u32 %v2540_v37, %v2537_v43  ;;  %v1577_v43 = vrot.slane %v8671_v58, 1  ;;  %v1578_v37 = vrot.slane %v8672_v6, 2  ;;  %v2853_v58 = vrot.slane %v5933_v49, 3 }
 0x102   : > { %v1582_v6 = vrot.slane %v8674_v16, 2 }
 0x103   : > { %v1579_v34 = vor.u32 %v1578_v37, %v1577_v43 }
 0x104   : > { %5048 = vmatmul.mubr.msk.bf16.gmra.mrb[8].mxu1 %vm8571_vm2, %v6375_v0  ;;  %v2532_v0 = vor.u32 %v2531_v29, %v2530_v44  ;;  %v1294_v44 = vrot.slane %v8682_v63, 1  ;;  %v2847_v29 = vrot.slane %v5864_v60, 3  ;;  %v1296_v60 = vrot.slane %v6266_v31, 1 }
 0x105   : > { %5051 = vmatprep.mubr.msk.bf16.mxu1 %vm8571_vm2, %v6388_v62 }
 0x106   : > { %5224 = vmatmul.mubr.msk.bf16.gmra.mrb[24].mxu0 %vm8571_vm2, %v2525_v15  ;;  %v2533_v62 = vsel %vm2466_vm4, %v2528_v28, %v2532_v0  ;;  %v2542_v33 = vsel %vm2466_vm4, %v2532_v0, %v2541_v39  ;;  %v5697_v28 = vld [vmem:[%s5773_s6 + $0x30] sm:$0xff]   ;;  %v2845_v15 = vrot.slane %v5698_v47, 3 }
 0x107   : > { %5227 = vmatprep.mubr.msk.bf16.mxu0 %vm8571_vm2, %v2529_v38  ;;  %v2843_v8 = vrot.slane %v5697_v28, 3  ;;  %v2849_v38 = vrot.slane %v5879_v9, 3  ;;  %v2851_v9 = vrot.slane %v5902_v25, 3 }
 0x109   : > { %v2850_v0 = vsel %vm8572_vm6, %v2847_v29, %v2849_v38  ;;  %v2852_v22 = vsel %vm8572_vm6, %v2849_v38, %v2851_v9  ;;  %v2854_v25 = vsel %vm8572_vm6, %v2851_v9, %v2853_v58  ;;  %v2871_v38 = vrot.slane %v6396_v12, 3 }
 0x10c   : > { %5052 = vmatmul.mubr.msk.bf16.gmra.mrb[12].mxu1 %vm8571_vm2, %v6391_v1  ;;  %v2837_v1 = vrot.slane %v5694_v3, 3  ;;  %v1594_v3 = vrot.slane %v8680_v14, 2  ;;  %v1597_v14 = vrot.slane %v8681_v51, 1  ;;  %v1611_v51 = vshrl.u32 %v6266_v31, 16 }
 0x10d   : > { %5055 = vmatprep.mubr.msk.bf16.mxu1 %vm8571_vm2, %v6408_v2  ;;  %v2551_v2 = vsel %vm2466_vm4, %v2541_v39, %v2550_v57  ;;  %v1580_v39 = vsel %vm1533_vm1, %v8683_v59, %v1579_v34  ;;  %v1590_v57 = vrot.slane %v8678_v32, 2 }
 0x10e   : > { %5228 = vmatmul.mubr.msk.bf16.gmra.mrb[28].mxu0 %vm8571_vm2, %v2533_v62  ;;  %v2838_v53 = vsel %vm8572_vm6, %v2836_v26, %v2837_v1  ;;  %v1585_v62 = vrot.slane %v8675_v7, 1  ;;  %v2857_v7 = vrot.slane %v5974_v30, 3  ;;  %v1593_v26 = vrot.slane %v8679_v24, 1 }
 0x10f   : > { %5231 = vmatprep.mubr.msk.bf16.mxu0 %vm8571_vm2, %v2542_v33  ;;  %v2861_v24 = vrot.slane %v6024_v5, 3  ;;  %v1613_v28 = vrot.slane %v1611_v51, 1 }
 0x110   : > { %v1587_v33 = vor.u32 %v1586_v21, %v1585_v62  ;;  %v1595_v30 = vor.u32 %v1594_v3, %v1593_v26  ;;  %v2860_v19 = vsel %vm8572_vm6, %v2857_v7, %v2859_v45  ;;  %v4717_v21 = vld [vmem:[%s6684_s14 + $0x8] sm:$0xff]  }
 0x111   : > { %v2862_v5 = vsel %vm8572_vm6, %v2859_v45, %v2861_v24 }
 0x114   : > { %5056 = vmatmul.mubr.msk.bf16.gmra.mrb[16].mxu1 %vm8571_vm2, %v6411_v36  ;;  %v2840_v36 = vsel %vm8572_vm6, %v2837_v1, %v2839_v11 }
 0x115   : > { %5059 = vmatprep.mubr.msk.bf16.mxu1 %vm8571_vm2, %v6426_v50  ;;  %v2842_v50 = vsel %vm8572_vm6, %v2839_v11, %v2841_v55  ;;  %v1604_v11 = vrot.slane %v1602_v17, 1  ;;  %v2863_v17 = vrot.slane %v6051_v46, 3  ;;  %v2867_v46 = vrot.slane %v8682_v63, 3 }
 0x116   : > { %5232 = vmatmul.mubr.msk.bf16.gmra.mrb[32].mxu0 %vm8571_vm2, %v2551_v2  ;;  %v1591_v2 = vor.u32 %v1590_v57, %v1589_v41  ;;  %v3488_v63 = vlaneseq  ;;  %v4648_v41 = vunpack.c.h.bf16 %v4717_v21 }
 0x117   : > { %5239 = vmatprep.mubr.msk.bf16.mxu0 %vm8571_vm2, %v2838_v53  ;;  %v1598_v53 = vrot.slane %v5979_v35, 2  ;;  %v1614_v35 = vshll.u32 %v6266_v31, 16 }
 0x118   : > { %v1592_v32 = vsel %vm1533_vm1, %v1587_v33, %v1591_v2  ;;  %v1596_v13 = vsel %vm1533_vm1, %v1591_v2, %v1595_v30  ;;  %v6664_v43 = vshrl.u32 %v3488_v63, 7 }
 0x11a   : > { %v3492_v37 = vadd.s32 24, %v6664_v43  ;;  %v6712_v45 = vadd.s32 56, %v6664_v43 }
 0x11c   : > { %5060 = vmatmul.mubr.msk.bf16.gmra.mrb[20].mxu1 %vm8571_vm2, %v6429_v40  ;;  %v2844_v40 = vsel %vm8572_vm6, %v2841_v55, %v2843_v8  ;;  %v1599_v55 = vor.u32 %v1598_v53, %v1597_v14 }
 0x11d   : > { %5063 = vmatprep.mubr.msk.bf16.mxu1 %vm8571_vm2, %v6446_v48  ;;  %v2846_v48 = vsel %vm8572_vm6, %v2843_v8, %v2845_v15  ;;  %v1616_v8 = vrot.slane %v1614_v35, 2  ;;  %v4720_v35 = vld [vmem:[%s6684_s14 + $0x20] sm:$0xff]  }
 0x11e   : > { %5240 = vmatmul.mubr.msk.bf16.vlgmr.msra.gmra.mrb[0].mxu0 %vm8571_vm2, %v2840_v36  ;;  %v1608_v36 = vor.u32 %v1607_v27, %v1604_v11  ;;  %v1600_v61 = vsel %vm1533_vm1, %v1595_v30, %v1599_v55  ;;  %v6721_v27 = vadd.s32 40, %v6664_v43 }
 0x11f   : > { %5243 = vmatprep.mubr.msk.bf16.mxu0 %vm8571_vm2, %v2842_v50  ;;  %v2865_v50 = vrot.slane %v5959_v10, 3 }
 0x120   : > { %v1609_v47 = vsel %vm1533_vm1, %v1599_v55, %v1608_v36 }
 0x121   : > { %v2866_v31 = vsel %vm8572_vm6, %v2863_v17, %v2865_v50 }
 0x124   : > { %5064 = vmatmul.mubr.msk.bf16.gmra.mrb[24].mxu1 %vm8571_vm2, %v6449_v23  ;;  %v1295_v23 = vsel %vm969_vm5, %v6457_v56, %v1294_v44  ;;  %v1297_v56 = vsel %vm969_vm5, %v1294_v44, %v1296_v60  ;;  %v2868_v44 = vsel %vm8572_vm6, %v2865_v50, %v2867_v46  ;;  %v3490_v60 = vadd.s32 8, %v6664_v43 }
 0x125   : > { %5067 = vmatprep.mubr.msk.bf16.mxu1 %vm8571_vm2, %v6464_v42  ;;  %v2848_v42 = vsel %vm8572_vm6, %v2845_v15, %v2847_v29  ;;  %v2864_v15 = vsel %vm8572_vm6, %v2861_v24, %v2863_v17  ;;  %v6743_v50 = vadd.s32 80, %v6664_v43 }
 0x126   : > { %5244 = vmatmul.mubr.msk.bf16.gmra.mrb[4].mxu0 %vm8571_vm2, %v2844_v40  ;;  %v1617_v40 = vor.u32 %v1616_v8, %v1613_v28 }
 0x127   : > { %5247 = vmatprep.mubr.msk.bf16.mxu0 %vm8571_vm2, %v2846_v48  ;;  %v2869_v48 = vrot.slane %v6079_v4, 3  ;;  %v3491_v4 = vadd.s32 16, %v6664_v43 }
 0x128   : > { %v1618_v10 = vsel %vm1533_vm1, %v1608_v36, %v1617_v40  ;;  %v6734_v36 = vmul.u32.u64.low 3817748708, %v6712_v45  ;;  %v6735_v17 = vmul.u32.u64.high 3817748708, %v6712_v45, %v6734_v36  ;;  %v4721_v40 = vld [vmem:[%s6684_s14 + $0x28] sm:$0xff]  }
 0x129   : > { %v2870_v29 = vsel %vm8572_vm6, %v2867_v46, %v2869_v48  ;;  %v6758_v46 = vadd.s32 64, %v6664_v43 }
 0x12c   : > { %5068 = vmatmul.mubr.msk.bf16.gmra.mrb[28].mxu1 %vm8571_vm2, %v6468_v54  ;;  %v1581_v54 = vrot.slane %v8673_v20, 1  ;;  %v2855_v20 = vrot.slane %v5963_v18, 3 }
 0x12d   : > { %5071 = vmatprep.mubr.msk.bf16.mxu1 %vm8571_vm2, %v1295_v23  ;;  %v2872_v23 = vsel %vm8572_vm6, %v2869_v48, %v2871_v38 }
 0x12e   : > { %5248 = vmatmul.mubr.msk.bf16.gmra.mrb[8].mxu0 %vm8571_vm2, %v2848_v42  ;;  %v1583_v49 = vor.u32 %v1582_v6, %v1581_v54  ;;  %v2856_v1 = vsel %vm8572_vm6, %v2853_v58, %v2855_v20  ;;  %v2858_v18 = vsel %vm8572_vm6, %v2855_v20, %v2857_v7  ;;  %v4718_v6 = vld [vmem:[%s6684_s14 + $0x10] sm:$0xff]   ;;  %v4647_v7 = vunpack.c.l.bf16 %v4717_v21 }
 0x12f   : > { %5251 = vmatprep.mubr.msk.bf16.mxu0 %vm8571_vm2, %v2850_v0  ;;  %v6668_v42 = vmul.u32.u64.low 3817748708, %v3491_v4  ;;  %v6669_v0 = vmul.u32.u64.high 3817748708, %v3491_v4, %v6668_v42  ;;  %v6686_v58 = vmul.u32.u64.low 3817748708, %v3490_v60  ;;  %v6687_v54 = vmul.u32.u64.high 3817748708, %v3490_v60, %v6686_v58 }
 0x130   : > { %v1584_v16 = vsel %vm1533_vm1, %v1579_v34, %v1583_v49  ;;  %v1588_v52 = vsel %vm1533_vm1, %v1583_v49, %v1587_v33  ;;  %v6673_v34 = vmul.u32.u64.low 3817748708, %v6664_v43  ;;  %v6674_v9 = vmul.u32.u64.high 3817748708, %v6664_v43, %v6673_v34 }
 0x131   : > { %v3553_v59 = vshrl.u32 %v6669_v0, 4  ;;  %v4652_v62 = vunpack.c.h.bf16 %v4718_v6  ;;  %v6698_v33 = vadd.s32 48, %v6664_v43  ;;  %v3542_v57 = vshrl.u32 %v6687_v54, 4  ;;  %v4722_v34 = vld [vmem:[%s6684_s14 + $0x30] sm:$0xff]  }
 0x132   : > { %v3307_v53 = vrot.slane %v4647_v7, 3 }
 0x133   : > { %v3554_v20 = vmul.u32 18, %v3553_v59  ;;  %v3312_v26 = vrot.slane %v4652_v62, 3  ;;  %v6708_v2 = vmul.u32.u64.low 3817748708, %v6698_v33  ;;  %v6709_v30 = vmul.u32.u64.high 3817748708, %v6698_v33, %v6708_v2 }
 0x134   : > { %5072 = vmatmul.mubr.msk.bf16.gmra.mrb[32].mxu1 %vm8571_vm2, %v1297_v56  ;;  %v6676_v12 = vmul.u32.u64.low 3817748708, %v3492_v37  ;;  %v6677_v56 = vmul.u32.u64.high 3817748708, %v3492_v37, %v6676_v12  ;;  %v3543_v11 = vmul.u32 18, %v3542_v57  ;;  %v3608_v59 = vshrl.u32 %v6735_v17, 4 }
 0x135   : > { %5099 = vmatprep.mubr.msk.bf16.mxu1 %vm8571_vm2, %v1580_v39  ;;  %v4651_v39 = vunpack.c.l.bf16 %v4718_v6  ;;  %v3597_v48 = vshrl.u32 %v6709_v30, 4 }
 0x136   : > { %5252 = vmatmul.mubr.msk.bf16.gmra.mrb[12].mxu0 %vm8571_vm2, %v2852_v22  ;;  %v3531_v22 = vshrl.u32 %v6674_v9, 4  ;;  %v3564_v49 = vshrl.u32 %v6677_v56, 4  ;;  %v6748_v8 = vsub.s32 %v3490_v60, %v3543_v11  ;;  %v3609_v30 = vmul.u32 18, %v3608_v59 }
 0x137   : > { %5255 = vmatprep.mubr.msk.bf16.mxu0 %vm8571_vm2, %v2854_v25  ;;  %v6694_v25 = vld [vmem:[%s6684_s14 + $0x18] sm:$0xff]   ;;  %v6795_v9 = vmul.u32.u64.low 3817748708, %v6758_v46  ;;  %v6796_v12 = vmul.u32.u64.high 3817748708, %v6758_v46, %v6795_v9  ;;  %v3598_v6 = vmul.u32 18, %v3597_v48  ;;  %v6887_v48 = vadd.s32 96, %v6664_v43 }
 0x138   : > { %v3532_v3 = vmul.u32 18, %v3531_v22  ;;  %vm3922_vm14 = vcmp.ne.s32.totalorder %v6748_v8, 0  ;;  %vm3958_vm15 = vcmp.lt.s32.totalorder %v6748_v8, 0  ;;  %v6807_v58 = vadd.s32 18, %v6748_v8 }
 0x139   : > { %vm6821_vm3 = vmand %vm3958_vm15, %vm3922_vm14  ;;  %v6846_v2 = vsub.s32 %v6698_v33, %v3598_v6  ;;  %v6864_v33 = vadd.s32 88, %v6664_v43  ;;  %v6925_v6 = vmul.u32.u64.low 3817748708, %v6887_v48  ;;  %v6926_v59 = vmul.u32.u64.high 3817748708, %v6887_v48, %v6925_v6 }
 0x13a   : > { %v8714_v6 = vmov 0 }
 0x13b   : > { %vm3927_vm4 = vcmp.ne.s32.totalorder %v6846_v2, 0  ;;  %vm3963_vm5 = vcmp.lt.s32.totalorder %v6846_v2, 0 }
 0x13c   : > { %5100 = vmatmul.mubr.msk.bf16.vlgmr.msra.gmra.mrb[20].mxu1 %vm8571_vm2, %v1584_v16  ;;  %v6701_v16 = vadd.s32 32, %v6664_v43 }
 0x13d   : > { %5103 = vmatprep.mubr.msk.bf16.mxu1 %vm8571_vm2, %v1588_v52  ;;  %v6704_v52 = vrot.slane %v4651_v39, 3 }
 0x13e   : > { %5256 = vmatmul.mubr.msk.bf16.gmra.mrb[16].mxu0 %vm8571_vm2, %v2856_v1  ;;  %v4655_v1 = vunpack.c.l.bf16 %v6694_v25  ;;  %v6717_v24 = vmul.u32.u64.low 3817748708, %v6701_v16  ;;  %v6718_v14 = vmul.u32.u64.high 3817748708, %v6701_v16, %v6717_v24 }
 0x13f   : > { %5259 = vmatprep.mubr.msk.bf16.mxu0 %vm8571_vm2, %v2858_v18  ;;  %v3565_v18 = vmul.u32 18, %v3564_v49 }
 0x140   : > { %v3314_v55 = vrot.slane %v4655_v1, 3  ;;  %v4664_v1 = vunpack.c.h.bf16 %v4721_v40 }
 0x141   : > { %v6730_v51 = vsub.s32 %v3492_v37, %v3565_v18  ;;  %v4663_v37 = vunpack.c.l.bf16 %v4721_v40  ;;  %v6883_v40 = vadd.s32 18, %v6846_v2 }
 0x142   : > { %v6815_v62 = vsel %vm8572_vm6, %v3312_v26, %v3314_v55 }
 0x143   : > { %vm3924_vm11 = vcmp.ne.s32.totalorder %v6730_v51, 0  ;;  %vm3960_vm12 = vcmp.lt.s32.totalorder %v6730_v51, 0  ;;  %v6791_v0 = vadd.s32 18, %v6730_v51 }
 0x144   : > { %5104 = vmatmul.mubr.msk.bf16.gmra.mrb[24].mxu1 %vm8571_vm2, %v1592_v32  ;;  %v6714_v32 = vsub.s32 %v3491_v4, %v3554_v20  ;;  %vm6802_vm1 = vmand %vm3960_vm12, %vm3924_vm11  ;;  %v3322_v20 = vrot.slane %v4663_v37, 3 }
 0x145   : > { %5107 = vmatprep.mubr.msk.bf16.mxu1 %vm8571_vm2, %v1596_v13  ;;  %v3308_v13 = vrot.slane %v4648_v41, 3  ;;  %v4667_v41 = vunpack.c.l.bf16 %v4722_v34  ;;  %vm6917_vm11 = vmand %vm3963_vm5, %vm3927_vm4 }
 0x146   : > { %5260 = vmatmul.mubr.msk.bf16.gmra.mrb[20].mxu0 %vm8571_vm2, %v2860_v19  ;;  %v6725_v19 = vsel %vm8572_vm6, %v6704_v52, %v3312_v26  ;;  %vm3923_vm7 = vcmp.ne.s32.totalorder %v6714_v32, 0  ;;  %vm3959_vm8 = vcmp.lt.s32.totalorder %v6714_v32, 0 }
 0x147   : > { %5263 = vmatprep.mubr.msk.bf16.mxu0 %vm8571_vm2, %v2862_v5  ;;  %v6728_v5 = vsub.s32 %v6664_v43, %v3532_v3  ;;  %v6746_v28 = vsel %vm8572_vm6, %v3307_v53, %v3308_v13  ;;  %vm6773_vm13 = vmand %vm3959_vm8, %vm3923_vm7  ;;  %v6827_v49 = vsel %vm8572_vm6, %v3308_v13, %v6704_v52  ;;  %v4668_v3 = vunpack.c.h.bf16 %v4722_v34 }
 0x148   : > { %8692 = vst [vmem:[#allocation4_spill] sm:$0xff] %v6827_v49  ;;  %v6861_v36 = vrot.slane %v4667_v41, 3  ;;  %v6905_v34 = vadd.s32 120, %v6664_v43  ;;  %v8718_v52 = vmov 0 }
 0x149   : > { %vm3921_vm9 = vcmp.ne.s32.totalorder %v6728_v5, 0  ;;  %vm3957_vm10 = vcmp.lt.s32.totalorder %v6728_v5, 0  ;;  %v6778_v4 = vadd.s32 18, %v6728_v5  ;;  %v6866_v17 = vrot.slane %v4668_v3, 3 }
 0x14a   : > { %vm6786_vm0 = vmand %vm3957_vm10, %vm3921_vm9  ;;  %v8707_v3 = vmov 0 }
 0x14b   : > { %v8870_v63 = vsel %vm6786_vm0, %v6778_v4, %v6728_v5 }
 0x14c   : > { %5108 = vmatmul.mubr.msk.bf16.gmra.mrb[28].mxu1 %vm8571_vm2, %v1600_v61  ;;  %v6740_v61 = vadd.s32 18, %v6714_v32 }
 0x14d   : > { %5111 = vmatprep.mubr.msk.bf16.mxu1 %vm8571_vm2, %v1609_v47 }
 0x14e   : > { %5264 = vmatmul.mubr.msk.bf16.gmra.mrb[24].mxu0 %vm8571_vm2, %v2864_v15  ;;  %v6751_v47 = vmul.u32.u64.low 3817748708, %v6721_v27  ;;  %v6752_v15 = vmul.u32.u64.high 3817748708, %v6721_v27, %v6751_v47 }
 0x14f   : > { %5267 = vmatprep.mubr.msk.bf16.mxu0 %vm8571_vm2, %v2866_v31  ;;  %v4659_v31 = vunpack.c.l.bf16 %v4720_v35  ;;  %v6872_v47 = vadd.s32 72, %v6664_v43 }
 0x150   : > { %v3586_v7 = vshrl.u32 %v6752_v15, 4  ;;  %v6877_v15 = vsub.s32 %v6712_v45, %v3609_v30 }
 0x151   : > { %v3318_v60 = vrot.slane %v4659_v31, 3  ;;  %v6880_v31 = vadd.s32 112, %v6664_v43 }
 0x152   : > { %8698 = vst [vmem:[#allocation9_spill] sm:$0xff] %v6877_v15  ;;  %vm3928_vm9 = vcmp.ne.s32.totalorder %v6877_v15, 0  ;;  %vm3964_vm10 = vcmp.lt.s32.totalorder %v6877_v15, 0 }
 0x153   : > { %vm6945_vm15 = vmand %vm3964_vm10, %vm3928_vm9 }
 0x154   : > { %5112 = vmatmul.mubr.msk.bf16.gmra.mrb[32].mxu1 %vm8571_vm2, %v1618_v10  ;;  %v4660_v10 = vunpack.c.h.bf16 %v4720_v35  ;;  %v3587_v35 = vmul.u32 18, %v3586_v7  ;;  %v8708_v3 = vsel %vm6945_vm15, 4294967295, %v8707_v3 }
 0x155   : > { %8709 = vst [vmem:[#allocation17_spill] sm:$0xff] %v8708_v3 }
 0x156   : > { %5268 = vmatmul.mubr.msk.bf16.gmra.mrb[28].mxu0 %vm8571_vm2, %v2868_v44  ;;  %v4656_v44 = vunpack.c.h.bf16 %v6694_v25  ;;  %v3320_v54 = vrot.slane %v4660_v10, 3 }
 0x157   : > { %5271 = vmatprep.mubr.msk.bf16.mxu0 %vm8571_vm2, %v2870_v29  ;;  %v3575_v29 = vshrl.u32 %v6718_v14, 4 }
 0x158   : > { %v3316_v22 = vrot.slane %v4656_v44, 3  ;;  %v6843_v18 = vsel %vm8572_vm6, %v3318_v60, %v3320_v54  ;;  %v6859_v11 = vsel %vm8572_vm6, %v3320_v54, %v3322_v20  ;;  %v6891_v44 = vsub.s32 %v6721_v27, %v3587_v35 }
 0x159   : > { %v3576_v25 = vmul.u32 18, %v3575_v29  ;;  %8693 = vst [vmem:[#allocation3_spill] sm:$0xff] %v6843_v18  ;;  %8697 = vst [vmem:[#allocation11_spill] sm:$0xff] %v6859_v11  ;;  %v6894_v45 = vmul.u32.u64.low 3817748708, %v6864_v33  ;;  %v6895_v29 = vmul.u32.u64.high 3817748708, %v6864_v33, %v6894_v45 }
 0x15a   : > { %v6849_v24 = vsel %vm8572_vm6, %v3314_v55, %v3316_v22  ;;  %v6855_v53 = vsel %vm8572_vm6, %v3316_v22, %v3318_v60  ;;  %v6868_v55 = vrot.slane %v4664_v1, 3  ;;  %8699 = vst [vmem:[#allocation12_spill] sm:$0xff] %v6891_v44  ;;  %v6929_v22 = vadd.s32 104, %v6664_v43  ;;  %v4724_v45 = vld [vmem:[%s6684_s14 + $0x40] sm:$0xff]  }
 0x15b   : > { %8694 = vst [vmem:[#allocation2_spill] sm:$0xff] %v6849_v24  ;;  %v6852_v14 = vsub.s32 %v6701_v16, %v3576_v25  ;;  %8696 = vst [vmem:[#allocation7_spill] sm:$0xff] %v6855_v53  ;;  %v3619_v16 = vshrl.u32 %v6796_v12, 4  ;;  %v6901_v37 = vmul.u32.u64.low 3817748708, %v6872_v47  ;;  %v6902_v60 = vmul.u32.u64.high 3817748708, %v6872_v47, %v6901_v37  ;;  %v4726_v24 = vld [vmem:[%s6684_s14 + $0x50] sm:$0xff]  }
 0x15c   : > { %v6910_v27 = vmul.u32.u64.low 3817748708, %v6880_v31  ;;  %v6911_v9 = vmul.u32.u64.high 3817748708, %v6880_v31, %v6910_v27  ;;  %v8703_v25 = vmov 0  ;;  %vm3926_vm14 = vcmp.ne.s32.totalorder %v6891_v44, 0 }
 0x15d   : > { %8695 = vst [vmem:[#allocation8_spill] sm:$0xff] %v6852_v14  ;;  %vm3925_vm7 = vcmp.ne.s32.totalorder %v6852_v14, 0  ;;  %vm3961_vm8 = vcmp.lt.s32.totalorder %v6852_v14, 0  ;;  %v6938_v7 = vadd.s32 18, %v6852_v14  ;;  %vm3962_vm4 = vcmp.lt.s32.totalorder %v6891_v44, 0  ;;  %v7004_v27 = vld [vmem:[%s6684_s14 + $0x48] sm:$0xff]  }
 0x15e   : > { %5272 = vmatmul.mubr.msk.bf16.gmra.mrb[32].mxu0 %vm8571_vm2, %v2872_v23  ;;  %v6766_v38 = vmul.u32.u64.low 3817748708, %v6743_v50  ;;  %v6767_v23 = vmul.u32.u64.high 3817748708, %v6743_v50, %v6766_v38  ;;  %vm6933_vm12 = vmand %vm3961_vm8, %vm3925_vm7  ;;  %v3685_v26 = vshrl.u32 %v6911_v9, 4  ;;  %v8723_v9 = vmov 0 }
 0x15f   : > { %v3620_v38 = vmul.u32 18, %v3619_v16  ;;  %v8704_v25 = vsel %vm6933_vm12, 4294967295, %v8703_v25  ;;  %8705 = vst [vmem:[#allocation16_spill] sm:$0xff] %v6938_v7  ;;  %v6962_v16 = vadd.s32 18, %v6891_v44  ;;  %vm6992_vm8 = vmand %vm3962_vm4, %vm3926_vm14  ;;  %v7041_v53 = vadd.s32 144, %v6664_v43 }
 0x160   : > { %v3641_v13 = vshrl.u32 %v6767_v23, 4  ;;  %v6898_v23 = vld [vmem:[%s6684_s14 + $0x38] sm:$0xff]   ;;  %v8715_v6 = vsel %vm6992_vm8, 4294967295, %v8714_v6  ;;  %v8828_v14 = vmov 0 }
 0x161   : > { %v4671_v41 = vunpack.c.l.bf16 %v6898_v23  ;;  %v6951_v1 = vsub.s32 %v6758_v46, %v3620_v38  ;;  %8711 = vst [vmem:[#allocation5_spill] sm:$0xff] %v6962_v16  ;;  %v6971_v46 = vsel %vm8572_vm6, %v3322_v20, %v6868_v55  ;;  %8716 = vst [vmem:[#allocation18_spill] sm:$0xff] %v8715_v6  ;;  %v3630_v20 = vshrl.u32 %v6902_v60, 4 }
 0x162   : > { %v3642_v10 = vmul.u32 18, %v3641_v13  ;;  %v6954_v30 = vmul.u32.u64.low 3817748708, %v6905_v34  ;;  %v6955_v13 = vmul.u32.u64.high 3817748708, %v6905_v34, %v6954_v30  ;;  %8713 = vst [vmem:[#allocation6_spill] sm:$0xff] %v6971_v46  ;;  %v4672_v57 = vunpack.c.h.bf16 %v6898_v23 }
 0x163   : > { %8710 = vst [vmem:[#allocation15_spill] sm:$0xff] %v6951_v1  ;;  %v6977_v38 = vmul.u32.u64.low 3817748708, %v6929_v22  ;;  %v6978_v37 = vmul.u32.u64.high 3817748708, %v6929_v22, %v6977_v38  ;;  %v3330_v30 = vrot.slane %v4671_v41, 3  ;;  %vm3929_vm9 = vcmp.ne.s32.totalorder %v6951_v1, 0 }
 0x164   : > { %v6922_v54 = vsub.s32 %v6743_v50, %v3642_v10  ;;  %v6941_v50 = vadd.s32 18, %v6877_v15  ;;  %v6967_v10 = vsel %vm8572_vm6, %v6861_v36, %v6866_v17  ;;  %v3652_v38 = vshrl.u32 %v6895_v29, 4  ;;  %v8897_v12 = vld [vmem:[#allocation8_spill] sm:$0xff] }
 0x165   : > { %8712 = vst [vmem:[#allocation14_spill] sm:$0xff] %v6967_v10  ;;  %vm3965_vm10 = vcmp.lt.s32.totalorder %v6951_v1, 0  ;;  %v4675_v29 = vunpack.c.l.bf16 %v4724_v45  ;;  %v4676_v41 = vunpack.c.h.bf16 %v4724_v45  ;;  %v7021_v39 = vadd.s32 18, %v6951_v1 }
 0x166   : > { %8702 = vst [vmem:[#allocation10_spill] sm:$0xff] %v6922_v54  ;;  %8706 = vst [vmem:[#allocation13_spill] sm:$0xff] %v6941_v50  ;;  %vm3931_vm5 = vcmp.ne.s32.totalorder %v6922_v54, 0  ;;  %vm3967_vm7 = vcmp.lt.s32.totalorder %v6922_v54, 0  ;;  %v6998_v35 = vadd.s32 18, %v6922_v54  ;;  %v7026_v46 = vsel %vm8572_vm6, %v6868_v55, %v6861_v36 }
 0x167   : > { %vm7010_vm14 = vmand %vm3967_vm7, %vm3931_vm5  ;;  %8721 = vst [vmem:[#allocation21_spill] sm:$0xff] %v7021_v39  ;;  %v3663_v10 = vshrl.u32 %v6926_v59, 4  ;;  %v7037_v23 = vsel %vm8572_vm6, %v6866_v17, %v3330_v30  ;;  %v3653_v45 = vmul.u32 18, %v3652_v38  ;;  %v4679_v60 = vunpack.c.l.bf16 %v7004_v27 }
 0x168   : > { %8717 = vst [vmem:[#allocation19_spill] sm:$0xff] %v6998_v35  ;;  %v8719_v52 = vsel %vm7010_vm14, 4294967295, %v8718_v52  ;;  %8722 = vst [vmem:[#allocation22_spill] sm:$0xff] %v7026_v46  ;;  %v3631_v55 = vmul.u32 18, %v3630_v20  ;;  %v3696_v59 = vshrl.u32 %v6955_v13, 4  ;;  %v7049_v46 = vadd.s32 128, %v6664_v43 }
 0x169   : > { %8720 = vst [vmem:[#allocation20_spill] sm:$0xff] %v8719_v52  ;;  %vm7031_vm4 = vmand %vm3965_vm10, %vm3929_vm9  ;;  %v3334_v17 = vrot.slane %v4675_v29, 3  ;;  %v3686_v38 = vmul.u32 18, %v3685_v26  ;;  %v3332_v11 = vrot.slane %v4672_v57, 3  ;;  %v3664_v18 = vmul.u32 18, %v3663_v10 }
 0x16a   : > { %v8724_v9 = vsel %vm7031_vm4, 4294967295, %v8723_v9  ;;  %8726 = vst [vmem:[#allocation24_spill] sm:$0xff] %v7037_v23  ;;  %v3336_v23 = vrot.slane %v4676_v41, 3  ;;  %v3674_v52 = vshrl.u32 %v6978_v37, 4  ;;  %v7057_v20 = vadd.s32 152, %v6664_v43 }
 0x16b   : > { %8725 = vst [vmem:[#allocation23_spill] sm:$0xff] %v8724_v9  ;;  %v7060_v13 = vsub.s32 %v6864_v33, %v3653_v45  ;;  %v7062_v36 = vrot.slane %v4679_v60, 3  ;;  %v7065_v29 = vmul.u32.u64.low 3817748708, %v7041_v53  ;;  %v7066_v26 = vmul.u32.u64.high 3817748708, %v7041_v53, %v7065_v29 }
 0x16c   : > { %v7069_v57 = vsub.s32 %v6872_v47, %v3631_v55  ;;  %v3697_v41 = vmul.u32 18, %v3696_v59  ;;  %v7073_v10 = vmul.u32.u64.low 3817748708, %v7049_v46  ;;  %v7074_v37 = vmul.u32.u64.high 3817748708, %v7049_v46, %v7073_v10 }
 0x16d   : > { %8727 = vst [vmem:[#allocation25_spill] sm:$0xff] %v7060_v13  ;;  %v7077_v1 = vsel %vm8572_vm6, %v3334_v17, %v3336_v23  ;;  %v7080_v33 = vsub.s32 %v6880_v31, %v3686_v38  ;;  %v7083_v60 = vsel %vm8572_vm6, %v3330_v30, %v3332_v11  ;;  %v7086_v45 = vsel %vm8572_vm6, %v3332_v11, %v3334_v17 }
 0x16e   : > { %8728 = vst [vmem:[#allocation26_spill] sm:$0xff] %v7069_v57  ;;  %8729 = vst [vmem:[#allocation27_spill] sm:$0xff] %v7077_v1  ;;  %v7089_v47 = vsub.s32 %v6887_v48, %v3664_v18  ;;  %v3675_v55 = vmul.u32 18, %v3674_v52  ;;  %v7092_v59 = vmul.u32.u64.low 3817748708, %v7057_v20  ;;  %v7093_v29 = vmul.u32.u64.high 3817748708, %v7057_v20, %v7092_v59 }
 0x16f   : > { %8730 = vst [vmem:[#allocation28_spill] sm:$0xff] %v7080_v33  ;;  %8731 = vst [vmem:[#allocation29_spill] sm:$0xff] %v7083_v60  ;;  %vm3932_vm5 = vcmp.ne.s32.totalorder %v7060_v13, 0  ;;  %vm3968_vm7 = vcmp.lt.s32.totalorder %v7060_v13, 0  ;;  %v7099_v31 = vsel %vm8572_vm6, %v3336_v23, %v7062_v36  ;;  %v4683_v30 = vunpack.c.l.bf16 %v4726_v24 }
 0x170   : > { %8732 = vst [vmem:[#allocation30_spill] sm:$0xff] %v7086_v45  ;;  %8733 = vst [vmem:[#allocation31_spill] sm:$0xff] %v7089_v47  ;;  %v7102_v11 = vadd.s32 18, %v7060_v13  ;;  %v7107_v52 = vsub.s32 %v6905_v34, %v3697_v41  ;;  %v7110_v18 = vadd.s32 18, %v7069_v57  ;;  %v4684_v48 = vunpack.c.h.bf16 %v4726_v24 }
 0x171   : > { %8734 = vst [vmem:[#allocation32_spill] sm:$0xff] %v7099_v31  ;;  %v7114_v23 = vadd.s32 136, %v6664_v43  ;;  %v7118_v17 = vadd.s32 18, %v7080_v33  ;;  %v7122_v38 = vsub.s32 %v6929_v22, %v3675_v55  ;;  %vm7128_vm10 = vmand %vm3968_vm7, %vm3932_vm5  ;;  %v8740_v34 = vmov 0 }
 0x172   : > { %8735 = vst [vmem:[#allocation33_spill] sm:$0xff] %v7102_v11  ;;  %8736 = vst [vmem:[#allocation34_spill] sm:$0xff] %v7107_v52  ;;  %v8741_v34 = vsel %vm7128_vm10, 4294967295, %v8740_v34  ;;  %vm3969_vm2 = vcmp.lt.s32.totalorder %v7089_v47, 0  ;;  %v7134_v24 = vadd.s32 18, %v7089_v47  ;;  %v3729_v41 = vshrl.u32 %v7066_v26, 4 }
 0x173   : > { %8737 = vst [vmem:[#allocation35_spill] sm:$0xff] %v7110_v18  ;;  %8738 = vst [vmem:[#allocation36_spill] sm:$0xff] %v7118_v17  ;;  %v7138_v10 = vadd.s32 176, %v6664_v43  ;;  %vm8744_vm9 = vcmp.ne.s32.totalorder %v7069_v57, 0  ;;  %vm8745_vm6 = vcmp.lt.s32.totalorder %v7069_v57, 0  ;;  %v8746_v22 = vmov 0 }
 0x174   : > { %8739 = vst [vmem:[#allocation37_spill] sm:$0xff] %v7122_v38  ;;  %8742 = vst [vmem:[#allocation38_spill] sm:$0xff] %v8741_v34  ;;  %vm3936_vm5 = vcmp.ne.s32.totalorder %v7107_v52, 0  ;;  %vm3972_vm7 = vcmp.lt.s32.totalorder %v7107_v52, 0  ;;  %v7150_v55 = vrot.slane %v4683_v30, 3  ;;  %v3707_v59 = vshrl.u32 %v7074_v37, 4 }
 0x175   : > { %8743 = vst [vmem:[#allocation39_spill] sm:$0xff] %v7134_v24  ;;  %vm7144_vm4 = vmand %vm8745_vm6, %vm8744_vm9  ;;  %vm8749_vm14 = vcmp.ne.s32.totalorder %v7080_v33, 0  ;;  %vm8750_vm8 = vcmp.lt.s32.totalorder %v7080_v33, 0  ;;  %v8751_v26 = vmov 0  ;;  %v7161_v45 = vrot.slane %v4684_v48, 3 }
 0x176   : > { %v8747_v22 = vsel %vm7144_vm4, 4294967295, %v8746_v22  ;;  %vm7157_vm15 = vmand %vm8750_vm8, %vm8749_vm14  ;;  %v4680_v31 = vunpack.c.h.bf16 %v7004_v27  ;;  %v7165_v60 = vmul.u32.u64.low 3817748708, %v7114_v23  ;;  %v7166_v1 = vmul.u32.u64.high 3817748708, %v7114_v23, %v7165_v60 }
 0x177   : > { %8748 = vst [vmem:[#allocation40_spill] sm:$0xff] %v8747_v22  ;;  %v8752_v26 = vsel %vm7157_vm15, 4294967295, %v8751_v26  ;;  %vm8754_vm6 = vcmp.ne.s32.totalorder %v7089_v47, 0  ;;  %v8755_v37 = vmov 0  ;;  %v7175_v30 = vadd.s32 18, %v7107_v52  ;;  %vm7180_vm12 = vmand %vm3972_vm7, %vm3936_vm5  ;;  %v7243_v52 = vld [vmem:[%s6684_s14 + $0x68] sm:$0xff]  }
 0x178   : > { %8753 = vst [vmem:[#allocation41_spill] sm:$0xff] %v8752_v26  ;;  %vm7170_vm9 = vmand %vm3969_vm2, %vm8754_vm6  ;;  %vm3934_vm8 = vcmp.ne.s32.totalorder %v7122_v38, 0  ;;  %vm3970_vm14 = vcmp.lt.s32.totalorder %v7122_v38, 0  ;;  %v3740_v27 = vshrl.u32 %v7093_v29, 4  ;;  %v8759_v48 = vmov 0  ;;  %v4728_v29 = vld [vmem:[%s6684_s14 + $0x60] sm:$0xff]  }
 0x179   : > { %v8756_v37 = vsel %vm7170_vm9, 4294967295, %v8755_v37  ;;  %8758 = vst [vmem:[#allocation43_spill] sm:$0xff] %v7175_v30  ;;  %v8760_v48 = vsel %vm7180_vm12, 4294967295, %v8759_v48  ;;  %v3730_v60 = vmul.u32 18, %v3729_v41  ;;  %v7189_v54 = vadd.s32 160, %v6664_v43  ;;  %v4727_v41 = vld [vmem:[%s6684_s14 + $0x58] sm:$0xff]   ;;  %vm7228_vm5 = vmand %vm3970_vm14, %vm3934_vm8 }
 0x17a   : > { %8757 = vst [vmem:[#allocation42_spill] sm:$0xff] %v8756_v37  ;;  %8761 = vst [vmem:[#allocation44_spill] sm:$0xff] %v8760_v48  ;;  %v7185_v39 = vmul.u32.u64.low 3817748708, %v7138_v10  ;;  %v7186_v9 = vmul.u32.u64.high 3817748708, %v7138_v10, %v7185_v39  ;;  %v3708_v44 = vmul.u32 18, %v3707_v59  ;;  %v7201_v16 = vadd.s32 184, %v6664_v43 }
 0x17b   : > { %v7212_v13 = vadd.s32 18, %v7122_v38  ;;  %vm8763_vm2 = vcmask 1044480   ;;  %v8765_v35 = vmov 0  ;;  %v3340_v39 = vrot.slane %v4680_v31, 3 }
 0x17c   : > { %v7217_v59 = vsel %vm8763_vm2, %v7150_v55, %v7161_v45  ;;  %v8766_v35 = vsel %vm7228_vm5, 4294967295, %v8765_v35  ;;  %v3741_v47 = vmul.u32 18, %v3740_v27  ;;  %v7233_v24 = vadd.s32 168, %v6664_v43  ;;  %vm8771_vm8 = vmmov %vm8763_vm2 }
 0x17d   : > { %8762 = vst [vmem:[#allocation45_spill] sm:$0xff] %v7212_v13  ;;  %8764 = vst [vmem:[#allocation46_spill] sm:$0xff] %v7217_v59  ;;  %v7236_v59 = vsub.s32 %v7041_v53, %v3730_v60  ;;  %v4687_v37 = vunpack.c.l.bf16 %v4727_v41  ;;  %v7239_v48 = vmul.u32.u64.low 3817748708, %v7189_v54  ;;  %v7240_v26 = vmul.u32.u64.high 3817748708, %v7189_v54, %v7239_v48 }
 0x17e   : > { %8767 = vst [vmem:[#allocation47_spill] sm:$0xff] %v8766_v35  ;;  %v7248_v33 = vsub.s32 %v7049_v46, %v3708_v44  ;;  %v4691_v31 = vunpack.c.l.bf16 %v4728_v29  ;;  %v7251_v27 = vmul.u32.u64.low 3817748708, %v7201_v16  ;;  %v7252_v17 = vmul.u32.u64.high 3817748708, %v7201_v16, %v7251_v27 }
 0x17f   : > { %8768 = vst [vmem:[#allocation48_spill] sm:$0xff] %v7236_v59  ;;  %v3718_v48 = vshrl.u32 %v7166_v1, 4  ;;  %v4692_v60 = vunpack.c.h.bf16 %v4728_v29  ;;  %v4688_v18 = vunpack.c.h.bf16 %v4727_v41  ;;  %v7264_v44 = vsub.s32 %v7057_v20, %v3741_v47 }
 0x180   : > { %8769 = vst [vmem:[#allocation49_spill] sm:$0xff] %v7248_v33  ;;  %v4695_v46 = vunpack.c.l.bf16 %v7243_v52  ;;  %v7268_v27 = vmul.u32.u64.low 3817748708, %v7233_v24  ;;  %v7269_v11 = vmul.u32.u64.high 3817748708, %v7233_v24, %v7268_v27  ;;  %vm3939_vm7 = vcmp.ne.s32.totalorder %v7236_v59, 0 }
 0x181   : > { %8770 = vst [vmem:[#allocation50_spill] sm:$0xff] %v7264_v44  ;;  %vm3975_vm6 = vcmp.lt.s32.totalorder %v7236_v59, 0  ;;  %v7277_v1 = vsel %vm8771_vm8, %v7062_v36, %v3340_v39  ;;  %v3773_v29 = vshrl.u32 %v7186_v9, 4  ;;  %vm3973_vm2 = vcmp.lt.s32.totalorder %v7248_v33, 0 }
 0x182   : > { %8772 = vst [vmem:[#allocation51_spill] sm:$0xff] %v7277_v1  ;;  %v3346_v20 = vrot.slane %v4687_v37, 3  ;;  %v7282_v47 = vrot.slane %v4691_v31, 3  ;;  %v7285_v41 = vadd.s32 18, %v7236_v59  ;;  %v3719_v27 = vmul.u32 18, %v3718_v48  ;;  %vm7289_vm5 = vmand %vm3975_vm6, %vm3939_vm7 }
 0x183   : > { %v3352_v53 = vrot.slane %v4692_v60, 3  ;;  %v7287_v38 = vrot.slane %v4688_v18, 3  ;;  %v8774_v13 = vmov 0  ;;  %v7294_v9 = vadd.s32 18, %v7248_v33 }
 0x184   : > { %8773 = vst [vmem:[#allocation52_spill] sm:$0xff] %v7285_v41  ;;  %v8775_v13 = vsel %vm7289_vm5, 4294967295, %v8774_v13  ;;  %vm3940_vm8 = vcmp.ne.s32.totalorder %v7264_v44, 0  ;;  %vm3976_vm14 = vcmp.lt.s32.totalorder %v7264_v44, 0  ;;  %v7298_v36 = vrot.slane %v4695_v46, 3 }
 0x185   : > { %8776 = vst [vmem:[#allocation53_spill] sm:$0xff] %v8775_v13  ;;  %8777 = vst [vmem:[#allocation54_spill] sm:$0xff] %v7294_v9  ;;  %vm8778_vm12 = vcmp.ne.s32.totalorder %v7248_v33, 0  ;;  %v8779_v37 = vmov 0  ;;  %vm8782_vm7 = vcmask 1044480   ;;  %v3774_v31 = vmul.u32 18, %v3773_v29 }
 0x186   : > { %vm7302_vm9 = vmand %vm3973_vm2, %vm8778_vm12  ;;  %v7308_v18 = vsel %vm8782_vm7, %v3340_v39, %v7150_v55  ;;  %v3751_v48 = vshrl.u32 %v7240_v26, 4  ;;  %v7312_v60 = vadd.s32 208, %v6664_v43  ;;  %v7321_v35 = vadd.s32 18, %v7264_v44  ;;  %v7404_v44 = vld [vmem:[%s6684_s14 + $0x78] sm:$0xff]  }
 0x187   : > { %v8780_v37 = vsel %vm7302_vm9, 4294967295, %v8779_v37  ;;  %8783 = vst [vmem:[#allocation56_spill] sm:$0xff] %v7308_v18  ;;  %vm8785_vm6 = vmmov %vm8782_vm7  ;;  %v3784_v6 = vshrl.u32 %v7252_v17, 4  ;;  %v7325_v55 = vadd.s32 192, %v6664_v43  ;;  %v7350_v18 = vadd.s32 216, %v6664_v43 }
 0x188   : > { %8781 = vst [vmem:[#allocation55_spill] sm:$0xff] %v8780_v37  ;;  %v7318_v46 = vsel %vm8785_vm6, %v7161_v45, %v3346_v20  ;;  %8787 = vst [vmem:[#allocation59_spill] sm:$0xff] %v7321_v35  ;;  %v8789_v45 = vmov 0  ;;  %v7359_v59 = vsub.s32 %v7114_v23, %v3719_v27  ;;  %v7369_v41 = vsub.s32 %v7138_v10, %v3774_v31  ;;  %v4730_v27 = vld [vmem:[%s6684_s14 + $0x70] sm:$0xff]  }
 0x189   : > { %8786 = vst [vmem:[#allocation58_spill] sm:$0xff] %v7318_v46  ;;  %vm7337_vm12 = vmand %vm3976_vm14, %vm3940_vm8  ;;  %v3752_v13 = vmul.u32 18, %v3751_v48  ;;  %v7385_v10 = vmul.u32.u64.low 3817748708, %v7350_v18  ;;  %v7386_v31 = vmul.u32.u64.high 3817748708, %v7350_v18, %v7385_v10  ;;  %v7389_v48 = vadd.s32 200, %v6664_v43 }
 0x18a   : > { %v8790_v45 = vsel %vm7337_vm12, 4294967295, %v8789_v45  ;;  %vm8792_vm2 = vmmov %vm8785_vm6  ;;  %8797 = vst [vmem:[#allocation65_spill] sm:$0xff] %v7359_v59  ;;  %vm3938_vm8 = vcmp.ne.s32.totalorder %v7359_v59, 0  ;;  %vm3974_vm6 = vcmp.lt.s32.totalorder %v7359_v59, 0  ;;  %v7397_v23 = vadd.s32 224, %v6664_v43 }
 0x18b   : > { %8791 = vst [vmem:[#allocation61_spill] sm:$0xff] %v8790_v45  ;;  %v7343_v17 = vsel %vm8792_vm2, %v7282_v47, %v3352_v53  ;;  %vm8794_vm7 = vmmov %vm8792_vm2  ;;  %v4699_v10 = vunpack.c.l.bf16 %v4730_v27  ;;  %v7410_v45 = vsub.s32 %v7189_v54, %v3752_v13  ;;  %v4696_v33 = vunpack.c.h.bf16 %v7243_v52 }
 0x18c   : > { %8793 = vst [vmem:[#allocation62_spill] sm:$0xff] %v7343_v17  ;;  %v7347_v29 = vsel %vm8794_vm7, %v3346_v20, %v7287_v38  ;;  %vm8798_vm14 = vmmov %vm8792_vm2  ;;  %v3762_v20 = vshrl.u32 %v7269_v11, 4  ;;  %v7381_v11 = vmul.u32.u64.low 3817748708, %v7325_v55  ;;  %v7382_v46 = vmul.u32.u64.high 3817748708, %v7325_v55, %v7381_v11 }
 0x18d   : > { %8795 = vst [vmem:[#allocation63_spill] sm:$0xff] %v7347_v29  ;;  %v7363_v17 = vsel %vm8798_vm14, %v3352_v53, %v7298_v36  ;;  %8801 = vst [vmem:[#allocation68_spill] sm:$0xff] %v7369_v41  ;;  %v3785_v53 = vmul.u32 18, %v3784_v6  ;;  %v7400_v11 = vadd.s32 18, %v7359_v59  ;;  %vm8813_vm7 = vcmp.ne.s32.totalorder %v7369_v41, 0 }
 0x18e   : > { %8799 = vst [vmem:[#allocation66_spill] sm:$0xff] %v7363_v17  ;;  %v3763_v6 = vmul.u32 18, %v3762_v20  ;;  %v4700_v17 = vunpack.c.h.bf16 %v4730_v27  ;;  %8804 = vst [vmem:[#allocation71_spill] sm:$0xff] %v7410_v45  ;;  %v7433_v13 = vmul.u32.u64.low 3817748708, %v7397_v23  ;;  %v7434_v52 = vmul.u32.u64.high 3817748708, %v7397_v23, %v7433_v13 }
 0x18f   : > { %8802 = vst [vmem:[#allocation69_spill] sm:$0xff] %v7400_v11  ;;  %v7413_v20 = vsub.s32 %v7201_v16, %v3785_v53  ;;  %v4703_v16 = vunpack.c.l.bf16 %v7404_v44  ;;  %vm7452_vm2 = vmand %vm3974_vm6, %vm3938_vm8  ;;  %v8811_v13 = vmov 0  ;;  %vm8814_vm14 = vcmp.lt.s32.totalorder %v7369_v41, 0 }
 0x190   : > { %v7429_v54 = vsub.s32 %v7233_v24, %v3763_v6  ;;  %v3360_v24 = vrot.slane %v4700_v17, 3  ;;  %v3795_v6 = vshrl.u32 %v7382_v46, 4  ;;  %v8812_v13 = vsel %vm7452_vm2, 4294967295, %v8811_v13  ;;  %vm7463_vm5 = vmand %vm8814_vm14, %vm8813_vm7 }
 0x191   : > { %8805 = vst [vmem:[#allocation72_spill] sm:$0xff] %v7413_v20  ;;  %v8815_v46 = vmov 0  ;;  %v7468_v17 = vadd.s32 18, %v7410_v45  ;;  %vm8819_vm9 = vcmp.ne.s32.totalorder %v7410_v45, 0  ;;  %vm8820_vm12 = vcmp.lt.s32.totalorder %v7410_v45, 0 }
 0x192   : > { %8808 = vst [vmem:[#allocation75_spill] sm:$0xff] %v7429_v54  ;;  %v8816_v46 = vsel %vm7463_vm5, 4294967295, %v8815_v46  ;;  %vm3942_vm8 = vcmp.ne.s32.totalorder %v7429_v54, 0  ;;  %vm3978_vm6 = vcmp.lt.s32.totalorder %v7429_v54, 0  ;;  %vm7478_vm15 = vmand %vm8820_vm12, %vm8819_vm9  ;;  %vm8826_vm9 = vcmp.ne.s32.totalorder %v7413_v20, 0 }
 0x193   : > { %8817 = vst [vmem:[#allocation78_spill] sm:$0xff] %v8816_v46  ;;  %8818 = vst [vmem:[#allocation79_spill] sm:$0xff] %v7468_v17  ;;  %vm8827_vm12 = vcmp.lt.s32.totalorder %v7413_v20, 0  ;;  %vm8831_vm14 = vcmask 1044480   ;;  %v8834_v59 = vmov 0  ;;  %vm4362_vm5 = vcmask 259072  }
 0x194   : > { %vm7499_vm7 = vmand %vm8827_vm12, %vm8826_vm9  ;;  %v8874_v17 = vmov 0 }
 0x195   : > { %v8829_v14 = vsel %vm7499_vm7, 4294967295, %v8828_v14  ;;  %vm7521_vm9 = vmand %vm3978_vm6, %vm3942_vm8 }
 0x196   : > { %8830 = vst [vmem:[#allocation83_spill] sm:$0xff] %v8829_v14  ;;  %v8835_v59 = vsel %vm7521_vm9, 4294967295, %v8834_v59  ;;  %vm8837_vm12 = vmmov %vm8831_vm14 }
 0x197   : > { %8836 = vst [vmem:[#allocation86_spill] sm:$0xff] %v8835_v59  ;;  %vm8841_vm8 = vmmov %vm8837_vm12 }
 0x198   : > { %vm8843_vm6 = vmmov %vm8841_vm8 }
 0x1c7   : > { %v7245_v30 = vpop.f32.mrb[0].mxu1 }
 0x1c8   : > { %v7254_v57 = vpop.f32.mrb[1].mxu1 }
 0x1c9   : > { %v7261_v22 = vpop.f32.mrb[2].mxu1 }
 0x1ca   : > { %v7271_v34 = vpop.f32.mrb[3].mxu1 }
 0x1cf   : > { %v7314_v1 = vpop.f32.mrb[4].mxu1 }
 0x1d0   : > { %8784 = vst [vmem:[#allocation57_spill] sm:$0xff] %v7314_v1  ;;  %v7327_v39 = vpop.f32.mrb[5].mxu1 }
 0x1d1   : > { %8788 = vst [vmem:[#allocation60_spill] sm:$0xff] %v7327_v39  ;;  %v7352_v26 = vpop.f32.mrb[6].mxu1 }
 0x1d2   : > { %8796 = vst [vmem:[#allocation64_spill] sm:$0xff] %v7352_v26  ;;  %v7366_v29 = vpop.f32.mrb[7].mxu1  ;;  %v7372_v26 = vmul.u32.u64.low 3817748708, %v7312_v60  ;;  %v7373_v39 = vmul.u32.u64.high 3817748708, %v7312_v60, %v7372_v26 }
 0x1d3   : > { %8800 = vst [vmem:[#allocation67_spill] sm:$0xff] %v7366_v29  ;;  %v7392_v26 = vadd.s32 240, %v6664_v43  ;;  %v7419_v37 = vmul.u32.u64.low 3817748708, %v7389_v48  ;;  %v7420_v29 = vmul.u32.u64.high 3817748708, %v7389_v48, %v7419_v37 }
 0x1d4   : > { %v3358_v37 = vrot.slane %v4699_v10, 3  ;;  %v3817_v15 = vshrl.u32 %v7373_v39, 4  ;;  %v3356_v39 = vrot.slane %v4696_v33, 3  ;;  %v3828_v10 = vshrl.u32 %v7386_v31, 4 }
 0x1d5   : > { %v7423_v27 = vmul.u32.u64.low 3817748708, %v7392_v26  ;;  %v7424_v1 = vmul.u32.u64.high 3817748708, %v7392_v26, %v7423_v27  ;;  %v8821_v33 = vmov 0  ;;  %v7483_v31 = vadd.s32 18, %v7413_v20 }
 0x1d6   : > { %v7443_v27 = vadd.s32 248, %v6664_v43  ;;  %v8822_v33 = vsel %vm7478_vm15, 4294967295, %v8821_v33  ;;  %v7532_v46 = vsel %vm8837_vm12, %v3358_v37, %v3360_v24 }
 0x1d7   : > { %v7406_v35 = vpop.f32.mrb[8].mxu1  ;;  %8823 = vst [vmem:[#allocation80_spill] sm:$0xff] %v8822_v33  ;;  %8824 = vst [vmem:[#allocation81_spill] sm:$0xff] %v7483_v31 }
 0x1d8   : > { %8803 = vst [vmem:[#allocation70_spill] sm:$0xff] %v7406_v35  ;;  %v7416_v9 = vpop.f32.mrb[9].mxu1  ;;  %v7486_v50 = vmul.u32.u64.low 3817748708, %v7443_v27  ;;  %v7487_v3 = vmul.u32.u64.high 3817748708, %v7443_v27, %v7486_v50  ;;  %8838 = vst [vmem:[#allocation87_spill] sm:$0xff] %v7532_v46 }
 0x1d9   : > { %8806 = vst [vmem:[#allocation73_spill] sm:$0xff] %v7416_v9  ;;  %v7426_v35 = vpop.f32.mrb[10].mxu1  ;;  %v7439_v9 = vadd.s32 18, %v7369_v41  ;;  %v7509_v50 = vadd.s32 18, %v7429_v54  ;;  %v3839_v41 = vshrl.u32 %v7434_v52, 4 }
 0x1da   : > { %8807 = vst [vmem:[#allocation74_spill] sm:$0xff] %v7426_v35  ;;  %v7436_v53 = vpop.f32.mrb[11].mxu1  ;;  %v3818_v35 = vmul.u32 18, %v3817_v15  ;;  %v7506_v15 = vsel %vm8831_vm14, %v7287_v38, %v7282_v47  ;;  %v3829_v38 = vmul.u32 18, %v3828_v10  ;;  %v3806_v47 = vshrl.u32 %v7420_v29, 4  ;;  %vm8839_vm14 = vmmov %vm8837_vm12 }
 0x1db   : > { %8809 = vst [vmem:[#allocation76_spill] sm:$0xff] %v7436_v53  ;;  %8810 = vst [vmem:[#allocation77_spill] sm:$0xff] %v7439_v9  ;;  %v7472_v53 = vrot.slane %v4703_v16, 3  ;;  %v7536_v49 = vsel %vm8839_vm14, %v7298_v36, %v3356_v39  ;;  %v7540_v10 = vadd.s32 232, %v6664_v43 }
 0x1dc   : > { %8832 = vst [vmem:[#allocation84_spill] sm:$0xff] %v7506_v15  ;;  %8833 = vst [vmem:[#allocation85_spill] sm:$0xff] %v7509_v50  ;;  %v4732_v15 = vld [vmem:[%s6684_s14 + $0x80] sm:$0xff]   ;;  %v7553_v36 = vsub.s32 %v7312_v60, %v3818_v35  ;;  %v7570_v46 = vsub.s32 %v7350_v18, %v3829_v38  ;;  %v3807_v35 = vmul.u32 18, %v3806_v47 }
 0x1dd   : > { %8840 = vst [vmem:[#allocation88_spill] sm:$0xff] %v7536_v49  ;;  %v7557_v52 = vsel %vm8841_vm8, %v3360_v24, %v7472_v53  ;;  %v4707_v14 = vunpack.c.l.bf16 %v4732_v15  ;;  %v4708_v60 = vunpack.c.h.bf16 %v4732_v15  ;;  %v7573_v24 = vld [vmem:[%s6684_s14 + $0x88] sm:$0xff]   ;;  %vm8846_vm8 = vcmask 261120  }
 0x1de   : > { %8842 = vst [vmem:[#allocation89_spill] sm:$0xff] %v7557_v52  ;;  %8845 = vst [vmem:[#allocation91_spill] sm:$0xff] %v7570_v46  ;;  %vm3947_vm12 = vcmp.ne.s32.totalorder %v7553_v36, 0  ;;  %v7600_v15 = vadd.s32 18, %v7553_v36  ;;  %v4711_v38 = vunpack.c.l.bf16 %v7573_v24 }
 0x1df   : > { %v7489_v16 = vpop.f32.mrb[12].mxu1  ;;  %v3366_v49 = vrot.slane %v4707_v14, 3 }
 0x1e0   : > { %8825 = vst [vmem:[#allocation82_spill] sm:$0xff] %v7489_v16  ;;  %v3796_v16 = vmul.u32 18, %v3795_v6  ;;  %v7511_v7 = vpop.f32.mrb[13].mxu1  ;;  %v3861_v6 = vshrl.u32 %v7424_v1, 4  ;;  %v7567_v1 = vsel %vm8843_vm6, %v3356_v39, %v3358_v37  ;;  %v3872_v39 = vshrl.u32 %v7487_v3, 4  ;;  %vm8847_vm6 = vmmov %vm8846_vm8 }
 0x1e1   : > { %v7529_v11 = vpop.f32.mrb[14].mxu1  ;;  %8844 = vst [vmem:[#allocation90_spill] sm:$0xff] %v7567_v1  ;;  %v7581_v37 = vmul.u32.u64.low 3817748708, %v7540_v10  ;;  %v7582_v18 = vmul.u32.u64.high 3817748708, %v7540_v10, %v7581_v37  ;;  %vm8848_vm9 = vmmov %vm8847_vm6  ;;  %v4704_v3 = vunpack.c.h.bf16 %v7404_v44  ;;  %v4734_v1 = vld [vmem:[%s6684_s14 + $0x90] sm:$0xff]   ;;  %v3368_v44 = vrot.slane %v4708_v60, 3 }
 0x1e2   : > { %v7542_v29 = vpop.f32.mrb[15].mxu1  ;;  %v7564_v33 = vsub.s32 %v7325_v55, %v3796_v16  ;;  %v3862_v20 = vmul.u32 18, %v3861_v6  ;;  %v3840_v55 = vmul.u32 18, %v3839_v41  ;;  %v5707_v16 = vmov 0.0   ;;  %vm8849_vm7 = vmmov %vm8847_vm6 }
 0x1e3   : > { %4320 = vst.msk [vmem:[%s7578_s18] sm:$0xff] %vm8846_vm8, %v5707_v16  ;;  %vm8850_vm15 = vmmov %vm8847_vm6  ;;  %v7613_v37 = vsub.s32 %v7389_v48, %v3807_v35  ;;  %v7629_v48 = vadd.s32 18, %v7570_v46  ;;  %v3873_v14 = vmul.u32 18, %v3872_v39  ;;  %v7632_v35 = vadd.s32 272, %v6664_v43 }
 0x1e4   : > { %4321 = vst.msk [vmem:[%s7578_s18 + $0x8] sm:$0xff] %vm8847_vm6, %v5707_v16  ;;  %vm3945_vm14 = vcmp.ne.s32.totalorder %v7564_v33, 0  ;;  %v7610_v6 = vadd.s32 18, %v7564_v33  ;;  %v7620_v54 = vsub.s32 %v7392_v26, %v3862_v20  ;;  %v3370_v20 = vrot.slane %v4711_v38, 3 }
 0x1e5   : > { %4359 = vst.msk [vmem:[%s7578_s18 + $0x138] sm:$0xff] %vm8848_vm9, %v5707_v16  ;;  %vm3981_vm9 = vcmp.lt.s32.totalorder %v7564_v33, 0  ;;  %v4715_v60 = vunpack.c.l.bf16 %v4734_v1  ;;  %vm3982_vm2 = vcmp.lt.s32.totalorder %v7613_v37, 0  ;;  %v7653_v59 = vadd.s32 18, %v7613_v37  ;;  %v9111_v39 = vld [vmem:[#allocation91_spill] sm:$0xff] }
 0x1e6   : > { %4360 = vst.msk [vmem:[%s7578_s18 + $0x140] sm:$0xff] %vm8849_vm7, %v5707_v16  ;;  %vm8852_vm7 = vcmp.lt.s32.totalorder %v7553_v36, 0  ;;  %vm7646_vm6 = vmand %vm3981_vm9, %vm3945_vm14  ;;  %vm3951_vm14 = vcmp.ne.s32.totalorder %v7620_v54, 0  ;;  %vm3987_vm9 = vcmp.lt.s32.totalorder %v7620_v54, 0  ;;  %v3850_v38 = vshrl.u32 %v7582_v18, 4 }
 0x1e7   : > { %4361 = vst.msk [vmem:[%s7578_s18 + $0x148] sm:$0xff] %vm8850_vm15, %v5707_v16  ;;  %v7597_v41 = vpop.f32.mrb[16].mxu1  ;;  %vm7638_vm8 = vmand %vm8852_vm7, %vm3947_vm12  ;;  %vm3946_vm15 = vcmp.ne.s32.totalorder %v7613_v37, 0  ;;  %vm8857_vm12 = vcmp.ne.s32.totalorder %v7570_v46, 0  ;;  %v7668_v31 = vsub.s32 %v7443_v27, %v3873_v14  ;;  %v7683_v18 = vadd.s32 18, %v7620_v54 }
 0x1e8   : > { %4363 = vst.msk [vmem:[%s7578_s18 + $0x150] sm:$0x3f] %vm4362_vm5, %v5707_v16  ;;  %v7606_v47 = vpop.f32.mrb[17].mxu1  ;;  %v7623_v16 = vsub.s32 %v7397_v23, %v3840_v55  ;;  %vm3984_vm5 = vcmp.lt.s32.totalorder %v7570_v46, 0  ;;  %v3364_v23 = vrot.slane %v4704_v3, 3  ;;  %v4716_v55 = vunpack.c.h.bf16 %v4734_v1  ;;  %v8923_v46 = vld [vmem:[#allocation3_spill] sm:$0xff] }
 0x1e9   : > { %v7616_v52 = vpop.f32.mrb[18].mxu1  ;;  %v4712_v3 = vunpack.c.h.bf16 %v7573_v24  ;;  %vm7658_vm7 = vmand %vm3984_vm5, %vm8857_vm12  ;;  %8860 = vst [vmem:[#allocation93_spill] sm:$0xff] %v7668_v31  ;;  %v7671_v24 = vmul.u32.u64.low 3817748708, %v7632_v35  ;;  %v7672_v45 = vmul.u32.u64.high 3817748708, %v7632_v35, %v7671_v24  ;;  %v8863_v14 = vsel %vm6773_vm13, %v6740_v61, %v6714_v32 }
 0x1ea   : > { %v7625_v50 = vpop.f32.mrb[19].mxu1  ;;  %vm3949_vm4 = vcmp.ne.s32.totalorder %v7623_v16, 0  ;;  %vm3985_vm10 = vcmp.lt.s32.totalorder %v7623_v16, 0  ;;  %vm7678_vm5 = vmand %vm3982_vm2, %vm3946_vm15  ;;  %v7685_v27 = vrot.slane %v4716_v55, 3  ;;  %vm7692_vm12 = vcmp.lt.s32.totalorder %v8863_v14, 16 }
 0x1eb   : > { %8851 = vst [vmem:[#allocation92_spill] sm:$0xff] %v7625_v50  ;;  %v3374_v50 = vrot.slane %v4715_v60, 3  ;;  %vm8866_vm2 = vcmask 1044480   ;;  %vm7711_vm13 = vmand %vm3987_vm9, %vm3951_vm14  ;;  %v8868_v32 = vmov 0  ;;  %v7716_v61 = vadd.s32 18, %v7623_v16 }
 0x1ec   : > { %v7705_v55 = vsel %vm8866_vm2, %v3366_v49, %v3368_v44  ;;  %v8869_v32 = vsel %vm7711_vm13, 4294967295, %v8868_v32  ;;  %vm7723_vm15 = vcmp.lt.s32.totalorder %v8870_v63, 16  ;;  %v7729_v60 = vsel %vm8866_vm2, %v7472_v53, %v3364_v23  ;;  %vm7735_vm14 = vmand %vm3985_vm10, %vm3949_vm4  ;;  %v3231_v63 = vld [vmem:[%s6684_s14 + $0x98] sm:$0xf]  ;;  %v7746_v53 = vld [vmem:[%s8536_s2] ss:$0 sm:$0xff] }
 0x1ed   : > { %8867 = vst [vmem:[#allocation94_spill] sm:$0xff] %v7705_v55  ;;  %8873 = vst [vmem:[#allocation95_spill] sm:$0xff] %v7729_v60  ;;  %v8875_v17 = vsel %vm7735_vm14, 4294967295, %v8874_v17  ;;  %v3851_v5 = vmul.u32 18, %v3850_v38  ;;  %v3372_v4 = vrot.slane %v4712_v3, 3  ;;  %v8878_v60 = vsel %vm6802_vm1, %v6791_v0, %v6730_v51 }
 0x1ee   : > { %vm8876_vm9 = vmmov %vm8866_vm2  ;;  %vm7753_vm0 = vcmp.lt.s32.totalorder %v8878_v60, 16  ;;  %vm3952_vm10 = vcmp.ne.s32.totalorder %v7668_v31, 0  ;;  %v8883_v51 = vsel %vm6821_vm3, %v6807_v58, %v6748_v8  ;;  %v7793_v60 = vadd.s32 18, %v7668_v31 }
 0x1ef   : > { %v7740_v42 = vsel %vm8876_vm9, %v3364_v23, %v3366_v49  ;;  %vm8881_vm4 = vmmov %vm8866_vm2  ;;  %vm3988_vm2 = vcmp.lt.s32.totalorder %v7668_v31, 0  ;;  %vm7772_vm1 = vcmp.lt.s32.totalorder %v8883_v51, 16 }
 0x1f0   : > { %8877 = vst [vmem:[#allocation96_spill] sm:$0xff] %v7740_v42  ;;  %v7762_v23 = vsel %vm8881_vm4, %v3368_v44, %v3370_v20  ;;  %vm8886_vm9 = vmmov %vm8881_vm4 }
 0x1f1   : > { %v5241_v55 = vpop.f32.mrb[0].mxu0  ;;  %8882 = vst [vmem:[#allocation97_spill] sm:$0xff] %v7762_v23  ;;  %v7782_v38 = vsel %vm8886_vm9, %v3374_v50, %v7685_v27  ;;  %vm7801_vm3 = vmand %vm3988_vm2, %vm3952_vm10  ;;  %vm8895_vm2 = vnez %v8704_v25  ;;  %v8906_v25 = vld [vmem:[#allocation13_spill] sm:$0xff] }
 0x1f2   : > { %v5279_v56 = vadd.f32 %v5241_v55, %v7245_v30  ;;  %v2973_v3 = vpop.f32.mrb[1].mxu0  ;;  %8887 = vst [vmem:[#allocation98_spill] sm:$0xff] %v7782_v38  ;;  %v7785_v30 = vadd.s32 256, %v6664_v43  ;;  %v3268_v55 = vunpack.c.l.bf16 %v3231_v63  ;;  %vm8890_vm9 = vmmov %vm8881_vm4 }
 0x1f3   : > { %v5280_v21 = vadd.f32 %v2973_v3, %v7254_v57  ;;  %v5242_v8 = vpop.f32.mrb[2].mxu0  ;;  %v8888_v57 = vmov 0  ;;  %v7806_v3 = vsub.s32 %v7540_v10, %v3851_v5  ;;  %v7809_v58 = vsel %vm8890_vm9, %v3370_v20, %v3372_v4 }
 0x1f4   : > { %v3161_v51 = vadd.f32 %v5279_v56, %v7746_v53  ;;  %v5281_v44 = vadd.f32 %v5242_v8, %v7261_v22  ;;  %v2976_v49 = vpop.f32.mrb[3].mxu0  ;;  %v8889_v57 = vsel %vm7801_vm3, 4294967295, %v8888_v57  ;;  %8891 = vst [vmem:[#allocation99_spill] sm:$0xff] %v7809_v58  ;;  %v3905_v22 = vshrl.u32 %v7672_v45, 4 }
 0x1f5   : > { %v3159_v63 = vadd.f32 %v5280_v21, %v7746_v53  ;;  %v5282_v56 = vadd.f32 %v2976_v49, %v7271_v34  ;;  %v7815_v8 = vadd.s32 280, %v6664_v43  ;;  %v8892_v34 = vsel %vm6917_vm11, %v6883_v40, %v6846_v2  ;;  %vm8901_vm11 = vmmov %vm8881_vm4 }
 0x1f6   : > { %v3418_v38 = vadd.f32 %v6725_v19, %v3161_v51  ;;  %v3162_v42 = vadd.f32 %v5281_v44, %v7746_v53  ;;  %v7820_v23 = vmul.u32.u64.low 3817748708, %v7785_v30  ;;  %v7821_v10 = vmul.u32.u64.high 3817748708, %v7785_v30, %v7820_v23  ;;  %v8896_v44 = vld [vmem:[#allocation16_spill] sm:$0xff]  ;;  %v8914_v19 = vld [vmem:[#allocation5_spill] sm:$0xff] }
 0x1f7   : > { %v3416_v20 = vadd.f32 %v6746_v28, %v3159_v63  ;;  %v3160_v5 = vadd.f32 %v5282_v56, %v7746_v53  ;;  %vm7830_vm10 = vcmp.lt.s32.totalorder %v8892_v34, 16  ;;  %v3378_v49 = vrot.slane %v3268_v55, 3  ;;  %v8903_v55 = vld [vmem:[#allocation4_spill] sm:$0xff] }
 0x1f8   : > { %v3454_v23 = vmax.f32 %v3418_v38, 0.0  ;;  %v3419_v28 = vadd.f32 %v6815_v62, %v3162_v42  ;;  %v8898_v21 = vsel %vm8895_vm2, %v8896_v44, %v8897_v12  ;;  %v7849_v40 = vadd.s32 18, %v7806_v3  ;;  %v8904_v62 = vld [vmem:[#allocation17_spill] sm:$0xff]  ;;  %v8966_v44 = vld [vmem:[#allocation14_spill] sm:$0xff] }
 0x1f9   : > { %vm7844_vm9 = vcmp.lt.s32.totalorder %v8898_v21, 16  ;;  %v7852_v51 = vsel %vm8901_vm11, %v3372_v4, %v3374_v50  ;;  %v3452_v63 = vmax.f32 %v3416_v20, 0.0  ;;  %v3417_v38 = vadd.f32 %v8903_v55, %v3160_v5  ;;  %v5245_v56 = vpop.f32.mrb[4].mxu0  ;;  %v8907_v42 = vld [vmem:[#allocation9_spill] sm:$0xff] }
 0x1fa   : > { %8902 = vst [vmem:[#allocation16_spill] sm:$0xff] %v7852_v51  ;;  %vm8905_vm4 = vnez %v8904_v62  ;;  %v7865_v12 = vmul.u32.u64.low 3817748708, %v7815_v8  ;;  %v7866_v21 = vmul.u32.u64.high 3817748708, %v7815_v8, %v7865_v12  ;;  %v4139_v50 = vsel %vm7692_vm12, %v3454_v23, 0.0  ;;  %v8911_v20 = vld [vmem:[#allocation57_spill] sm:$0xff]  ;;  %v2989_v55 = vpop.f32.mrb[5].mxu0 }
 0x1fb   : > { %v8908_v34 = vsel %vm8905_vm4, %v8906_v25, %v8907_v42  ;;  %v3455_v4 = vmax.f32 %v3419_v28, 0.0  ;;  %v5283_v5 = vadd.f32 %v5245_v56, %v8911_v20  ;;  %v8912_v62 = vld [vmem:[#allocation18_spill] sm:$0xff]  ;;  %v8915_v25 = vld [vmem:[#allocation12_spill] sm:$0xff]  ;;  %v3906_v51 = vmul.u32 18, %v3905_v22  ;;  %v5246_v56 = vpop.f32.mrb[6].mxu0 }
 0x1fc   : > { %vm7860_vm2 = vcmp.lt.s32.totalorder %v8908_v34, 16  ;;  %vm8913_vm11 = vnez %v8912_v62  ;;  %v4213_v58 = vrot.slane %v4139_v50, 5  ;;  %v4137_v12 = vsel %vm7723_vm15, %v3452_v63, 0.0  ;;  %v8919_v23 = vld [vmem:[#allocation60_spill] sm:$0xff]  ;;  %v2992_v31 = vpop.f32.mrb[7].mxu0 }
 0x1fd   : > { %v8916_v42 = vsel %vm8913_vm11, %v8914_v19, %v8915_v25  ;;  %v3453_v24 = vmax.f32 %v3417_v38, 0.0  ;;  %v5284_v28 = vadd.f32 %v2989_v55, %v8919_v23  ;;  %v4210_v20 = vrot.slane %v4137_v12, 5  ;;  %v8920_v25 = vld [vmem:[#allocation64_spill] sm:$0xff]  ;;  %v8921_v38 = vld [vmem:[#allocation67_spill] sm:$0xff] }
 0x1fe   : > { %vm7877_vm4 = vcmp.lt.s32.totalorder %v8916_v42, 16  ;;  %v4140_v62 = vsel %vm7753_vm0, %v3455_v4, 0.0  ;;  %v3165_v19 = vadd.f32 %v5283_v5, %v7746_v53  ;;  %v5285_v42 = vadd.f32 %v5246_v56, %v8920_v25  ;;  %v8926_v56 = vld [vmem:[#allocation2_spill] sm:$0xff] }
 0x1ff   : > { %v4215_v22 = vrot.slane %v4140_v62, 5  ;;  %v4138_v14 = vsel %vm7772_vm1, %v3453_v24, 0.0  ;;  %v3163_v63 = vadd.f32 %v5284_v28, %v7746_v53  ;;  %v5286_v50 = vadd.f32 %v2992_v31, %v8921_v38  ;;  %v8927_v28 = vld [vmem:[#allocation20_spill] sm:$0xff]  ;;  %v8929_v31 = vld [vmem:[#allocation19_spill] sm:$0xff]  ;;  %v8930_v62 = vld [vmem:[#allocation10_spill] sm:$0xff] }
 0x200   : > { %vm8922_vm12 = vcmask 1042432   ;;  %v4211_v12 = vrot.slane %v4138_v14, 5  ;;  %v3422_v4 = vadd.f32 %v8923_v46, %v3165_v19  ;;  %v3166_v5 = vadd.f32 %v5285_v42, %v7746_v53  ;;  %v8937_v46 = vld [vmem:[#allocation23_spill] sm:$0xff] }
 0x201   : > { %v4318_v55 = vsel %vm8922_vm12, 0.0, %v4210_v20  ;;  %vm8924_vm15 = vcmask 261120   ;;  %vm8925_vm0 = vmmov %vm8922_vm12  ;;  %v3420_v0 = vadd.f32 %v8926_v56, %v3163_v63  ;;  %v3164_v24 = vadd.f32 %v5286_v50, %v7746_v53  ;;  %v8936_v50 = vld [vmem:[#allocation11_spill] sm:$0xff]  ;;  %v8939_v56 = vld [vmem:[#allocation21_spill] sm:$0xff] }
 0x202   : > { %4322 = vst.msk [vmem:[%s7578_s18 + $0x10] sm:$0xff] %vm8924_vm15, %v4318_v55  ;;  %v4216_v23 = vsel %vm8925_vm0, %v4213_v58, %v4215_v22  ;;  %vm8928_vm1 = vnez %v8927_v28  ;;  %vm8934_vm12 = vcmask 1044480   ;;  %v4212_v42 = vsel %vm8925_vm0, %v4210_v20, %v4211_v12  ;;  %vm8935_vm3 = vmmov %vm8925_vm0  ;;  %v8940_v28 = vld [vmem:[#allocation15_spill] sm:$0xff] }
 0x203   : > { %v8931_v25 = vsel %vm8928_vm1, %v8929_v31, %v8930_v62  ;;  %v7911_v19 = vsel %vm8934_vm12, %v7685_v27, %v3378_v49  ;;  %4325 = vst.msk [vmem:[%s7578_s18 + $0x28] sm:$0xff] %vm8924_vm15, %v4216_v23  ;;  %v4214_v63 = vsel %vm8935_vm3, %v4211_v12, %v4213_v58  ;;  %v3458_v38 = vmax.f32 %v3422_v4, 0.0  ;;  %vm8944_vm12 = vmmov %vm8924_vm15  ;;  %v8946_v49 = vld [vmem:[#allocation7_spill] sm:$0xff]  ;;  %v5249_v58 = vpop.f32.mrb[8].mxu0  ;;  %v8947_v12 = vld [vmem:[#allocation38_spill] sm:$0xff] }
 0x204   : > { %vm7905_vm11 = vcmp.lt.s32.totalorder %v8931_v25, 16  ;;  %v3423_v55 = vadd.f32 %v8936_v50, %v3166_v5  ;;  %vm8938_vm14 = vnez %v8937_v46  ;;  %4323 = vst.msk [vmem:[%s7578_s18 + $0x18] sm:$0xff] %vm8944_vm12, %v4212_v42  ;;  %vm8945_vm13 = vmmov %vm8944_vm12  ;;  %v3456_v27 = vmax.f32 %v3420_v0, 0.0  ;;  %v8949_v4 = vld [vmem:[#allocation33_spill] sm:$0xff]  ;;  %v8954_v50 = vld [vmem:[#allocation70_spill] sm:$0xff] }
 0x205   : > { %v8941_v31 = vsel %vm8938_vm14, %v8939_v56, %v8940_v28  ;;  %4324 = vst.msk [vmem:[%s7578_s18 + $0x20] sm:$0xff] %vm8945_vm13, %v4214_v63  ;;  %v3421_v20 = vadd.f32 %v8946_v49, %v3164_v24  ;;  %vm8948_vm3 = vnez %v8947_v12  ;;  %v8950_v5 = vld [vmem:[#allocation25_spill] sm:$0xff]  ;;  %v3883_v42 = vshrl.u32 %v7821_v10, 4  ;;  %v3005_v56 = vpop.f32.mrb[9].mxu0  ;;  %v8955_v28 = vld [vmem:[#allocation40_spill] sm:$0xff]  ;;  %v8958_v49 = vld [vmem:[#allocation26_spill] sm:$0xff] }
 0x206   : > { %vm7923_vm1 = vcmp.lt.s32.totalorder %v8941_v31, 16  ;;  %v8951_v23 = vsel %vm8948_vm3, %v8949_v4, %v8950_v5  ;;  %v7945_v0 = vadd.s32 264, %v6664_v43  ;;  %v4143_v24 = vsel %vm7830_vm10, %v3458_v38, 0.0  ;;  %v8957_v31 = vld [vmem:[#allocation35_spill] sm:$0xff]  ;;  %v5250_v5 = vpop.f32.mrb[10].mxu0  ;;  %vm8965_vm10 = vmmov %vm8925_vm0 }
 0x207   : > { %vm7937_vm15 = vcmp.lt.s32.totalorder %v8951_v23, 16  ;;  %v3459_v63 = vmax.f32 %v3423_v55, 0.0  ;;  %v5287_v46 = vadd.f32 %v5249_v58, %v8954_v50  ;;  %vm8956_vm13 = vnez %v8955_v28  ;;  %v8962_v55 = vld [vmem:[#allocation73_spill] sm:$0xff] }
 0x208   : > { %v8959_v12 = vsel %vm8956_vm13, %v8957_v31, %v8958_v49  ;;  %v7960_v10 = vsub.s32 %v7632_v35, %v3906_v51  ;;  %v4221_v43 = vrot.slane %v4143_v24, 5  ;;  %v4141_v45 = vsel %vm7844_vm9, %v3456_v27, 0.0  ;;  %v8963_v31 = vld [vmem:[#allocation74_spill] sm:$0xff]  ;;  %v3008_v35 = vpop.f32.mrb[11].mxu0 }
 0x209   : > { %vm7955_vm12 = vcmp.lt.s32.totalorder %v8959_v12, 16  ;;  %v3457_v38 = vmax.f32 %v3421_v20, 0.0  ;;  %v5288_v58 = vadd.f32 %v3005_v56, %v8962_v55  ;;  %v4217_v23 = vrot.slane %v4141_v45, 5  ;;  %v8964_v20 = vld [vmem:[#allocation76_spill] sm:$0xff]  ;;  %v8969_v55 = vld [vmem:[#allocation6_spill] sm:$0xff] }
 0x20a   : > { %v4144_v50 = vsel %vm7860_vm2, %v3459_v63, 0.0  ;;  %v3169_v28 = vadd.f32 %v5287_v46, %v7746_v53  ;;  %v5289_v49 = vadd.f32 %v5250_v5, %v8963_v31  ;;  %v5290_v24 = vadd.f32 %v3008_v35, %v8964_v20  ;;  %vm8968_vm2 = vmmov %vm8925_vm0  ;;  %v8972_v5 = vld [vmem:[#allocation36_spill] sm:$0xff] }
 0x20b   : > { %v4223_v51 = vrot.slane %v4144_v50, 5  ;;  %v4142_v2 = vsel %vm7877_vm4, %v3457_v38, 0.0  ;;  %v3167_v27 = vadd.f32 %v5288_v58, %v7746_v53  ;;  %v4218_v56 = vsel %vm8965_vm10, %v4215_v22, %v4217_v23  ;;  %v8970_v58 = vld [vmem:[#allocation41_spill] sm:$0xff]  ;;  %v8973_v50 = vld [vmem:[#allocation28_spill] sm:$0xff]  ;;  %vm8978_vm10 = vmmov %vm8925_vm0 }
 0x20c   : > { %v4219_v12 = vrot.slane %v4142_v2, 5  ;;  %v3426_v63 = vadd.f32 %v8966_v44, %v3169_v28  ;;  %v3170_v46 = vadd.f32 %v5289_v49, %v7746_v53  ;;  %vm8967_vm9 = vcmask 261120   ;;  %v8984_v44 = vld [vmem:[#allocation31_spill] sm:$0xff] }
 0x20d   : > { %4326 = vst.msk [vmem:[%s7578_s18 + $0x30] sm:$0xff] %vm8967_vm9, %v4218_v56  ;;  %v4224_v45 = vsel %vm8968_vm2, %v4221_v43, %v4223_v51  ;;  %v3424_v34 = vadd.f32 %v8969_v55, %v3167_v27  ;;  %v3168_v38 = vadd.f32 %v5290_v24, %v7746_v53  ;;  %vm8971_vm4 = vnez %v8970_v58  ;;  %vm8977_vm13 = vmmov %vm8967_vm9  ;;  %v8980_v27 = vld [vmem:[#allocation24_spill] sm:$0xff]  ;;  %v8981_v24 = vld [vmem:[#allocation42_spill] sm:$0xff] }
 0x20e   : > { %v8974_v22 = vsel %vm8971_vm4, %v8972_v5, %v8973_v50  ;;  %v7990_v28 = vmul.u32 18, %v3883_v42  ;;  %4329 = vst.msk [vmem:[%s7578_s18 + $0x48] sm:$0xff] %vm8977_vm13, %v4224_v45  ;;  %v4220_v49 = vsel %vm8978_vm10, %v4217_v23, %v4219_v12  ;;  %vm8979_vm9 = vmmov %vm8925_vm0  ;;  %v3462_v2 = vmax.f32 %v3426_v63, 0.0  ;;  %v8983_v56 = vld [vmem:[#allocation39_spill] sm:$0xff]  ;;  %v8990_v23 = vld [vmem:[#allocation22_spill] sm:$0xff] }
 0x20f   : > { %vm7986_vm3 = vcmp.lt.s32.totalorder %v8974_v22, 16  ;;  %v4222_v35 = vsel %vm8979_vm9, %v4219_v12, %v4221_v43  ;;  %v3427_v20 = vadd.f32 %v8980_v27, %v3170_v46  ;;  %vm8982_vm2 = vnez %v8981_v24  ;;  %vm8988_vm0 = vmmov %vm8977_vm13  ;;  %v5253_v43 = vpop.f32.mrb[12].mxu0  ;;  %v8991_v12 = vld [vmem:[#allocation44_spill] sm:$0xff]  ;;  %v8993_v63 = vld [vmem:[#allocation43_spill] sm:$0xff] }
 0x210   : > { %v8985_v55 = vsel %vm8982_vm2, %v8983_v56, %v8984_v44  ;;  %4327 = vst.msk [vmem:[%s7578_s18 + $0x38] sm:$0xff] %vm8988_vm0, %v4220_v49  ;;  %vm8989_vm14 = vmmov %vm8988_vm0  ;;  %v3460_v42 = vmax.f32 %v3424_v34, 0.0  ;;  %v3425_v45 = vadd.f32 %v8990_v23, %v3168_v38  ;;  %vm8992_vm13 = vnez %v8991_v12  ;;  %v8994_v46 = vld [vmem:[#allocation34_spill] sm:$0xff]  ;;  %v3021_v24 = vpop.f32.mrb[13].mxu0  ;;  %v8999_v56 = vld [vmem:[#allocation47_spill] sm:$0xff] }
 0x211   : > { %vm8002_vm4 = vcmp.lt.s32.totalorder %v8985_v55, 16  ;;  %4328 = vst.msk [vmem:[%s7578_s18 + $0x40] sm:$0xff] %vm8989_vm14, %v4222_v35  ;;  %v8995_v5 = vsel %vm8992_vm13, %v8993_v63, %v8994_v46  ;;  %v8021_v22 = vmul.u32.u64.low 3817748708, %v7945_v0  ;;  %v8022_v27 = vmul.u32.u64.high 3817748708, %v7945_v0, %v8021_v22  ;;  %v8998_v38 = vld [vmem:[#allocation82_spill] sm:$0xff]  ;;  %v9001_v44 = vld [vmem:[#allocation45_spill] sm:$0xff] }
 0x212   : > { %vm8016_vm10 = vcmp.lt.s32.totalorder %v8995_v5, 16  ;;  %v4147_v34 = vsel %vm7905_vm11, %v3462_v2, 0.0  ;;  %v3463_v49 = vmax.f32 %v3427_v20, 0.0  ;;  %v5291_v35 = vadd.f32 %v5253_v43, %v8998_v38  ;;  %v9002_v55 = vld [vmem:[#allocation37_spill] sm:$0xff]  ;;  %v5254_v43 = vpop.f32.mrb[14].mxu0  ;;  %v9052_v12 = vld [vmem:[#allocation51_spill] sm:$0xff] }
 0x213   : > { %vm9000_vm14 = vnez %v8999_v56  ;;  %v3916_v63 = vshrl.u32 %v7866_v21, 4  ;;  %v4229_v46 = vrot.slane %v4147_v34, 5  ;;  %v4145_v14 = vsel %vm7923_vm1, %v3460_v42, 0.0  ;;  %v9011_v34 = vld [vmem:[#allocation27_spill] sm:$0xff] }
 0x214   : > { %v9003_v23 = vsel %vm9000_vm14, %v9001_v44, %v9002_v55  ;;  %v3461_v2 = vmax.f32 %v3425_v45, 0.0  ;;  %v5292_v20 = vadd.f32 %v3021_v24, %v7511_v7  ;;  %v4225_v5 = vrot.slane %v4145_v14, 5  ;;  %v3024_v44 = vpop.f32.mrb[15].mxu0  ;;  %v8060_v24 = vpop.f32.mrb[20].mxu1  ;;  %v9014_v55 = vld [vmem:[#allocation29_spill] sm:$0xff] }
 0x215   : > { %vm8033_vm0 = vcmp.lt.s32.totalorder %v9003_v23, 16  ;;  %v4148_v22 = vsel %vm7937_vm15, %v3463_v49, 0.0  ;;  %v3173_v38 = vadd.f32 %v5291_v35, %v7746_v53  ;;  %v5293_v56 = vadd.f32 %v5254_v43, %v7529_v11 }
 0x216   : > { %vm9006_vm11 = vcmp.ne.s32.totalorder %v7806_v3, 0  ;;  %vm9007_vm9 = vcmp.lt.s32.totalorder %v7806_v3, 0  ;;  %v4231_v7 = vrot.slane %v4148_v22, 5  ;;  %v4146_v62 = vsel %vm7955_vm12, %v3461_v2, 0.0  ;;  %v9018_v2 = vld [vmem:[#allocation48_spill] sm:$0xff]  ;;  %v8076_v22 = vpop.f32.mrb[21].mxu1 }
 0x217   : > { %vm8049_vm2 = vmand %vm9007_vm9, %vm9006_vm11  ;;  %v3171_v25 = vadd.f32 %v5292_v20, %v7746_v53  ;;  %v5294_v42 = vadd.f32 %v3024_v44, %v7542_v29  ;;  %vm9010_vm1 = vcmask 1042432   ;;  %v4227_v45 = vrot.slane %v4146_v62, 5  ;;  %v9015_v29 = vld [vmem:[#allocation53_spill] sm:$0xff] }
 0x218   : > { %v4226_v11 = vsel %vm9010_vm1, %v4223_v51, %v4225_v5  ;;  %v3430_v49 = vadd.f32 %v9011_v34, %v3173_v38  ;;  %v3174_v35 = vadd.f32 %v5293_v56, %v7746_v53  ;;  %vm9012_vm15 = vcmask 261120   ;;  %vm9013_vm13 = vmmov %vm9010_vm1  ;;  %v9017_v51 = vld [vmem:[#allocation52_spill] sm:$0xff]  ;;  %v9027_v34 = vld [vmem:[#allocation54_spill] sm:$0xff] }
 0x219   : > { %4330 = vst.msk [vmem:[%s7578_s18 + $0x50] sm:$0xff] %vm9012_vm15, %v4226_v11  ;;  %v4232_v4 = vsel %vm9013_vm13, %v4229_v46, %v4231_v7  ;;  %v3428_v23 = vadd.f32 %v9014_v55, %v3171_v25  ;;  %v3172_v14 = vadd.f32 %v5294_v42, %v7746_v53  ;;  %vm9016_vm12 = vnez %v9015_v29  ;;  %vm9022_vm11 = vmmov %vm9012_vm15  ;;  %v9024_v25 = vld [vmem:[#allocation32_spill] sm:$0xff]  ;;  %v9025_v11 = vld [vmem:[#allocation55_spill] sm:$0xff] }
 0x21a   : > { %v9019_v20 = vsel %vm9016_vm12, %v9017_v51, %v9018_v2  ;;  %4333 = vst.msk [vmem:[%s7578_s18 + $0x68] sm:$0xff] %vm9022_vm11, %v4232_v4  ;;  %vm9023_vm9 = vmmov %vm9010_vm1  ;;  %v4230_v44 = vsel %vm9010_vm1, %v4227_v45, %v4229_v46  ;;  %v3466_v62 = vmax.f32 %v3430_v49, 0.0  ;;  %v3431_v42 = vadd.f32 %v9024_v25, %v3174_v35  ;;  %v9028_v55 = vld [vmem:[#allocation49_spill] sm:$0xff]  ;;  %v8096_v2 = vpop.f32.mrb[22].mxu1  ;;  %v9033_v46 = vld [vmem:[#allocation30_spill] sm:$0xff]  ;;  %v5257_v49 = vpop.f32.mrb[16].mxu0 }
 0x21b   : > { %vm8072_vm14 = vcmp.lt.s32.totalorder %v9019_v20, 16  ;;  %v4228_v56 = vsel %vm9023_vm9, %v4225_v5, %v4227_v45  ;;  %vm9026_vm15 = vnez %v9025_v11  ;;  %vm9032_vm12 = vmmov %vm9022_vm11  ;;  %4332 = vst.msk [vmem:[%s7578_s18 + $0x60] sm:$0xff] %vm9022_vm11, %v4230_v44  ;;  %v3464_v5 = vmax.f32 %v3428_v23, 0.0  ;;  %v9034_v35 = vld [vmem:[#allocation61_spill] sm:$0xff]  ;;  %v9036_v4 = vld [vmem:[#allocation59_spill] sm:$0xff] }
 0x21c   : > { %v9029_v29 = vsel %vm9026_vm15, %v9027_v34, %v9028_v55  ;;  %4331 = vst.msk [vmem:[%s7578_s18 + $0x58] sm:$0xff] %vm9032_vm12, %v4228_v56  ;;  %v3429_v45 = vadd.f32 %v9033_v46, %v3172_v14  ;;  %vm9035_vm9 = vnez %v9034_v35  ;;  %v9037_v20 = vld [vmem:[#allocation50_spill] sm:$0xff]  ;;  %v8112_v34 = vpop.f32.mrb[23].mxu1  ;;  %v8117_v23 = vadd.s32 18, %v7960_v10  ;;  %v9042_v46 = vld [vmem:[#allocation69_spill] sm:$0xff] }
 0x21d   : > { %vm8092_vm13 = vcmp.lt.s32.totalorder %v9029_v29, 16  ;;  %v9038_v25 = vsel %vm9035_vm9, %v9036_v4, %v9037_v20  ;;  %v8121_v14 = vsub.s32 %v7785_v30, %v7990_v28  ;;  %v4151_v56 = vsel %vm7986_vm3, %v3466_v62, 0.0  ;;  %v3037_v29 = vpop.f32.mrb[17].mxu0  ;;  %v9043_v35 = vld [vmem:[#allocation65_spill] sm:$0xff] }
 0x21e   : > { %vm8108_vm1 = vcmp.lt.s32.totalorder %v9038_v25, 16  ;;  %v3467_v44 = vmax.f32 %v3431_v42, 0.0  ;;  %v5295_v55 = vadd.f32 %v5257_v49, %v7597_v41  ;;  %vm9041_vm11 = vnez %v8812_v13  ;;  %v5258_v41 = vpop.f32.mrb[18].mxu0 }
 0x21f   : > { %v9044_v4 = vsel %vm9041_vm11, %v9042_v46, %v9043_v35  ;;  %v8135_v25 = vmul.u32 18, %v3916_v63  ;;  %v4237_v30 = vrot.slane %v4151_v56, 5  ;;  %v4149_v31 = vsel %vm8002_vm4, %v3464_v5, 0.0  ;;  %v3040_v35 = vpop.f32.mrb[19].mxu0  ;;  %vm9050_vm4 = vmmov %vm9032_vm12 }
 0x220   : > { %vm8131_vm9 = vcmp.lt.s32.totalorder %v9044_v4, 16  ;;  %v3465_v28 = vmax.f32 %v3429_v45, 0.0  ;;  %v5296_v62 = vadd.f32 %v3037_v29, %v7606_v47  ;;  %v4233_v42 = vrot.slane %v4149_v31, 5  ;;  %v9047_v45 = vld [vmem:[#allocation92_spill] sm:$0xff]  ;;  %v9049_v4 = vld [vmem:[#allocation46_spill] sm:$0xff] }
 0x221   : > { %v4152_v13 = vsel %vm8016_vm10, %v3467_v44, 0.0  ;;  %v3177_v49 = vadd.f32 %v5295_v55, %v7746_v53  ;;  %v5297_v46 = vadd.f32 %v5258_v41, %v7616_v52  ;;  %v5298_v47 = vadd.f32 %v3040_v35, %v9047_v45  ;;  %v8151_v55 = vpop.f32.mrb[24].mxu1  ;;  %v9056_v41 = vld [vmem:[#allocation68_spill] sm:$0xff]  ;;  %v9062_v45 = vld [vmem:[#allocation58_spill] sm:$0xff] }
 0x222   : > { %v4239_v63 = vrot.slane %v4152_v13, 5  ;;  %v4150_v58 = vsel %vm8033_vm0, %v3465_v28, 0.0  ;;  %v3175_v5 = vadd.f32 %v5296_v62, %v7746_v53  ;;  %vm9048_vm3 = vcmask 1042432   ;;  %v9053_v62 = vld [vmem:[#allocation78_spill] sm:$0xff] }
 0x223   : > { %v4234_v56 = vsel %vm9048_vm3, %v4231_v7, %v4233_v42  ;;  %v4235_v29 = vrot.slane %v4150_v58, 5  ;;  %v3434_v50 = vadd.f32 %v9049_v4, %v3177_v49  ;;  %v3178_v44 = vadd.f32 %v5297_v46, %v7746_v53  ;;  %vm9051_vm10 = vmmov %vm9048_vm3  ;;  %v9055_v7 = vld [vmem:[#allocation77_spill] sm:$0xff]  ;;  %v8167_v46 = vpop.f32.mrb[25].mxu1  ;;  %v9065_v4 = vld [vmem:[#allocation79_spill] sm:$0xff] }
 0x224   : > { %4334 = vst.msk [vmem:[%s7578_s18 + $0x70] sm:$0xff] %vm9050_vm4, %v4234_v56  ;;  %v4240_v52 = vsel %vm9051_vm10, %v4237_v30, %v4239_v63  ;;  %v3432_v31 = vadd.f32 %v9052_v12, %v3175_v5  ;;  %v3176_v28 = vadd.f32 %v5298_v47, %v7746_v53  ;;  %vm9054_vm0 = vnez %v9053_v62  ;;  %vm9060_vm10 = vmmov %vm9048_vm3  ;;  %v9063_v56 = vld [vmem:[#allocation80_spill] sm:$0xff]  ;;  %v9066_v12 = vld [vmem:[#allocation71_spill] sm:$0xff] }
 0x225   : > { %v9057_v13 = vsel %vm9054_vm0, %v9055_v7, %v9056_v41  ;;  %4337 = vst.msk [vmem:[%s7578_s18 + $0x88] sm:$0xff] %vm9050_vm4, %v4240_v52  ;;  %v4236_v35 = vsel %vm9060_vm10, %v4233_v42, %v4235_v29  ;;  %vm9061_vm12 = vmmov %vm9048_vm3  ;;  %v3470_v5 = vmax.f32 %v3434_v50, 0.0  ;;  %v3435_v47 = vadd.f32 %v9062_v45, %v3178_v44  ;;  %v8184_v41 = vpop.f32.mrb[26].mxu1  ;;  %v5261_v50 = vpop.f32.mrb[20].mxu0  ;;  %v9073_v44 = vld [vmem:[#allocation83_spill] sm:$0xff]  ;;  %v9075_v52 = vld [vmem:[#allocation81_spill] sm:$0xff] }
 0x226   : > { %vm8163_vm11 = vcmp.lt.s32.totalorder %v9057_v13, 16  ;;  %v4238_v58 = vsel %vm9061_vm12, %v4235_v29, %v4237_v30  ;;  %vm9064_vm15 = vnez %v9063_v56  ;;  %vm9070_vm3 = vmmov %vm9050_vm4  ;;  %v3468_v42 = vmax.f32 %v3432_v31, 0.0  ;;  %v9072_v30 = vld [vmem:[#allocation56_spill] sm:$0xff] }
 0x227   : > { %v9067_v62 = vsel %vm9064_vm15, %v9065_v4, %v9066_v12  ;;  %4335 = vst.msk [vmem:[%s7578_s18 + $0x78] sm:$0xff] %vm9070_vm3, %v4236_v35  ;;  %vm9071_vm4 = vmmov %vm9070_vm3  ;;  %v3433_v29 = vadd.f32 %v9072_v30, %v3176_v28  ;;  %vm9074_vm12 = vnez %v9073_v44  ;;  %v9076_v13 = vld [vmem:[#allocation72_spill] sm:$0xff]  ;;  %v8200_v4 = vpop.f32.mrb[27].mxu1  ;;  %vm3989_vm10 = vcmp.lt.s32.totalorder %v8121_v14, 0  ;;  %v3053_v12 = vpop.f32.mrb[21].mxu0  ;;  %v9082_v30 = vld [vmem:[#allocation85_spill] sm:$0xff] }
 0x228   : > { %vm8180_vm0 = vcmp.lt.s32.totalorder %v9067_v62, 16  ;;  %4336 = vst.msk [vmem:[%s7578_s18 + $0x80] sm:$0xff] %vm9071_vm4, %v4238_v58  ;;  %v9077_v45 = vsel %vm9074_vm12, %v9075_v52, %v9076_v13  ;;  %v8204_v35 = vadd.s32 18, %v8121_v14  ;;  %v4155_v31 = vsel %vm8072_vm14, %v3470_v5, 0.0  ;;  %v9080_v62 = vld [vmem:[#allocation86_spill] sm:$0xff]  ;;  %v9083_v44 = vld [vmem:[#allocation75_spill] sm:$0xff] }
 0x229   : > { %vm8196_vm15 = vcmp.lt.s32.totalorder %v9077_v45, 16  ;;  %v3471_v28 = vmax.f32 %v3435_v47, 0.0  ;;  %v5299_v58 = vadd.f32 %v5261_v50, %v8060_v24  ;;  %vm9081_vm3 = vnez %v9080_v62  ;;  %v5262_v24 = vpop.f32.mrb[22].mxu0  ;;  %v9122_v13 = vld [vmem:[#allocation88_spill] sm:$0xff] }
 0x22a   : > { %v9084_v52 = vsel %vm9081_vm3, %v9082_v30, %v9083_v44  ;;  %v3894_v45 = vshrl.u32 %v8022_v27, 4  ;;  %v4245_v38 = vrot.slane %v4155_v31, 5  ;;  %v4153_v43 = vsel %vm8092_vm13, %v3468_v42, 0.0  ;;  %v9092_v31 = vld [vmem:[#allocation62_spill] sm:$0xff]  ;;  %v9158_v27 = vld [vmem:[#allocation97_spill] sm:$0xff] }
 0x22b   : > { %vm8214_vm4 = vcmp.lt.s32.totalorder %v9084_v52, 16  ;;  %v3469_v5 = vmax.f32 %v3433_v29, 0.0  ;;  %v5300_v47 = vadd.f32 %v3053_v12, %v8076_v22  ;;  %v4241_v50 = vrot.slane %v4153_v43, 5  ;;  %v3056_v52 = vpop.f32.mrb[23].mxu0  ;;  %v8241_v12 = vpop.f32.mrb[28].mxu1 }
 0x22c   : > { %v4156_v62 = vsel %vm8108_vm1, %v3471_v28, 0.0  ;;  %v3181_v30 = vadd.f32 %v5299_v58, %v7746_v53  ;;  %v5301_v44 = vadd.f32 %v5262_v24, %v8096_v2  ;;  %vm9087_vm14 = vcmp.ne.s32.totalorder %v7960_v10, 0 }
 0x22d   : > { %vm9088_vm12 = vcmp.lt.s32.totalorder %v7960_v10, 0  ;;  %v4247_v22 = vrot.slane %v4156_v62, 5  ;;  %v4154_v51 = vsel %vm8131_vm9, %v3469_v5, 0.0  ;;  %v3179_v11 = vadd.f32 %v5300_v47, %v7746_v53  ;;  %v8265_v62 = vpop.f32.mrb[29].mxu1 }
 0x22e   : > { %vm8230_vm3 = vmand %vm9088_vm12, %vm9087_vm14  ;;  %v5302_v42 = vadd.f32 %v3056_v52, %v8112_v34  ;;  %vm9091_vm13 = vcmask 1042432   ;;  %v4243_v29 = vrot.slane %v4154_v51, 5  ;;  %v3438_v28 = vadd.f32 %v9092_v31, %v3181_v30  ;;  %v9105_v51 = vld [vmem:[#allocation66_spill] sm:$0xff] }
 0x22f   : > { %v4242_v2 = vsel %vm9091_vm13, %v4239_v63, %v4241_v50  ;;  %v3182_v58 = vadd.f32 %v5301_v44, %v7746_v53  ;;  %vm9093_vm1 = vcmp.ne.s32.totalorder %v8121_v14, 0  ;;  %vm9096_vm14 = vcmask 261120   ;;  %vm9097_vm12 = vmmov %vm9091_vm13  ;;  %v9098_v63 = vld [vmem:[#allocation63_spill] sm:$0xff] }
 0x230   : > { %vm8247_vm9 = vmand %vm3989_vm10, %vm9093_vm1  ;;  %4338 = vst.msk [vmem:[%s7578_s18 + $0x90] sm:$0xff] %vm9096_vm14, %v4242_v2  ;;  %v4248_v34 = vsel %vm9097_vm12, %v4245_v38, %v4247_v22  ;;  %v3436_v43 = vadd.f32 %v9098_v63, %v3179_v11  ;;  %v3180_v5 = vadd.f32 %v5302_v42, %v7746_v53  ;;  %v9099_v47 = vsel %vm7638_vm8, %v7600_v15, %v7553_v36  ;;  %v8285_v42 = vpop.f32.mrb[30].mxu1 }
 0x231   : > { %vm8261_vm13 = vcmp.lt.s32.totalorder %v9099_v47, 16  ;;  %v4099_v30 = vsel %vm8230_vm3, %v8117_v23, %v7960_v10  ;;  %vm9102_vm10 = vmmov %vm9096_vm14  ;;  %v3474_v52 = vmax.f32 %v3438_v28, 0.0  ;;  %v3439_v36 = vadd.f32 %v9105_v51, %v3182_v58 }
 0x232   : > { %4341 = vst.msk [vmem:[%s7578_s18 + $0xa8] sm:$0xff] %vm9102_vm10, %v4248_v34  ;;  %vm9103_vm1 = vmmov %vm9097_vm12  ;;  %v9106_v15 = vsel %vm7646_vm6, %v7610_v6, %v7564_v33  ;;  %v9112_v31 = vsel %vm7658_vm7, %v7629_v48, %v9111_v39  ;;  %v8301_v6 = vpop.f32.mrb[31].mxu1  ;;  %v4097_v28 = vsel %vm8247_vm9, %v8204_v35, %v8121_v14  ;;  %v8309_v58 = vsub.s32 %v7815_v8, %v8135_v25 }
 0x233   : > { %v4244_v44 = vsel %vm9103_vm1, %v4241_v50, %v4243_v29  ;;  %vm9104_vm14 = vmmov %vm9103_vm1  ;;  %vm8281_vm8 = vcmp.lt.s32.totalorder %v9106_v15, 16  ;;  %v3472_v50 = vmax.f32 %v3436_v43, 0.0  ;;  %vm8297_vm6 = vcmp.lt.s32.totalorder %v9112_v31, 16 }
 0x234   : > { %v4246_v26 = vsel %vm9104_vm14, %v4243_v29, %v4245_v38  ;;  %vm9109_vm12 = vmmov %vm9102_vm10  ;;  %v9110_v38 = vld [vmem:[#allocation84_spill] sm:$0xff]  ;;  %v5265_v29 = vpop.f32.mrb[24].mxu0  ;;  %v4159_v1 = vsel %vm8163_vm11, %v3474_v52, 0.0  ;;  %v3475_v34 = vmax.f32 %v3439_v36, 0.0  ;;  %v9115_v43 = vsel %vm7678_vm5, %v7653_v59, %v7613_v37 }
 0x235   : > { %4339 = vst.msk [vmem:[%s7578_s18 + $0x98] sm:$0xff] %vm9109_vm12, %v4244_v44  ;;  %v3437_v2 = vadd.f32 %v9110_v38, %v3180_v5  ;;  %v5303_v48 = vadd.f32 %v5265_v29, %v8151_v55  ;;  %v3069_v63 = vpop.f32.mrb[25].mxu0  ;;  %vm8319_vm7 = vcmp.lt.s32.totalorder %v9115_v43, 16  ;;  %v3895_v47 = vmul.u32 18, %v3894_v45  ;;  %vm9118_vm5 = vmmov %vm9103_vm1 }
 0x236   : > { %4340 = vst.msk [vmem:[%s7578_s18 + $0xa0] sm:$0xff] %vm9102_vm10, %v4246_v26  ;;  %v4253_v44 = vrot.slane %v4159_v1, 5  ;;  %v4157_v8 = vsel %vm8180_vm0, %v3472_v50, 0.0  ;;  %v5304_v49 = vadd.f32 %v3069_v63, %v8167_v46  ;;  %v5266_v55 = vpop.f32.mrb[26].mxu0  ;;  %v4160_v9 = vsel %vm8196_vm15, %v3475_v34, 0.0  ;;  %v9119_v50 = vld [vmem:[#allocation87_spill] sm:$0xff]  ;;  %vm9120_vm11 = vmmov %vm9102_vm10 }
 0x237   : > { %v3473_v25 = vmax.f32 %v3437_v2, 0.0  ;;  %v4249_v26 = vrot.slane %v4157_v8, 5  ;;  %v3185_v59 = vadd.f32 %v5303_v48, %v7746_v53  ;;  %v5305_v37 = vadd.f32 %v5266_v55, %v8184_v41  ;;  %v3072_v52 = vpop.f32.mrb[27].mxu0  ;;  %v8337_v2 = vpop.f32.mrb[32].mxu1  ;;  %vm9121_vm0 = vmmov %vm9103_vm1  ;;  %v9130_v63 = vld [vmem:[#allocation89_spill] sm:$0xff] }
 0x238   : > { %v4255_v51 = vrot.slane %v4160_v9, 5  ;;  %v3183_v45 = vadd.f32 %v5304_v49, %v7746_v53  ;;  %v5306_v46 = vadd.f32 %v3072_v52, %v8200_v4  ;;  %vm9123_vm15 = vnez %v8869_v32  ;;  %v8353_v31 = vpop.f32.mrb[33].mxu1  ;;  %vm9127_vm14 = vmmov %vm9102_vm10  ;;  %v5269_v49 = vpop.f32.mrb[28].mxu0 }
 0x239   : > { %v4158_v7 = vsel %vm8214_vm4, %v3473_v25, 0.0  ;;  %v4250_v36 = vsel %vm9118_vm5, %v4247_v22, %v4249_v26  ;;  %v3442_v56 = vadd.f32 %v9119_v50, %v3185_v59  ;;  %v3186_v38 = vadd.f32 %v5305_v37, %v7746_v53  ;;  %vm9128_vm12 = vmmov %vm9121_vm0  ;;  %v8370_v43 = vpop.f32.mrb[34].mxu1  ;;  %v3085_v37 = vpop.f32.mrb[29].mxu0 }
 0x23a   : > { %v4251_v15 = vrot.slane %v4158_v7, 5  ;;  %4342 = vst.msk [vmem:[%s7578_s18 + $0xb0] sm:$0xff] %vm9120_vm11, %v4250_v36  ;;  %v4256_v41 = vsel %vm9121_vm0, %v4253_v44, %v4255_v51  ;;  %v3440_v29 = vadd.f32 %v9122_v13, %v3183_v45  ;;  %v3184_v39 = vadd.f32 %v5306_v46, %v7746_v53  ;;  %vm9129_vm10 = vmmov %vm9121_vm0  ;;  %v5270_v36 = vpop.f32.mrb[30].mxu0 }
 0x23b   : > { %v9124_v4 = vsel %vm9123_vm15, %v7683_v18, %v7620_v54  ;;  %vm3956_vm1 = vcmp.ne.s32.totalorder %v8309_v58, 0  ;;  %4345 = vst.msk [vmem:[%s7578_s18 + $0xc8] sm:$0xff] %vm9127_vm14, %v4256_v41  ;;  %v3478_v48 = vmax.f32 %v3442_v56, 0.0  ;;  %v3443_v32 = vadd.f32 %v9130_v63, %v3186_v38  ;;  %vm9135_vm0 = vmmov %vm9127_vm14  ;;  %v3088_v50 = vpop.f32.mrb[31].mxu0  ;;  %v9149_v38 = vld [vmem:[#allocation94_spill] sm:$0xff] }
 0x23c   : > { %vm8349_vm4 = vcmp.lt.s32.totalorder %v9124_v4, 16  ;;  %v4252_v1 = vsel %vm9128_vm12, %v4249_v26, %v4251_v15  ;;  %v4254_v34 = vsel %vm9129_vm10, %v4251_v15, %v4253_v44  ;;  %vm9131_vm5 = vnez %v8875_v17  ;;  %vm9136_vm15 = vmmov %vm9135_vm0  ;;  %v9137_v44 = vld [vmem:[#allocation90_spill] sm:$0xff]  ;;  %v9139_v17 = vld [vmem:[#allocation93_spill] sm:$0xff] }
 0x23d   : > { %v9132_v54 = vsel %vm9131_vm5, %v7716_v61, %v7623_v16  ;;  %4343 = vst.msk [vmem:[%s7578_s18 + $0xb8] sm:$0xff] %vm9135_vm0, %v4252_v1  ;;  %v3476_v8 = vmax.f32 %v3440_v29, 0.0  ;;  %v3441_v25 = vadd.f32 %v9137_v44, %v3184_v39  ;;  %vm9138_vm14 = vnez %v8889_v57  ;;  %v8386_v61 = vpop.f32.mrb[35].mxu1  ;;  %v9152_v39 = vld [vmem:[#allocation95_spill] sm:$0xff] }
 0x23e   : > { %vm8366_vm11 = vcmp.lt.s32.totalorder %v9132_v54, 16  ;;  %4344 = vst.msk [vmem:[%s7578_s18 + $0xc0] sm:$0xff] %vm9136_vm15, %v4254_v34  ;;  %v9140_v55 = vsel %vm9138_vm14, %v7793_v60, %v9139_v17  ;;  %vm3992_vm10 = vcmp.lt.s32.totalorder %v8309_v58, 0  ;;  %v8390_v26 = vadd.s32 18, %v8309_v58 }
 0x23f   : > { %vm8382_vm12 = vcmp.lt.s32.totalorder %v9140_v55, 16  ;;  %v4163_v9 = vsel %vm8261_vm13, %v3478_v48, 0.0  ;;  %v3479_v59 = vmax.f32 %v3443_v32, 0.0  ;;  %v5307_v57 = vadd.f32 %v5269_v49, %v8241_v12  ;;  %v5273_v32 = vpop.f32.mrb[32].mxu0 }
 0x240   : > { %v9143_v60 = vsel %vm8049_vm2, %v7849_v40, %v7806_v3  ;;  %v8405_v7 = vsub.s32 %v7945_v0, %v3895_v47  ;;  %v4261_v45 = vrot.slane %v4163_v9, 5  ;;  %v4161_v24 = vsel %vm8281_vm8, %v3476_v8, 0.0  ;;  %vm8418_vm2 = vmand %vm3992_vm10, %vm3956_vm1 }
 0x241   : > { %vm8400_vm5 = vcmp.lt.s32.totalorder %v9143_v60, 16  ;;  %v3477_v46 = vmax.f32 %v3441_v25, 0.0  ;;  %v5308_v12 = vadd.f32 %v3085_v37, %v8265_v62  ;;  %v4257_v21 = vrot.slane %v4161_v24, 5  ;;  %vm9150_vm8 = vmmov %vm9135_vm0  ;;  %v9167_v60 = vld [vmem:[#allocation98_spill] sm:$0xff] }
 0x242   : > { %v4164_v3 = vsel %vm8297_vm6, %v3479_v59, 0.0  ;;  %v3189_v40 = vadd.f32 %v5307_v57, %v7746_v53  ;;  %v5309_v15 = vadd.f32 %v5270_v36, %v8285_v42  ;;  %v5310_v47 = vadd.f32 %v3088_v50, %v8301_v6  ;;  %vm9155_vm1 = vmmov %vm9135_vm0 }
 0x243   : > { %v4263_v62 = vrot.slane %v4164_v3, 5  ;;  %v4162_v11 = vsel %vm8319_vm7, %v3477_v46, 0.0  ;;  %v3187_v33 = vadd.f32 %v5308_v12, %v7746_v53  ;;  %vm9148_vm13 = vcmask 1042432   ;;  %vm9161_vm14 = vmmov %vm9155_vm1  ;;  %v9170_v12 = vld [vmem:[#allocation99_spill] sm:$0xff] }
 0x244   : > { %v4258_v42 = vsel %vm9148_vm13, %v4255_v51, %v4257_v21  ;;  %v4259_v56 = vrot.slane %v4162_v11, 5  ;;  %v3446_v41 = vadd.f32 %v9149_v38, %v3189_v40  ;;  %v3190_v13 = vadd.f32 %v5309_v15, %v7746_v53  ;;  %vm9151_vm6 = vmmov %vm9148_vm13 }
 0x245   : > { %4346 = vst.msk [vmem:[%s7578_s18 + $0xd0] sm:$0xff] %vm9150_vm8, %v4258_v42  ;;  %v4264_v29 = vsel %vm9151_vm6, %v4261_v45, %v4263_v62  ;;  %v3444_v5 = vadd.f32 %v9152_v39, %v3187_v33  ;;  %v3188_v4 = vadd.f32 %v5310_v47, %v7746_v53  ;;  %vm8439_vm7 = vcmp.lt.s32.totalorder %v4099_v30, 16  ;;  %vm9156_vm0 = vmmov %vm9151_vm6  ;;  %v9163_v30 = vld [vmem:[#allocation96_spill] sm:$0xff] }
 0x246   : > { %v4100_v51 = vsel %vm8418_vm2, %v8390_v26, %v8309_v58  ;;  %4349 = vst.msk [vmem:[%s7578_s18 + $0xe8] sm:$0xff] %vm9155_vm1, %v4264_v29  ;;  %v4260_v1 = vsel %vm9156_vm0, %v4257_v21, %v4259_v56  ;;  %vm9157_vm15 = vmmov %vm9156_vm0  ;;  %v3482_v48 = vmax.f32 %v3446_v41, 0.0  ;;  %v3447_v63 = vadd.f32 %v9158_v27, %v3190_v13 }
 0x247   : > { %v4262_v34 = vsel %vm9157_vm15, %v4259_v56, %v4261_v45  ;;  %vm8457_vm3 = vcmp.lt.s32.totalorder %v4097_v28, 16  ;;  %4347 = vst.msk [vmem:[%s7578_s18 + $0xd8] sm:$0xff] %vm9161_vm14, %v4260_v1  ;;  %vm9162_vm10 = vmmov %vm9155_vm1  ;;  %v3480_v23 = vmax.f32 %v3444_v5, 0.0  ;;  %v3445_v58 = vadd.f32 %v9163_v30, %v3188_v4  ;;  %v3101_v28 = vpop.f32.mrb[33].mxu0 }
 0x248   : > { %4348 = vst.msk [vmem:[%s7578_s18 + $0xe0] sm:$0xff] %vm9162_vm10, %v4262_v34  ;;  %vm3954_vm2 = vcmp.ne.s32.totalorder %v8405_v7, 0  ;;  %vm3990_vm13 = vcmp.lt.s32.totalorder %v8405_v7, 0  ;;  %v4167_v20 = vsel %vm8349_vm4, %v3482_v48, 0.0  ;;  %v3483_v14 = vmax.f32 %v3447_v63, 0.0  ;;  %v5274_v17 = vpop.f32.mrb[34].mxu0  ;;  %vm9166_vm4 = vmmov %vm9156_vm0 }
 0x249   : > { %v5311_v35 = vadd.f32 %v5273_v32, %v8337_v2  ;;  %v4062_v54 = vadd.s32 18, %v8405_v7  ;;  %v4269_v8 = vrot.slane %v4167_v20, 5  ;;  %v4165_v44 = vsel %vm8366_vm11, %v3480_v23, 0.0  ;;  %v3104_v9 = vpop.f32.mrb[35].mxu0  ;;  %vm8483_vm9 = vmand %vm3990_vm13, %vm3954_vm2 }
 0x24a   : > { %v3481_v25 = vmax.f32 %v3445_v58, 0.0  ;;  %v5312_v49 = vadd.f32 %v3101_v28, %v8353_v31  ;;  %v4265_v55 = vrot.slane %v4165_v44, 5  ;;  %v4168_v22 = vsel %vm8382_vm12, %v3483_v14, 0.0  ;;  %vm9168_vm11 = vmmov %vm9155_vm1 }
 0x24b   : > { %v3193_v26 = vadd.f32 %v5311_v35, %v7746_v53  ;;  %v5313_v2 = vadd.f32 %v5274_v17, %v8370_v43  ;;  %v4271_v31 = vrot.slane %v4168_v22, 5  ;;  %v5314_v57 = vadd.f32 %v3104_v9, %v8386_v61  ;;  %vm9169_vm12 = vmmov %vm9156_vm0 }
 0x24c   : > { %v4166_v59 = vsel %vm8400_vm5, %v3481_v25, 0.0  ;;  %v3191_v16 = vadd.f32 %v5312_v49, %v7746_v53  ;;  %v4266_v43 = vsel %vm9166_vm4, %v4263_v62, %v4265_v55  ;;  %v4098_v61 = vsel %vm8483_vm9, %v4062_v54, %v8405_v7  ;;  %vm9171_vm5 = vmmov %vm9155_vm1 }
 0x24d   : > { %v4267_v37 = vrot.slane %v4166_v59, 5  ;;  %v3450_v45 = vadd.f32 %v9167_v60, %v3193_v26  ;;  %v3194_v24 = vadd.f32 %v5313_v2, %v7746_v53  ;;  %4350 = vst.msk [vmem:[%s7578_s18 + $0xf0] sm:$0xff] %vm9168_vm11, %v4266_v43  ;;  %v4272_v46 = vsel %vm9169_vm12, %v4269_v8, %v4271_v31  ;;  %vm9172_vm8 = vmmov %vm9156_vm0 }
 0x24e   : > { %v3448_v52 = vadd.f32 %v9170_v12, %v3191_v16  ;;  %v3192_v36 = vadd.f32 %v5314_v57, %v7746_v53  ;;  %4353 = vst.msk [vmem:[%s7578_s18 + $0x108] sm:$0xff] %vm9171_vm5, %v4272_v46  ;;  %vm9173_vm6 = vmmov %vm9156_vm0  ;;  %vm4136_vm15 = vcmp.lt.s32.totalorder %v4100_v51, 16  ;;  %v9175_v53 = vld [vmem:[#allocation16_spill] sm:$0xff]  ;;  %vm4134_vm14 = vcmp.lt.s32.totalorder %v4098_v61, 16 }
 0x24f   : > { %v4268_v21 = vsel %vm9172_vm8, %v4265_v55, %v4267_v37  ;;  %v4270_v3 = vsel %vm9173_vm6, %v4267_v37, %v4269_v8  ;;  %v3486_v40 = vmax.f32 %v3450_v45, 0.0  ;;  %v3451_v15 = vadd.f32 %v7911_v19, %v3194_v24  ;;  %vm9174_vm0 = vmmov %vm9155_vm1 }
 0x250   : > { %4351 = vst.msk [vmem:[%s7578_s18 + $0xf8] sm:$0xff] %vm9155_vm1, %v4268_v21  ;;  %v3484_v50 = vmax.f32 %v3448_v52, 0.0  ;;  %v3449_v0 = vadd.f32 %v9175_v53, %v3192_v36  ;;  %vm9176_vm10 = vmmov %vm9166_vm4 }
 0x251   : > { %4352 = vst.msk [vmem:[%s7578_s18 + $0x100] sm:$0xff] %vm9174_vm0, %v4270_v3  ;;  %v4171_v7 = vsel %vm8439_vm7, %v3486_v40, 0.0  ;;  %v3487_v62 = vmax.f32 %v3451_v15, 0.0  ;;  %vm9177_vm2 = vmmov %vm9174_vm0 }
 0x252   : > { %v4169_v11 = vsel %vm8457_vm3, %v3484_v50, 0.0  ;;  %v3485_v19 = vmax.f32 %v3449_v0, 0.0  ;;  %v4277_v42 = vrot.slane %v4171_v7, 5  ;;  %vm9178_vm7 = vmmov %vm9166_vm4 }
 0x253   : > { %v4273_v33 = vrot.slane %v4169_v11, 5  ;;  %v4172_v47 = vsel %vm4136_vm15, %v3487_v62, 0.0  ;;  %vm9179_vm13 = vmmov %vm9166_vm4 }
 0x254   : > { %v4279_v56 = vrot.slane %v4172_v47, 5  ;;  %v4170_v38 = vsel %vm4134_vm14, %v3485_v19, 0.0  ;;  %vm9180_vm9 = vmmov %vm9174_vm0 }
 0x255   : > { %v4274_v41 = vsel %vm9176_vm10, %v4271_v31, %v4273_v33  ;;  %v4275_v13 = vrot.slane %v4170_v38, 5  ;;  %vm9181_vm3 = vmmov %vm9174_vm0 }
 0x256   : > { %4354 = vst.msk [vmem:[%s7578_s18 + $0x110] sm:$0xff] %vm9177_vm2, %v4274_v41  ;;  %v4280_v29 = vsel %vm9178_vm7, %v4277_v42, %v4279_v56  ;;  %v4319_v39 = vsel %vm9179_vm13, %v4279_v56, 0.0  ;;  %vm9182_vm11 = vmmov %vm9166_vm4 }
 0x257   : > { %4357 = vst.msk [vmem:[%s7578_s18 + $0x128] sm:$0xff] %vm9180_vm9, %v4280_v29  ;;  %v4276_v5 = vsel %vm9166_vm4, %v4273_v33, %v4275_v13  ;;  %v4278_v4 = vsel %vm9182_vm11, %v4275_v13, %v4277_v42  ;;  %vm9183_vm12 = vmmov %vm9174_vm0 }
 0x258   : > { %4358 = vst.msk [vmem:[%s7578_s18 + $0x130] sm:$0xff] %vm9181_vm3, %v4319_v39  ;;  %vm9184_vm5 = vmmov %vm9174_vm0 }
 0x259   : > { %4355 = vst.msk [vmem:[%s7578_s18 + $0x118] sm:$0xff] %vm9183_vm12, %v4276_v5 }
 0x25a   : > { %4356 = vst.msk [vmem:[%s7578_s18 + $0x120] sm:$0xff] %vm9184_vm5, %v4278_v4 }
 0x25b PF: > { %s14_s15 = sadd.s32 1, %s5705_s15  }
 0x25c   : > { %p11_p4 = scmp.ge.s32.totalorder %s14_s15, 4  }
 0x25e   :  { %13 = sbr.rel (!%p11_p4) target bundleno = 1 (0x1), region = 69 }

// kernel: resblock_forward.2
= control target key start
LH: loop header
LB: loop body
LE: loop exit
PB: predicated region body
PF: predicated region fallthrough
CT: control target
= control target key end

     0   :  { %s5559_s12 = smov 0   ;;  %s8135_s0 = inlined_call_operand.vmem [shape: bf16[2,342,32], index: 0, kind: input, shape index: {}]   ;;  %s8136_s1 = inlined_call_operand.vmem [shape: bf16[288,32], index: 1, kind: input, shape index: {}]   ;;  %s8137_s2 = inlined_call_operand.vmem [shape: f32[1,32], index: 2, kind: input, shape index: {}]   ;;  %s8138_s3 = inlined_call_operand.vmem [shape: bf16[2,342,32], index: 3, kind: output, shape index: {}]  }
   0x1 LB: > { %s4276_s13 = sadd.s32 4294967295, %s5536_s12   ;;  %p4280_p0 = scmp.ge.s32.totalorder %s5536_s12, 1  ;;  %s5536_s12 = sphi %s5559_s12, %s13_s12  }
   0x2   : > { %p137_p1 = scmp.lt.s32.totalorder %s5536_s12, 3 }
   0x4   : > { %p138_p2 = pnand %p4280_p0, %p137_p1 }
   0x6   : > { %141 = sbr.rel (%p138_p2) target bundleno = 604 (0x25c), region = 32 }
   0xd   : > { %v5570_v0 = vld [vmem:[%s8136_s1 + $0x40] sm:$0xff]   ;;  %p161_p3 = scmp.lt.s32.totalorder %s4276_s13, 1  ;;  %v5482_v1 = vld [vmem:[%s8136_s1 + $0x10] sm:$0xff]   ;;  %v5483_v2 = vld [vmem:[%s8136_s1 + $0x48] sm:$0xff]   ;;  %vm281_vm0 = vsmask.f32 7424 }
   0xe   : > { %4907 = vmatprep.subr.bf16.mxu0 %v5570_v0  ;;  %4747 = vmatprep.subr.bf16.mxu1 %v5482_v1  ;;  %v5484_v3 = vld [vmem:[%s8136_s1 + $0x18] sm:$0xff]   ;;  %v5589_v4 = vld [vmem:[%s8136_s1 + $0x50] sm:$0xff]   ;;  %v5490_v5 = vld [vmem:[%s8136_s1] sm:$0xff]   ;;  %vm1486_vm1 = vsmask.f32 6400  ;;  %vm442_vm2 = vcmask 261120  }
   0xf   : > { %s8712_s13 = smov (!%p161_p3, %s4276_s13), 1  ;;  %4908 = vmatpush3.bf16.msra.mxu0 %v5570_v0  ;;  %4748 = vmatpush3.bf16.msra.mxu1 %v5482_v1  ;;  %v5495_v48 = vld [vmem:[%s8136_s1 + $0x58] sm:$0xff]   ;;  %vm1855_vm3 = vcmask 1045504   ;;  %vm2419_vm4 = vsmask.f32 5376  ;;  %vm922_vm5 = vcmask 1046528  }
  0x10   : > { %4909 = vmatprep.subr.bf16.mxu0 %v5483_v2  ;;  %s5399_s22 = smul.u32 172, %s8712_s13  ;;  %4749 = vmatprep.subr.bf16.mxu1 %v5484_v3  ;;  %vm2788_vm6 = vcmask 1044480  }
  0x12   : > { %s5596_s27 = scalar_lea.vmem %s8135_s0, %s5399_s22  ;;  %s6803_s9 = scalar_lea.vmem %s8138_s3, %s5399_s22 }
  0x13   : > { %4910 = vmatpush3.bf16.msra.mxu0 %v5483_v2  ;;  %4750 = vmatpush3.bf16.msra.mxu1 %v5484_v3  ;;  %v5602_v6 = vld [vmem:[%s5596_s27] sm:$0xff]   ;;  %v5605_v7 = vld [vmem:[%s5596_s27 + $0x8] sm:$0xff]   ;;  %v5609_v8 = vld [vmem:[%s5596_s27 + $0x10] sm:$0xff]  }
  0x14   : > { %4947 = vmatprep.subr.bf16.mxu0 %v5589_v4  ;;  %4787 = vmatprep.subr.bf16.mxu1 %v5490_v5  ;;  %v283_v9 = vshrl.u32 %v5602_v6, 16  ;;  %v285_v10 = vshll.u32 %v5602_v6, 16  ;;  %v290_v11 = vshll.u32 %v5605_v7, 16  ;;  %v294_v12 = vshrl.u32 %v5605_v7, 16  ;;  %v5622_v15 = vld [vmem:[%s5596_s27 + $0x18] sm:$0xff]   ;;  %v5625_v16 = vld [vmem:[%s5596_s27 + $0x20] sm:$0xff]  }
  0x15   : > { %v5616_v13 = vshll.u32 %v5609_v8, 16  ;;  %v5619_v14 = vshrl.u32 %v5609_v8, 16  ;;  %v5631_v24 = vshll.u32 %v5622_v15, 16  ;;  %v5634_v28 = vshrl.u32 %v5622_v15, 16  ;;  %v5637_v29 = vld [vmem:[%s5596_s27 + $0x28] sm:$0xff]   ;;  %v5649_v38 = vld [vmem:[%s5596_s27 + $0x30] sm:$0xff]  }
  0x16   : > { %v287_v17 = vrot.slane %v285_v10, 1  ;;  %v292_v18 = vrot.slane %v290_v11, 1  ;;  %v1487_v19 = vrot.slane %v294_v12, 1  ;;  %v1488_v20 = vrot.slane %v290_v11, 2  ;;  %v5659_v43 = vld [vmem:[%s5596_s27 + $0x38] sm:$0xff]   ;;  %v5690_v60 = vld [vmem:[%s5596_s27 + $0x40] sm:$0xff]  }
  0x17   : > { %v1490_v21 = vrot.slane %v5619_v14, 1  ;;  %v1491_v22 = vrot.slane %v5616_v13, 2  ;;  %v300_v23 = vrot.slane %v5616_v13, 1  ;;  %v1495_v31 = vrot.slane %v5631_v24, 2 }
  0x18   : > { %v288_v25 = vor.u32 %v287_v17, %v283_v9  ;;  %v296_v26 = vor.u32 %v294_v12, %v292_v18  ;;  %v1489_v27 = vor.u32 %v1488_v20, %v1487_v19  ;;  %v308_v33 = vrot.slane %v5631_v24, 1  ;;  %v5705_v9 = vld [vmem:[%s5596_s27 + $0x48] sm:$0xff]   ;;  %v5715_v17 = vld [vmem:[%s8136_s1 + $0x60] sm:$0xff]  }
  0x19   : > { %v1492_v30 = vor.u32 %v1491_v22, %v1490_v21  ;;  %v304_v32 = vor.u32 %v5619_v14, %v300_v23  ;;  %v1494_v36 = vrot.slane %v5634_v28, 1  ;;  %v5646_v37 = vshll.u32 %v5625_v16, 16 }
  0x1a   : > { %v293_v34 = vsel %vm281_vm0, %v288_v25, %v292_v18  ;;  %v301_v35 = vsel %vm281_vm0, %v296_v26, %v300_v23  ;;  %v5655_v41 = vshrl.u32 %v5625_v16, 16  ;;  %v312_v42 = vor.u32 %v5634_v28, %v308_v33  ;;  %v5728_v25 = vld [vmem:[%s5596_s27 + $0x50] sm:$0xff]   ;;  %v5502_v26 = vld [vmem:[%s8136_s1 + $0x8] sm:$0xff]  }
  0x1b   : > { %4751 = vmatprep.mubr.msk.bf16.mxu1 %vm442_vm2, %v293_v34  ;;  %v1493_v39 = vsel %vm1486_vm1, %v1489_v27, %v1492_v30  ;;  %v309_v40 = vsel %vm281_vm0, %v304_v32, %v308_v33  ;;  %v1496_v44 = vor.u32 %v1495_v31, %v1494_v36  ;;  %v1499_v45 = vrot.slane %v5646_v37, 2 }
  0x1c   : > { %4911 = vmatprep.mubr.msk.bf16.mxu0 %vm442_vm2, %v1493_v39  ;;  %4752 = vmatmul.mubr.msk.bf16.vlgmr.msra.gmra.mrb[0].mxu1 %vm442_vm2, %v301_v35  ;;  %v316_v46 = vrot.slane %v5646_v37, 1  ;;  %v5666_v47 = vshll.u32 %v5637_v29, 16  ;;  %v1498_v49 = vrot.slane %v5655_v41, 1  ;;  %v5674_v50 = vshrl.u32 %v5637_v29, 16 }
  0x1d   : > { %4755 = vmatprep.mubr.msk.bf16.mxu1 %vm442_vm2, %v309_v40  ;;  %4788 = vmatpush3.bf16.msra.mxu1 %v5490_v5  ;;  %v5677_v51 = vshll.u32 %v5649_v38, 16  ;;  %v5680_v52 = vshrl.u32 %v5649_v38, 16  ;;  %v1497_v53 = vsel %vm1486_vm1, %v1492_v30, %v1496_v44  ;;  %v5695_v62 = vshll.u32 %v5659_v43, 16 }
  0x1e   : > { %v1503_v54 = vrot.slane %v5666_v47, 2  ;;  %v320_v55 = vor.u32 %v5655_v41, %v316_v46  ;;  %4912 = vmatmul.mubr.msk.bf16.vlgmr.msra.gmra.mrb[0].mxu0 %vm442_vm2, %v1497_v53  ;;  %v1500_v56 = vor.u32 %v1499_v45, %v1498_v49  ;;  %v1502_v57 = vrot.slane %v5674_v50, 1  ;;  %4789 = vmatprep.subr.bf16.mxu1 %v5502_v26  ;;  %v5759_v49 = vld [vmem:[%s5596_s27 + $0x58] sm:$0xff]  }
  0x1f   : > { %v324_v58 = vrot.slane %v5666_v47, 1  ;;  %v1506_v59 = vrot.slane %v5680_v52, 1  ;;  %4948 = vmatpush3.bf16.msra.mxu0 %v5589_v4  ;;  %v1507_v61 = vrot.slane %v5677_v51, 2  ;;  %v5698_v63 = vshrl.u32 %v5659_v43, 16 }
  0x20   : > { %v1501_v1 = vsel %vm1486_vm1, %v1496_v44, %v1500_v56  ;;  %v317_v2 = vsel %vm281_vm0, %v312_v42, %v316_v46  ;;  %v1504_v3 = vor.u32 %v1503_v54, %v1502_v57  ;;  %4949 = vmatprep.subr.bf16.mxu0 %v5495_v48  ;;  %v332_v10 = vrot.slane %v5677_v51, 1 }
  0x21   : > { %4915 = vmatprep.mubr.msk.bf16.mxu0 %vm442_vm2, %v1501_v1  ;;  %v325_v5 = vsel %vm281_vm0, %v320_v55, %v324_v58  ;;  %v1508_v4 = vor.u32 %v1507_v61, %v1506_v59  ;;  %v1510_v11 = vrot.slane %v5698_v63, 1  ;;  %v5710_v12 = vshll.u32 %v5690_v60, 16  ;;  %4790 = vmatpush3.bf16.msra.mxu1 %v5502_v26  ;;  %v5771_v59 = vld [vmem:[%s8136_s1 + $0x20] sm:$0xff]  }
  0x22   : > { %v1505_v18 = vsel %vm1486_vm1, %v1500_v56, %v1504_v3  ;;  %v1511_v19 = vrot.slane %v5695_v62, 2  ;;  %v5721_v20 = vshrl.u32 %v5690_v60, 16  ;;  %v328_v22 = vor.u32 %v5674_v50, %v324_v58  ;;  %4827 = vmatprep.subr.bf16.mxu1 %v5771_v59 }
  0x23   : > { %4950 = vmatpush3.bf16.msra.mxu0 %v5495_v48  ;;  %v1509_v21 = vsel %vm1486_vm1, %v1504_v3, %v1508_v4  ;;  %v1515_v23 = vrot.slane %v5710_v12, 2  ;;  %v336_v27 = vor.u32 %v5680_v52, %v332_v10  ;;  %v340_v30 = vrot.slane %v5695_v62, 1 }
  0x24   : > { %4756 = vmatmul.mubr.msk.bf16.gmra.mrb[4].mxu1 %vm442_vm2, %v317_v2  ;;  %4987 = vmatprep.subr.bf16.mxu0 %v5715_v17  ;;  %v1514_v31 = vrot.slane %v5721_v20, 1  ;;  %v1512_v32 = vor.u32 %v1511_v19, %v1510_v11  ;;  %v5740_v33 = vshll.u32 %v5705_v9, 16  ;;  %v5743_v34 = vshrl.u32 %v5705_v9, 16 }
  0x25   : > { %4759 = vmatprep.mubr.msk.bf16.mxu1 %vm442_vm2, %v325_v5  ;;  %v333_v35 = vsel %vm281_vm0, %v328_v22, %v332_v10  ;;  %v5747_v39 = vshll.u32 %v5728_v25, 16  ;;  %v5750_v40 = vshrl.u32 %v5728_v25, 16  ;;  %v341_v42 = vsel %vm281_vm0, %v336_v27, %v340_v30  ;;  %v5785_v10 = vld [vmem:[%s5596_s27 + $0x88] sm:$0xff]  }
  0x26   : > { %4916 = vmatmul.mubr.msk.bf16.gmra.mrb[4].mxu0 %vm442_vm2, %v1505_v18  ;;  %v1516_v36 = vor.u32 %v1515_v23, %v1514_v31  ;;  %v1513_v44 = vsel %vm1486_vm1, %v1508_v4, %v1512_v32  ;;  %v348_v45 = vrot.slane %v5710_v12, 1  ;;  %v1518_v46 = vrot.slane %v5743_v34, 1  ;;  %v5789_v18 = vld [vmem:[%s5596_s27 + $0x60] sm:$0xff]   ;;  %v208_v23 = vld [vmem:[%s5596_s27 + $0x90] sm:$0xf] }
  0x27   : > { %4919 = vmatprep.mubr.msk.bf16.mxu0 %vm442_vm2, %v1509_v21  ;;  %v1519_v48 = vrot.slane %v5740_v33, 2  ;;  %v344_v54 = vor.u32 %v5698_v63, %v340_v30  ;;  %v1522_v55 = vrot.slane %v5750_v40, 1  ;;  %v1523_v56 = vrot.slane %v5747_v39, 2  ;;  %v5800_v30 = vld [vmem:[%s5596_s27 + $0x68] sm:$0xff]  }
  0x28   : > { %v1517_v53 = vsel %vm1486_vm1, %v1512_v32, %v1516_v36  ;;  %v352_v57 = vor.u32 %v5721_v20, %v348_v45  ;;  %v356_v58 = vrot.slane %v5740_v33, 1  ;;  %v5776_v1 = vshll.u32 %v5759_v49, 16 }
  0x29   : > { %v1520_v61 = vor.u32 %v1519_v48, %v1518_v46  ;;  %v5779_v2 = vshrl.u32 %v5759_v49, 16  ;;  %v349_v3 = vsel %vm281_vm0, %v344_v54, %v348_v45  ;;  %v1524_v5 = vor.u32 %v1523_v56, %v1522_v55 }
  0x2a   : > { %8247 = vst [vmem:[#allocation2_spill] sm:$0xff] %v5776_v1  ;;  %v357_v4 = vsel %vm281_vm0, %v352_v57, %v356_v58  ;;  %v364_v11 = vrot.slane %v5747_v39, 1  ;;  %v1527_v22 = vrot.slane %v5776_v1, 2  ;;  %v360_v27 = vor.u32 %v5743_v34, %v356_v58 }
  0x2b   : > { %8248 = vst [vmem:[#allocation3_spill] sm:$0xff] %v5779_v2  ;;  %v1521_v19 = vsel %vm1486_vm1, %v1516_v36, %v1520_v61  ;;  %v1526_v21 = vrot.slane %v5779_v2, 1  ;;  %v1525_v26 = vsel %vm1486_vm1, %v1520_v61, %v1524_v5  ;;  %v372_v32 = vrot.slane %v5776_v1, 1 }
  0x2c   : > { %4760 = vmatmul.mubr.msk.bf16.gmra.mrb[8].mxu1 %vm442_vm2, %v333_v35  ;;  %v368_v31 = vor.u32 %v5750_v40, %v364_v11  ;;  %v5805_v35 = vshll.u32 %v5785_v10, 16  ;;  %v5808_v36 = vcombine.low %v208_v23, %v208_v23  ;;  %v5817_v45 = vshll.u32 %v5789_v18, 16 }
  0x2d   : > { %4763 = vmatprep.mubr.msk.bf16.mxu1 %vm442_vm2, %v341_v42  ;;  %v5811_v42 = vshrl.u32 %v5785_v10, 16  ;;  %v365_v48 = vsel %vm281_vm0, %v360_v27, %v364_v11  ;;  %v1857_v54 = vrot.slane %v5609_v8, 2  ;;  %v5826_v57 = vshrl.u32 %v5789_v18, 16 }
  0x2e   : > { %4920 = vmatmul.mubr.msk.bf16.gmra.mrb[8].mxu0 %vm442_vm2, %v1513_v44  ;;  %8249 = vst [vmem:[#allocation4_spill] sm:$0xff] %v5808_v36  ;;  %v5814_v44 = vor.u32 %v1527_v22, %v1526_v21  ;;  %8252 = vst [vmem:[#allocation7_spill] sm:$0xff] %v5817_v45  ;;  %v8139_v46 = vrot.slane %v5805_v35, 1  ;;  %v426_v55 = vshll.u32 %v5808_v36, 16  ;;  %v373_v56 = vsel %vm281_vm0, %v368_v31, %v372_v32 }
  0x2f   : > { %4923 = vmatprep.mubr.msk.bf16.mxu0 %vm442_vm2, %v1517_v53  ;;  %8250 = vst [vmem:[#allocation5_spill] sm:$0xff] %v5811_v42  ;;  %v1856_v53 = vrot.slane %v5605_v7, 2  ;;  %8253 = vst [vmem:[#allocation8_spill] sm:$0xff] %v5826_v57  ;;  %v5829_v58 = vshll.u32 %v5800_v30, 16  ;;  %v380_v11 = vrot.slane %v5817_v45, 1  ;;  %v376_v22 = vor.u32 %v5779_v2, %v372_v32 }
  0x30   : > { %8251 = vst [vmem:[#allocation6_spill] sm:$0xff] %v5814_v44  ;;  %v424_v61 = vor.u32 %v5811_v42, %v8139_v46  ;;  %v5877_v46 = vld [vmem:[%s5596_s27 + $0x80] sm:$0xff]   ;;  %v5510_v42 = vld [vmem:[%s8136_s1 + $0x68] sm:$0xff]   ;;  %v2427_v2 = vrot.slane %v5655_v41, 2  ;;  %v2428_v36 = vrot.slane %v5646_v37, 3  ;;  %v1871_v37 = vrot.slane %v5705_v9, 2 }
  0x31   : > { %8254 = vst [vmem:[#allocation9_spill] sm:$0xff] %v5829_v58  ;;  %v1858_v21 = vsel %vm1855_vm3, %v1856_v53, %v1857_v54  ;;  %v384_v27 = vor.u32 %v5826_v57, %v380_v11  ;;  %v388_v31 = vrot.slane %v5829_v58, 1  ;;  %v381_v32 = vsel %vm281_vm0, %v376_v22, %v380_v11 }
  0x32   : > { %v5919_v45 = vshrl.u32 %v5877_v46, 16  ;;  %v2431_v41 = vrot.slane %v5674_v50, 2 }
  0x34   : > { %4764 = vmatmul.mubr.msk.bf16.gmra.mrb[12].mxu1 %vm442_vm2, %v349_v3  ;;  %v428_v3 = vrot.slane %v426_v55, 1  ;;  %v1861_v55 = vrot.slane %v5625_v16, 2  ;;  %8262 = vst [vmem:[#allocation17_spill] sm:$0xff] %v5919_v45 }
  0x35   : > { %4767 = vmatprep.mubr.msk.bf16.mxu1 %vm442_vm2, %v357_v4  ;;  %v1529_v4 = vsel %vm1486_vm1, %v1524_v5, %v5814_v44  ;;  %v5850_v5 = vld [vmem:[%s5596_s27 + $0x78] sm:$0xff]  }
  0x36   : > { %4924 = vmatmul.mubr.msk.bf16.gmra.mrb[12].mxu0 %vm442_vm2, %v1521_v19  ;;  %v5839_v19 = vld [vmem:[%s5596_s27 + $0x70] sm:$0xff]  }
  0x37   : > { %4927 = vmatprep.mubr.msk.bf16.mxu0 %vm442_vm2, %v1525_v26  ;;  %v5845_v26 = vsel %vm281_vm0, %v424_v61, %v428_v3  ;;  %v5856_v53 = vshll.u32 %v5839_v19, 16  ;;  %v389_v61 = vsel %vm281_vm0, %v384_v27, %v388_v31  ;;  %v5865_v3 = vshrl.u32 %v5839_v19, 16 }
  0x39   : > { %8255 = vst [vmem:[#allocation10_spill] sm:$0xff] %v5856_v53  ;;  %8257 = vst [vmem:[#allocation12_spill] sm:$0xff] %v5865_v3  ;;  %v396_v22 = vrot.slane %v5856_v53, 1  ;;  %v5894_v53 = vld [vmem:[%s5596_s27 + $0x98] sm:$0xf] }
  0x3c   : > { %4768 = vmatmul.mubr.msk.bf16.gmra.mrb[16].mxu1 %vm442_vm2, %v365_v48  ;;  %v1859_v48 = vrot.slane %v5622_v15, 2 }
  0x3d   : > { %4771 = vmatprep.mubr.msk.bf16.mxu1 %vm442_vm2, %v373_v56  ;;  %v5861_v56 = vshrl.u32 %v5800_v30, 16 }
  0x3e   : > { %4928 = vmatmul.mubr.msk.bf16.gmra.mrb[16].mxu0 %vm442_vm2, %v1529_v4  ;;  %v5868_v4 = vshll.u32 %v5850_v5, 16  ;;  %v5873_v11 = vsel %vm1855_vm3, %v1857_v54, %v1859_v48  ;;  %v5881_v27 = vsel %vm1855_vm3, %v1859_v48, %v1861_v55  ;;  %v5902_v48 = vshll.u32 %v5877_v46, 16 }
  0x3f   : > { %4951 = vmatprep.mubr.msk.bf16.mxu0 %vm442_vm2, %v1858_v21  ;;  %8256 = vst [vmem:[#allocation11_spill] sm:$0xff] %v5861_v56  ;;  %v209_v21 = vld [vmem:[%s5596_s27 + $0x94] sm:$0xf]  ;;  %v392_v44 = vor.u32 %v5861_v56, %v388_v31  ;;  %v1863_v31 = vrot.slane %v5637_v29, 2 }
  0x40   : > { %8258 = vst [vmem:[#allocation13_spill] sm:$0xff] %v5868_v4  ;;  %v404_v54 = vrot.slane %v5868_v4, 1  ;;  %v5889_v58 = vcombine.low %v208_v23, %v209_v21  ;;  %8260 = vst [vmem:[#allocation15_spill] sm:$0xff] %v5902_v48  ;;  %v1865_v21 = vrot.slane %v5649_v38, 2  ;;  %v412_v57 = vrot.slane %v5902_v48, 1 }
  0x41   : > { %v397_v23 = vsel %vm281_vm0, %v392_v44, %v396_v22  ;;  %v1869_v48 = vrot.slane %v5690_v60, 2 }
  0x42   : > { %8259 = vst [vmem:[#allocation14_spill] sm:$0xff] %v5889_v58 }
  0x44   : > { %4772 = vmatmul.mubr.msk.bf16.gmra.mrb[20].mxu1 %vm442_vm2, %v381_v32  ;;  %v400_v32 = vor.u32 %v5865_v3, %v396_v22  ;;  %v5910_v3 = vshrl.u32 %v5850_v5, 16  ;;  %v5927_v22 = vsel %vm1855_vm3, %v1861_v55, %v1863_v31  ;;  %v416_v55 = vor.u32 %v5919_v45, %v412_v57 }
  0x45   : > { %4775 = vmatprep.mubr.msk.bf16.mxu1 %vm442_vm2, %v389_v61  ;;  %v211_v61 = vld [vmem:[%s5596_s27 + $0x9c] sm:$0xf] }
  0x46   : > { %4952 = vmatmul.mubr.msk.bf16.vlgmr.msra.gmra.mrb[0].mxu0 %vm442_vm2, %v5873_v11  ;;  %v5905_v4 = vcombine.low %v5894_v53, %v211_v61  ;;  %8261 = vst [vmem:[#allocation16_spill] sm:$0xff] %v5910_v3  ;;  %v405_v56 = vsel %vm281_vm0, %v400_v32, %v404_v54  ;;  %v5922_v61 = vrot.slane %v5889_v58, 2  ;;  %v5938_v58 = vsel %vm1855_vm3, %v1863_v31, %v1865_v21 }
  0x47   : > { %4988 = vmatpush3.bf16.msra.mxu0 %v5715_v17  ;;  %4955 = vmatprep.mubr.msk.bf16.mxu0 %vm442_vm2, %v5881_v27  ;;  %v5915_v17 = vld [vmem:[%s8136_s1 + $0x70] sm:$0xff]   ;;  %v408_v1 = vor.u32 %v5910_v3, %v404_v54  ;;  %v2423_v31 = vrot.slane %v5634_v28, 2  ;;  %v2424_v54 = vrot.slane %v5631_v24, 3  ;;  %v8263_v3 = vrot.slane %v5805_v35, 1 }
  0x48   : > { %4989 = vmatprep.subr.bf16.mxu0 %v5510_v42  ;;  %v8160_v44 = vrot.slane %v5905_v4, 2 }
  0x4a   : > { %v5934_v32 = vsel %vm1855_vm3, %v5922_v61, %v8160_v44  ;;  %v413_v44 = vsel %vm281_vm0, %v408_v1, %v412_v57  ;;  %v2429_v1 = vor.u32 %v2428_v36, %v2427_v2  ;;  %v2432_v2 = vrot.slane %v5666_v47, 3 }
  0x4b   : > { %4990 = vmatpush3.bf16.msra.mxu0 %v5510_v42  ;;  %v2420_v42 = vrot.slane %v5619_v14, 2  ;;  %v421_v14 = vsel %vm281_vm0, %v416_v55, %v8263_v3  ;;  %v1873_v36 = vrot.slane %v5728_v25, 2  ;;  %v5986_v55 = vsel %vm1855_vm3, %v1869_v48, %v1871_v37 }
  0x4c   : > { %4776 = vmatmul.mubr.msk.bf16.gmra.mrb[24].mxu1 %vm442_vm2, %v397_v23  ;;  %5027 = vmatprep.subr.bf16.mxu0 %v5915_v17  ;;  %v2421_v23 = vrot.slane %v5616_v13, 3  ;;  %v2425_v13 = vor.u32 %v2424_v54, %v2423_v31  ;;  %v5514_v31 = vld [vmem:[%s8136_s1 + $0x28] sm:$0xff]   ;;  %v2443_v54 = vrot.slane %v5721_v20, 2 }
  0x4d   : > { %4779 = vmatprep.mubr.msk.bf16.mxu1 %vm442_vm2, %v405_v56  ;;  %v1867_v56 = vrot.slane %v5659_v43, 2  ;;  %v5994_v47 = vsel %vm1855_vm3, %v1871_v37, %v1873_v36  ;;  %v2447_v37 = vrot.slane %v5743_v34, 2 }
  0x4e   : > { %4956 = vmatmul.mubr.msk.bf16.gmra.mrb[4].mxu0 %vm442_vm2, %v5927_v22  ;;  %v2422_v45 = vor.u32 %v2421_v23, %v2420_v42  ;;  %v5971_v3 = vsel %vm2419_vm4, %v2425_v13, %v2429_v1  ;;  %v1877_v23 = vrot.slane %v5789_v18, 2 }
  0x4f   : > { %4959 = vmatprep.mubr.msk.bf16.mxu0 %vm442_vm2, %v5938_v58  ;;  %v5961_v28 = vsel %vm1855_vm3, %v1865_v21, %v1867_v56  ;;  %v5968_v57 = vsel %vm1855_vm3, %v1867_v56, %v1869_v48  ;;  %v2435_v21 = vrot.slane %v5680_v52, 2  ;;  %v2439_v52 = vrot.slane %v5698_v63, 2 }
  0x50   : > { %v5964_v24 = vsel %vm2419_vm4, %v2422_v45, %v2425_v13  ;;  %v2433_v45 = vor.u32 %v2432_v2, %v2431_v41  ;;  %v1875_v48 = vrot.slane %v5759_v49, 2  ;;  %v2448_v41 = vrot.slane %v5740_v33, 3 }
  0x51   : > { %v1881_v2 = vrot.slane %v5839_v19, 2 }
  0x52   : > { %v5989_v42 = vsel %vm2419_vm4, %v2429_v1, %v2433_v45  ;;  %v6023_v1 = vsel %vm1855_vm3, %v1875_v48, %v1877_v23 }
  0x54   : > { %4780 = vmatmul.mubr.msk.bf16.gmra.mrb[28].mxu1 %vm442_vm2, %v413_v44  ;;  %v2436_v44 = vrot.slane %v5677_v51, 3 }
  0x55   : > { %4783 = vmatprep.mubr.msk.bf16.mxu1 %vm442_vm2, %v421_v14  ;;  %v2444_v14 = vrot.slane %v5710_v12, 3  ;;  %v6029_v12 = vld [vmem:[%s8136_s1 + $0x30] sm:$0xff]  }
  0x56   : > { %4960 = vmatmul.mubr.msk.bf16.gmra.mrb[8].mxu0 %vm442_vm2, %v5961_v28  ;;  %v2437_v50 = vor.u32 %v2436_v44, %v2435_v21  ;;  %v2452_v21 = vrot.slane %v5747_v39, 3 }
  0x57   : > { %4963 = vmatprep.mubr.msk.bf16.mxu0 %vm442_vm2, %v5968_v57  ;;  %v2445_v13 = vor.u32 %v2444_v14, %v2443_v54 }
  0x58   : > { %v5999_v51 = vsel %vm2419_vm4, %v2433_v45, %v2437_v50  ;;  %v2451_v45 = vrot.slane %v5750_v40, 2  ;;  %v1883_v40 = vrot.slane %v5850_v5, 2 }
  0x5a   : > { %v6053_v34 = vor.u32 %v2452_v21, %v2451_v45  ;;  %v8264_v45 = vrot.slane %v5905_v4, 2 }
  0x5c   : > { %4784 = vmatmul.mubr.msk.bf16.gmra.mrb[32].mxu1 %vm442_vm2, %v5845_v26  ;;  %v2440_v26 = vrot.slane %v5695_v62, 3  ;;  %v6018_v62 = vsel %vm1855_vm3, %v1873_v36, %v1875_v48  ;;  %v2449_v36 = vor.u32 %v2448_v41, %v2447_v37  ;;  %v942_v37 = vrot.slane %v5728_v25, 1 }
  0x5d   : > { %4791 = vmatprep.mubr.msk.bf16.mxu1 %vm442_vm2, %v5602_v6  ;;  %v944_v41 = vrot.slane %v5759_v49, 1 }
  0x5e   : > { %4964 = vmatmul.mubr.msk.bf16.gmra.mrb[12].mxu0 %vm442_vm2, %v5986_v55  ;;  %v2441_v56 = vor.u32 %v2440_v26, %v2439_v52  ;;  %v6046_v44 = vsel %vm2419_vm4, %v2445_v13, %v2449_v36  ;;  %v6062_v39 = vsel %vm2419_vm4, %v2449_v36, %v6053_v34  ;;  %v1885_v52 = vrot.slane %v5877_v46, 2 }
  0x5f   : > { %4967 = vmatprep.mubr.msk.bf16.mxu0 %vm442_vm2, %v5994_v47  ;;  %v6073_v26 = vsel %vm1855_vm3, %v1881_v2, %v1883_v40  ;;  %v6237_v36 = vsel %vm922_vm5, %v942_v37, %v944_v41 }
  0x60   : > { %v6013_v63 = vsel %vm2419_vm4, %v2437_v50, %v2441_v56  ;;  %v6032_v20 = vsel %vm2419_vm4, %v2441_v56, %v2445_v13  ;;  %v6078_v48 = vsel %vm1855_vm3, %v1883_v40, %v1885_v52  ;;  %v5515_v13 = vld [vmem:[%s8136_s1 + $0x78] sm:$0xff]  }
  0x64   : > { %4792 = vmatmul.mubr.msk.bf16.vlgmr.msra.gmra.mrb[0].mxu1 %vm442_vm2, %v5605_v7 }
  0x65   : > { %4795 = vmatprep.mubr.msk.bf16.mxu1 %vm442_vm2, %v5609_v8  ;;  %4828 = vmatpush3.bf16.msra.mxu1 %v5771_v59  ;;  %v1879_v59 = vrot.slane %v5800_v30, 2 }
  0x66   : > { %4829 = vmatprep.subr.bf16.mxu1 %v5514_v31  ;;  %4968 = vmatmul.mubr.msk.bf16.gmra.mrb[16].mxu0 %vm442_vm2, %v6018_v62 }
  0x67   : > { %4971 = vmatprep.mubr.msk.bf16.mxu0 %vm442_vm2, %v6023_v1  ;;  %v6051_v33 = vsel %vm1855_vm3, %v1877_v23, %v1879_v59  ;;  %v6058_v50 = vsel %vm1855_vm3, %v1879_v59, %v1881_v2  ;;  %v1887_v23 = vrot.slane %v5785_v10, 2 }
  0x69   : > { %4830 = vmatpush3.bf16.msra.mxu1 %v5514_v31  ;;  %v6088_v56 = vsel %vm1855_vm3, %v1885_v52, %v1887_v23  ;;  %v6092_v31 = vcombine.low %v5894_v53, %v5894_v53  ;;  %v6098_v54 = vsel %vm1855_vm3, %v1887_v23, %v5922_v61  ;;  %v950_v52 = vrot.slane %v5839_v19, 1 }
  0x6a   : > { %4867 = vmatprep.subr.bf16.mxu1 %v6029_v12 }
  0x6b   : > { %v1891_v14 = vrot.slane %v6092_v31, 2 }
  0x6c   : > { %4796 = vmatmul.mubr.msk.bf16.gmra.mrb[4].mxu1 %vm442_vm2, %v5622_v15 }
  0x6d   : > { %4799 = vmatprep.mubr.msk.bf16.mxu1 %vm442_vm2, %v5625_v16  ;;  %v1892_v53 = vsel %vm1855_vm3, %v5922_v61, %v1891_v14  ;;  %v926_v61 = vrot.slane %v5609_v8, 1  ;;  %v930_v8 = vrot.slane %v5625_v16, 1  ;;  %v934_v16 = vrot.slane %v5649_v38, 1  ;;  %v8265_v14 = vld [vmem:[#allocation4_spill] sm:$0xff] }
  0x6e   : > { %4972 = vmatmul.mubr.msk.bf16.gmra.mrb[20].mxu0 %vm442_vm2, %v6051_v33 }
  0x6f   : > { %4975 = vmatprep.mubr.msk.bf16.mxu0 %vm442_vm2, %v6058_v50 }
  0x74   : > { %4800 = vmatmul.mubr.msk.bf16.gmra.mrb[8].mxu1 %vm442_vm2, %v5637_v29 }
  0x75   : > { %4803 = vmatprep.mubr.msk.bf16.mxu1 %vm442_vm2, %v5649_v38  ;;  %v938_v38 = vrot.slane %v5690_v60, 1 }
  0x76   : > { %4976 = vmatmul.mubr.msk.bf16.gmra.mrb[24].mxu0 %vm442_vm2, %v6073_v26 }
  0x77   : > { %4979 = vmatprep.mubr.msk.bf16.mxu0 %vm442_vm2, %v6078_v48 }
  0x7c   : > { %4804 = vmatmul.mubr.msk.bf16.gmra.mrb[12].mxu1 %vm442_vm2, %v5659_v43 }
  0x7d   : > { %4807 = vmatprep.mubr.msk.bf16.mxu1 %vm442_vm2, %v5690_v60 }
  0x7e   : > { %4980 = vmatmul.mubr.msk.bf16.gmra.mrb[28].mxu0 %vm442_vm2, %v6088_v56 }
  0x7f   : > { %4983 = vmatprep.mubr.msk.bf16.mxu0 %vm442_vm2, %v6098_v54 }
  0x84   : > { %4808 = vmatmul.mubr.msk.bf16.gmra.mrb[16].mxu1 %vm442_vm2, %v5705_v9 }
  0x85   : > { %4811 = vmatprep.mubr.msk.bf16.mxu1 %vm442_vm2, %v5728_v25 }
  0x86   : > { %4984 = vmatmul.mubr.msk.bf16.gmra.mrb[32].mxu0 %vm442_vm2, %v1892_v53  ;;  %v958_v53 = vrot.slane %v8265_v14, 1  ;;  %v8277_v14 = vld [vmem:[#allocation15_spill] sm:$0xff] }
  0x87   : > { %4991 = vmatprep.mubr.msk.bf16.mxu0 %vm442_vm2, %v5873_v11  ;;  %v6129_v11 = vld [vmem:[%s8136_s1 + $0x80] sm:$0xff]  }
  0x8c   : > { %4812 = vmatmul.mubr.msk.bf16.gmra.mrb[20].mxu1 %vm442_vm2, %v5759_v49 }
  0x8d   : > { %4815 = vmatprep.mubr.msk.bf16.mxu1 %vm442_vm2, %v5789_v18 }
  0x8e   : > { %4992 = vmatmul.mubr.msk.bf16.vlgmr.msra.gmra.mrb[0].mxu0 %vm442_vm2, %v5881_v27  ;;  %v923_v27 = vrot.slane %v5602_v6, 1  ;;  %v928_v6 = vrot.slane %v5622_v15, 1  ;;  %v932_v15 = vrot.slane %v5637_v29, 1  ;;  %v936_v29 = vrot.slane %v5659_v43, 1 }
  0x8f   : > { %5028 = vmatpush3.bf16.msra.mxu0 %v5915_v17  ;;  %4995 = vmatprep.mubr.msk.bf16.mxu0 %vm442_vm2, %v5927_v22  ;;  %v924_v17 = vrot.slane %v5605_v7, 1  ;;  %v940_v43 = vrot.slane %v5705_v9, 1 }
  0x90   : > { %5029 = vmatprep.subr.bf16.mxu0 %v5515_v13  ;;  %v6164_v22 = vsel %vm922_vm5, %v926_v61, %v928_v6 }
  0x91   : > { %v6161_v7 = vsel %vm922_vm5, %v924_v17, %v926_v61  ;;  %v6234_v2 = vsel %vm922_vm5, %v940_v43, %v942_v37 }
  0x93   : > { %5030 = vmatpush3.bf16.msra.mxu0 %v5515_v13  ;;  %v8266_v13 = vld [vmem:[#allocation3_spill] sm:$0xff] }
  0x94   : > { %4816 = vmatmul.mubr.msk.bf16.gmra.mrb[24].mxu1 %vm442_vm2, %v5800_v30  ;;  %5067 = vmatprep.subr.bf16.mxu0 %v6129_v11 }
  0x95   : > { %4819 = vmatprep.mubr.msk.bf16.mxu1 %vm442_vm2, %v5839_v19 }
  0x96   : > { %4996 = vmatmul.mubr.msk.bf16.gmra.mrb[4].mxu0 %vm442_vm2, %v5938_v58  ;;  %v925_v58 = vsel %vm922_vm5, %v923_v27, %v924_v17 }
  0x97   : > { %4999 = vmatprep.mubr.msk.bf16.mxu0 %vm442_vm2, %v5961_v28  ;;  %v5520_v28 = vld [vmem:[%s8136_s1 + $0x38] sm:$0xff]  }
  0x9c   : > { %4820 = vmatmul.mubr.msk.bf16.gmra.mrb[28].mxu1 %vm442_vm2, %v5850_v5 }
  0x9d   : > { %4823 = vmatprep.mubr.msk.bf16.mxu1 %vm442_vm2, %v5877_v46 }
  0x9e   : > { %5000 = vmatmul.mubr.msk.bf16.gmra.mrb[8].mxu0 %vm442_vm2, %v5968_v57  ;;  %v6181_v57 = vsel %vm922_vm5, %v928_v6, %v930_v8  ;;  %v8269_v6 = vld [vmem:[#allocation7_spill] sm:$0xff] }
  0x9f   : > { %5003 = vmatprep.mubr.msk.bf16.mxu0 %vm442_vm2, %v5986_v55  ;;  %v6184_v55 = vsel %vm922_vm5, %v930_v8, %v932_v15 }
  0xa4   : > { %4824 = vmatmul.mubr.msk.bf16.gmra.mrb[32].mxu1 %vm442_vm2, %v5785_v10 }
  0xa5   : > { %4831 = vmatprep.mubr.msk.bf16.mxu1 %vm442_vm2, %v925_v58  ;;  %v8268_v58 = vld [vmem:[#allocation8_spill] sm:$0xff] }
  0xa6   : > { %5004 = vmatmul.mubr.msk.bf16.gmra.mrb[12].mxu0 %vm442_vm2, %v5994_v47  ;;  %v6198_v47 = vsel %vm922_vm5, %v932_v15, %v934_v16  ;;  %v2459_v61 = vrot.slane %v8268_v58, 2 }
  0xa7   : > { %5007 = vmatprep.mubr.msk.bf16.mxu0 %vm442_vm2, %v6018_v62  ;;  %v6214_v62 = vsel %vm922_vm5, %v936_v29, %v938_v38 }
  0xac   : > { %4832 = vmatmul.mubr.msk.bf16.vlgmr.msra.gmra.mrb[0].mxu1 %vm442_vm2, %v6161_v7 }
  0xad   : > { %4835 = vmatprep.mubr.msk.bf16.mxu1 %vm442_vm2, %v6164_v22  ;;  %4868 = vmatpush3.bf16.msra.mxu1 %v6029_v12  ;;  %v6222_v12 = vld [vmem:[%s5596_s27 + $0xa0] ss:$0 sps:$4 sm:$0xff]  }
  0xae   : > { %4869 = vmatprep.subr.bf16.mxu1 %v5520_v28  ;;  %5008 = vmatmul.mubr.msk.bf16.gmra.mrb[16].mxu0 %vm442_vm2, %v6023_v1  ;;  %v6217_v1 = vsel %vm922_vm5, %v938_v38, %v940_v43  ;;  %v2182_v59 = vrot.slane %v6222_v12, 2 }
  0xaf   : > { %5011 = vmatprep.mubr.msk.bf16.mxu0 %vm442_vm2, %v6051_v33  ;;  %v948_v33 = vrot.slane %v5800_v30, 1 }
  0xb0   : > { %v2183_v21 = vsel %vm1855_vm3, %v8264_v45, %v2182_v59  ;;  %v8274_v45 = vld [vmem:[#allocation16_spill] sm:$0xff] }
  0xb1   : > { %4870 = vmatpush3.bf16.msra.mxu1 %v5520_v28  ;;  %v2460_v28 = vrot.slane %v8269_v6, 3 }
  0xb2   : > { %5107 = vmatprep.subr.bf16.mxu1 %v5570_v0  ;;  %v6201_v0 = vsel %vm922_vm5, %v934_v16, %v936_v29  ;;  %v8271_v16 = vld [vmem:[#allocation9_spill] sm:$0xff] }
  0xb3   : > { %v2461_v29 = vor.u32 %v2460_v28, %v2459_v61 }
  0xb4   : > { %4836 = vmatmul.mubr.msk.bf16.gmra.mrb[4].mxu1 %vm442_vm2, %v6181_v57 }
  0xb5   : > { %4839 = vmatprep.mubr.msk.bf16.mxu1 %vm442_vm2, %v6184_v55 }
  0xb6   : > { %5012 = vmatmul.mubr.msk.bf16.gmra.mrb[20].mxu0 %vm442_vm2, %v6058_v50 }
  0xb7   : > { %5015 = vmatprep.mubr.msk.bf16.mxu0 %vm442_vm2, %v6073_v26  ;;  %v5521_v26 = vld [vmem:[%s8136_s1 + $0x88] sm:$0xff]  }
  0xbc   : > { %4840 = vmatmul.mubr.msk.bf16.gmra.mrb[8].mxu1 %vm442_vm2, %v6198_v47 }
  0xbd   : > { %4843 = vmatprep.mubr.msk.bf16.mxu1 %vm442_vm2, %v6201_v0 }
  0xbe   : > { %5016 = vmatmul.mubr.msk.bf16.gmra.mrb[24].mxu0 %vm442_vm2, %v6078_v48  ;;  %v6272_v48 = vsel %vm922_vm5, %v948_v33, %v950_v52 }
  0xbf   : > { %5019 = vmatprep.mubr.msk.bf16.mxu0 %vm442_vm2, %v6088_v56  ;;  %v6283_v56 = vrot.slane %v5785_v10, 1 }
  0xc4   : > { %4844 = vmatmul.mubr.msk.bf16.gmra.mrb[12].mxu1 %vm442_vm2, %v6214_v62 }
  0xc5   : > { %4847 = vmatprep.mubr.msk.bf16.mxu1 %vm442_vm2, %v6217_v1 }
  0xc6   : > { %5020 = vmatmul.mubr.msk.bf16.gmra.mrb[28].mxu0 %vm442_vm2, %v6098_v54 }
  0xc7   : > { %5023 = vmatprep.mubr.msk.bf16.mxu0 %vm442_vm2, %v5934_v32  ;;  %v946_v32 = vrot.slane %v5789_v18, 1 }
  0xc9   : > { %v6252_v50 = vsel %vm922_vm5, %v944_v41, %v946_v32  ;;  %v6255_v40 = vsel %vm922_vm5, %v946_v32, %v948_v33  ;;  %v8273_v41 = vld [vmem:[#allocation10_spill] sm:$0xff]  ;;  %v8275_v32 = vld [vmem:[#allocation13_spill] sm:$0xff]  ;;  %v5523_v33 = vld [vmem:[%s8136_s1 + $0x48] sm:$0xff]  }
  0xcc   : > { %4848 = vmatmul.mubr.msk.bf16.gmra.mrb[16].mxu1 %vm442_vm2, %v6234_v2 }
  0xcd   : > { %4851 = vmatprep.mubr.msk.bf16.mxu1 %vm442_vm2, %v6237_v36 }
  0xce   : > { %5024 = vmatmul.mubr.msk.bf16.gmra.mrb[32].mxu0 %vm442_vm2, %v2183_v21  ;;  %v2471_v21 = vrot.slane %v8274_v45, 2 }
  0xcf   : > { %5031 = vmatprep.mubr.msk.bf16.mxu0 %vm442_vm2, %v5964_v24  ;;  %v952_v24 = vrot.slane %v5850_v5, 1 }
  0xd1   : > { %v6275_v23 = vsel %vm922_vm5, %v950_v52, %v952_v24 }
  0xd4   : > { %4852 = vmatmul.mubr.msk.bf16.gmra.mrb[20].mxu1 %vm442_vm2, %v6252_v50 }
  0xd5   : > { %4855 = vmatprep.mubr.msk.bf16.mxu1 %vm442_vm2, %v6255_v40 }
  0xd6   : > { %5032 = vmatmul.mubr.msk.bf16.vlgmr.msra.gmra.mrb[0].mxu0 %vm442_vm2, %v5971_v3  ;;  %v954_v3 = vrot.slane %v5877_v46, 1 }
  0xd7   : > { %5068 = vmatpush3.bf16.msra.mxu0 %v6129_v11  ;;  %5035 = vmatprep.mubr.msk.bf16.mxu0 %vm442_vm2, %v5989_v42  ;;  %v8267_v11 = vld [vmem:[#allocation2_spill] sm:$0xff] }
  0xd8   : > { %5069 = vmatprep.subr.bf16.mxu0 %v5521_v26  ;;  %v6290_v42 = vsel %vm922_vm5, %v952_v24, %v954_v3  ;;  %v6294_v54 = vsel %vm922_vm5, %v954_v3, %v6283_v56  ;;  %v2456_v27 = vrot.slane %v8267_v11, 3  ;;  %v8276_v24 = vld [vmem:[#allocation17_spill] sm:$0xff] }
  0xd9   : > { %v2475_v3 = vrot.slane %v8276_v24, 2 }
  0xdb   : > { %5070 = vmatpush3.bf16.msra.mxu0 %v5521_v26 }
  0xdc   : > { %4856 = vmatmul.mubr.msk.bf16.gmra.mrb[24].mxu1 %vm442_vm2, %v6272_v48 }
  0xdd   : > { %4859 = vmatprep.mubr.msk.bf16.mxu1 %vm442_vm2, %v6275_v23 }
  0xde   : > { %5036 = vmatmul.mubr.msk.bf16.gmra.mrb[4].mxu0 %vm442_vm2, %v5999_v51  ;;  %v2455_v51 = vrot.slane %v8266_v13, 2 }
  0xdf   : > { %5039 = vmatprep.mubr.msk.bf16.mxu0 %vm442_vm2, %v6013_v63  ;;  %v959_v63 = vsel %vm922_vm5, %v6283_v56, %v958_v53  ;;  %v2476_v53 = vrot.slane %v8277_v14, 3 }
  0xe0   : > { %v2457_v17 = vor.u32 %v2456_v27, %v2455_v51  ;;  %v8278_v51 = vld [vmem:[#allocation5_spill] sm:$0xff]  ;;  %v2480_v27 = vrot.slane %v5805_v35, 3 }
  0xe1   : > { %v2479_v11 = vrot.slane %v8278_v51, 2 }
  0xe2   : > { %v2458_v8 = vsel %vm2419_vm4, %v6053_v34, %v2457_v17  ;;  %v2462_v43 = vsel %vm2419_vm4, %v2457_v17, %v2461_v29  ;;  %v2468_v34 = vrot.slane %v8273_v41, 3 }
  0xe3   : > { %v2481_v28 = vor.u32 %v2480_v27, %v2479_v11  ;;  %v5527_v27 = vld [vmem:[%s5596_s27 + $0x28] sm:$0xff]  }
  0xe4   : > { %4860 = vmatmul.mubr.msk.bf16.gmra.mrb[28].mxu1 %vm442_vm2, %v6290_v42 }
  0xe5   : > { %4863 = vmatprep.mubr.msk.bf16.mxu1 %vm442_vm2, %v6294_v54 }
  0xe6   : > { %5040 = vmatmul.mubr.msk.bf16.gmra.mrb[8].mxu0 %vm442_vm2, %v6032_v20  ;;  %v8270_v20 = vld [vmem:[#allocation11_spill] sm:$0xff] }
  0xe7   : > { %5043 = vmatprep.mubr.msk.bf16.mxu0 %vm442_vm2, %v6046_v44  ;;  %v2463_v15 = vrot.slane %v8270_v20, 2  ;;  %v2464_v44 = vrot.slane %v8271_v16, 3 }
  0xe9   : > { %v2465_v38 = vor.u32 %v2464_v44, %v2463_v15 }
  0xeb   : > { %v2466_v59 = vsel %vm2419_vm4, %v2461_v29, %v2465_v38 }
  0xec   : > { %4864 = vmatmul.mubr.msk.bf16.gmra.mrb[32].mxu1 %vm442_vm2, %v959_v63  ;;  %v8279_v63 = vld [vmem:[#allocation14_spill] sm:$0xff] }
  0xed   : > { %4871 = vmatprep.mubr.msk.bf16.mxu1 %vm442_vm2, %v6161_v7  ;;  %v8272_v7 = vld [vmem:[#allocation12_spill] sm:$0xff]  ;;  %v1555_v17 = vshrl.u32 %v8279_v63, 16  ;;  %v1558_v61 = vshll.u32 %v8279_v63, 16 }
  0xee   : > { %5044 = vmatmul.mubr.msk.bf16.gmra.mrb[12].mxu0 %vm442_vm2, %v6062_v39  ;;  %v2467_v37 = vrot.slane %v8272_v7, 2  ;;  %v5522_v39 = vld [vmem:[%s8136_s1 + $0x40] sm:$0xff]  }
  0xef   : > { %5047 = vmatprep.mubr.msk.bf16.mxu0 %vm442_vm2, %v2458_v8  ;;  %v2488_v8 = vshrl.u32 %v5905_v4, 16  ;;  %v2483_v44 = vrot.slane %v1555_v17, 2  ;;  %v2484_v29 = vrot.slane %v1558_v61, 3 }
  0xf4   : > { %4872 = vmatmul.mubr.msk.bf16.vlgmr.msra.gmra.mrb[0].mxu1 %vm442_vm2, %v6164_v22  ;;  %v2472_v22 = vrot.slane %v8275_v32, 3 }
  0xf5   : > { %4875 = vmatprep.mubr.msk.bf16.mxu1 %vm442_vm2, %v6181_v57  ;;  %5109 = vmatpush3.bf16.msra.mxu1 %v5522_v39  ;;  %v2469_v57 = vor.u32 %v2468_v34, %v2467_v37  ;;  %v2497_v34 = vshrl.u32 %v6222_v12, 16 }
  0xf6   : > { %5108 = vmatprep.subr.bf16.mxu1 %v5523_v33  ;;  %5048 = vmatmul.mubr.msk.bf16.gmra.mrb[16].mxu0 %vm442_vm2, %v2462_v43  ;;  %v2473_v52 = vor.u32 %v2472_v22, %v2471_v21  ;;  %v2490_v43 = vrot.slane %v2488_v8, 2 }
  0xf7   : > { %5051 = vmatprep.mubr.msk.bf16.mxu0 %vm442_vm2, %v2466_v59  ;;  %v2470_v26 = vsel %vm2419_vm4, %v2465_v38, %v2469_v57  ;;  %v2500_v59 = vshll.u32 %v6222_v12, 16  ;;  %v2499_v21 = vrot.slane %v2497_v34, 2 }
  0xf8   : > { %v2474_v13 = vsel %vm2419_vm4, %v2469_v57, %v2473_v52 }
  0xf9   : > { %5110 = vmatpush3.bf16.msra.mxu1 %v5523_v33  ;;  %v2502_v22 = vrot.slane %v2500_v59, 3  ;;  %v8280_v59 = vld [vmem:[#allocation6_spill] sm:$0xff] }
  0xfb   : > { %v2503_v57 = vor.u32 %v2502_v22, %v2499_v21  ;;  %v1539_v21 = vrot.slane %v8273_v41, 2  ;;  %v1542_v41 = vrot.slane %v8274_v45, 1  ;;  %v2812_v45 = vrot.slane %v5839_v19, 3 }
  0xfc   : > { %4876 = vmatmul.mubr.msk.bf16.gmra.mrb[4].mxu1 %vm442_vm2, %v6184_v55  ;;  %v2477_v55 = vor.u32 %v2476_v53, %v2475_v3  ;;  %v5525_v3 = vld [vmem:[%s5596_s27 + $0x18] sm:$0xff]  }
  0xfd   : > { %4879 = vmatprep.mubr.msk.bf16.mxu1 %vm442_vm2, %v6198_v47  ;;  %v2491_v47 = vshll.u32 %v5905_v4, 16 }
  0xfe   : > { %5052 = vmatmul.mubr.msk.bf16.gmra.mrb[20].mxu0 %vm442_vm2, %v2470_v26  ;;  %v2478_v15 = vsel %vm2419_vm4, %v2473_v52, %v2477_v55  ;;  %v2482_v38 = vsel %vm2419_vm4, %v2477_v55, %v2481_v28  ;;  %v5524_v52 = vld [vmem:[%s5596_s27 + $0x10] sm:$0xff]   ;;  %v2794_v55 = vrot.slane %v5527_v27, 3  ;;  %v1560_v27 = vrot.slane %v1558_v61, 2 }
  0xff   : > { %5055 = vmatprep.mubr.msk.bf16.mxu0 %vm442_vm2, %v2474_v13  ;;  %v2493_v37 = vrot.slane %v2491_v47, 3  ;;  %v2789_v26 = vrot.slane %v5524_v52, 3  ;;  %v5526_v13 = vld [vmem:[%s5596_s27 + $0x20] sm:$0xff]   ;;  %v5529_v47 = vld [vmem:[%s5596_s27 + $0x38] sm:$0xff]  }
 0x100   : > { %v2792_v11 = vrot.slane %v5526_v13, 3 }
 0x101   : > { %v2494_v39 = vor.u32 %v2493_v37, %v2490_v43  ;;  %v1530_v43 = vrot.slane %v8268_v58, 1  ;;  %v1531_v37 = vrot.slane %v8269_v6, 2  ;;  %v2806_v58 = vrot.slane %v5759_v49, 3 }
 0x102   : > { %v1535_v6 = vrot.slane %v8271_v16, 2 }
 0x103   : > { %v1532_v34 = vor.u32 %v1531_v37, %v1530_v43 }
 0x104   : > { %4880 = vmatmul.mubr.msk.bf16.gmra.mrb[8].mxu1 %vm442_vm2, %v6201_v0  ;;  %v2485_v0 = vor.u32 %v2484_v29, %v2483_v44  ;;  %v1247_v44 = vrot.slane %v8279_v63, 1  ;;  %v2800_v29 = vrot.slane %v5690_v60, 3  ;;  %v1249_v60 = vrot.slane %v6092_v31, 1 }
 0x105   : > { %4883 = vmatprep.mubr.msk.bf16.mxu1 %vm442_vm2, %v6214_v62 }
 0x106   : > { %5056 = vmatmul.mubr.msk.bf16.gmra.mrb[24].mxu0 %vm442_vm2, %v2478_v15  ;;  %v2486_v62 = vsel %vm2419_vm4, %v2481_v28, %v2485_v0  ;;  %v2495_v33 = vsel %vm2419_vm4, %v2485_v0, %v2494_v39  ;;  %v5528_v28 = vld [vmem:[%s5596_s27 + $0x30] sm:$0xff]   ;;  %v2798_v15 = vrot.slane %v5529_v47, 3 }
 0x107   : > { %5059 = vmatprep.mubr.msk.bf16.mxu0 %vm442_vm2, %v2482_v38  ;;  %v2796_v8 = vrot.slane %v5528_v28, 3  ;;  %v2802_v38 = vrot.slane %v5705_v9, 3  ;;  %v2804_v9 = vrot.slane %v5728_v25, 3 }
 0x109   : > { %v2803_v0 = vsel %vm2788_vm6, %v2800_v29, %v2802_v38  ;;  %v2805_v22 = vsel %vm2788_vm6, %v2802_v38, %v2804_v9  ;;  %v2807_v25 = vsel %vm2788_vm6, %v2804_v9, %v2806_v58  ;;  %v2824_v38 = vrot.slane %v6222_v12, 3 }
 0x10c   : > { %4884 = vmatmul.mubr.msk.bf16.gmra.mrb[12].mxu1 %vm442_vm2, %v6217_v1  ;;  %v2790_v1 = vrot.slane %v5525_v3, 3  ;;  %v1547_v3 = vrot.slane %v8277_v14, 2  ;;  %v1550_v14 = vrot.slane %v8278_v51, 1  ;;  %v1564_v51 = vshrl.u32 %v6092_v31, 16 }
 0x10d   : > { %4887 = vmatprep.mubr.msk.bf16.mxu1 %vm442_vm2, %v6234_v2  ;;  %v2504_v2 = vsel %vm2419_vm4, %v2494_v39, %v2503_v57  ;;  %v1533_v39 = vsel %vm1486_vm1, %v8280_v59, %v1532_v34  ;;  %v1543_v57 = vrot.slane %v8275_v32, 2 }
 0x10e   : > { %5060 = vmatmul.mubr.msk.bf16.gmra.mrb[28].mxu0 %vm442_vm2, %v2486_v62  ;;  %v2791_v53 = vsel %vm2788_vm6, %v2789_v26, %v2790_v1  ;;  %v1538_v62 = vrot.slane %v8272_v7, 1  ;;  %v2810_v7 = vrot.slane %v5800_v30, 3  ;;  %v1546_v26 = vrot.slane %v8276_v24, 1 }
 0x10f   : > { %5063 = vmatprep.mubr.msk.bf16.mxu0 %vm442_vm2, %v2495_v33  ;;  %v2814_v24 = vrot.slane %v5850_v5, 3  ;;  %v1566_v28 = vrot.slane %v1564_v51, 1 }
 0x110   : > { %v1540_v33 = vor.u32 %v1539_v21, %v1538_v62  ;;  %v1548_v30 = vor.u32 %v1547_v3, %v1546_v26  ;;  %v2813_v19 = vsel %vm2788_vm6, %v2810_v7, %v2812_v45 }
 0x111   : > { %v2815_v5 = vsel %vm2788_vm6, %v2812_v45, %v2814_v24 }
 0x114   : > { %4888 = vmatmul.mubr.msk.bf16.gmra.mrb[16].mxu1 %vm442_vm2, %v6237_v36  ;;  %v2793_v36 = vsel %vm2788_vm6, %v2790_v1, %v2792_v11 }
 0x115   : > { %4891 = vmatprep.mubr.msk.bf16.mxu1 %vm442_vm2, %v6252_v50  ;;  %v2795_v50 = vsel %vm2788_vm6, %v2792_v11, %v2794_v55  ;;  %v1557_v11 = vrot.slane %v1555_v17, 1  ;;  %v2816_v17 = vrot.slane %v5877_v46, 3  ;;  %v2820_v46 = vrot.slane %v8279_v63, 3 }
 0x116   : > { %5064 = vmatmul.mubr.msk.bf16.gmra.mrb[32].mxu0 %vm442_vm2, %v2504_v2  ;;  %v1544_v2 = vor.u32 %v1543_v57, %v1542_v41  ;;  %v3184_v63 = vlaneseq }
 0x117   : > { %5071 = vmatprep.mubr.msk.bf16.mxu0 %vm442_vm2, %v2791_v53  ;;  %v1551_v53 = vrot.slane %v5805_v35, 2  ;;  %v1567_v35 = vshll.u32 %v6092_v31, 16 }
 0x118   : > { %v1545_v32 = vsel %vm1486_vm1, %v1540_v33, %v1544_v2  ;;  %v1549_v13 = vsel %vm1486_vm1, %v1544_v2, %v1548_v30  ;;  %v6490_v43 = vshrl.u32 %v3184_v63, 7 }
 0x11a   : > { %v3186_v12 = vadd.s32 8, %v6490_v43  ;;  %v6512_v21 = vadd.s32 32, %v6490_v43  ;;  %v6526_v41 = vadd.s32 80, %v6490_v43  ;;  %v6535_v3 = vadd.s32 64, %v6490_v43 }
 0x11c   : > { %4892 = vmatmul.mubr.msk.bf16.gmra.mrb[20].mxu1 %vm442_vm2, %v6255_v40  ;;  %v2797_v40 = vsel %vm2788_vm6, %v2794_v55, %v2796_v8  ;;  %v1552_v55 = vor.u32 %v1551_v53, %v1550_v14  ;;  %v6552_v14 = vmul.u32.u64.low 3817748708, %v6526_v41  ;;  %v6553_v53 = vmul.u32.u64.high 3817748708, %v6526_v41, %v6552_v14 }
 0x11d   : > { %4895 = vmatprep.mubr.msk.bf16.mxu1 %vm442_vm2, %v6272_v48  ;;  %v2799_v48 = vsel %vm2788_vm6, %v2796_v8, %v2798_v15  ;;  %v1569_v8 = vrot.slane %v1567_v35, 2  ;;  %v8296_v14 = vmov 0 }
 0x11e   : > { %5072 = vmatmul.mubr.msk.bf16.vlgmr.msra.gmra.mrb[0].mxu0 %vm442_vm2, %v2793_v36  ;;  %v1561_v36 = vor.u32 %v1560_v27, %v1557_v11  ;;  %v1553_v61 = vsel %vm1486_vm1, %v1548_v30, %v1552_v55  ;;  %v6557_v11 = vmul.u32.u64.low 3817748708, %v6535_v3  ;;  %v6558_v27 = vmul.u32.u64.high 3817748708, %v6535_v3, %v6557_v11 }
 0x11f   : > { %5075 = vmatprep.mubr.msk.bf16.mxu0 %vm442_vm2, %v2795_v50  ;;  %v2818_v50 = vrot.slane %v5785_v10, 3 }
 0x120   : > { %v1562_v47 = vsel %vm1486_vm1, %v1552_v55, %v1561_v36 }
 0x121   : > { %v2819_v31 = vsel %vm2788_vm6, %v2816_v17, %v2818_v50 }
 0x124   : > { %4896 = vmatmul.mubr.msk.bf16.gmra.mrb[24].mxu1 %vm442_vm2, %v6275_v23  ;;  %v1248_v23 = vsel %vm922_vm5, %v6283_v56, %v1247_v44  ;;  %v1250_v56 = vsel %vm922_vm5, %v1247_v44, %v1249_v60  ;;  %v2821_v44 = vsel %vm2788_vm6, %v2818_v50, %v2820_v46 }
 0x125   : > { %4899 = vmatprep.mubr.msk.bf16.mxu1 %vm442_vm2, %v6290_v42  ;;  %v2801_v42 = vsel %vm2788_vm6, %v2798_v15, %v2800_v29  ;;  %v2817_v15 = vsel %vm2788_vm6, %v2814_v24, %v2816_v17 }
 0x126   : > { %5076 = vmatmul.mubr.msk.bf16.gmra.mrb[4].mxu0 %vm442_vm2, %v2797_v40  ;;  %v1570_v40 = vor.u32 %v1569_v8, %v1566_v28  ;;  %v7331_v8 = vadd.s32 256, %v6490_v43 }
 0x127   : > { %5079 = vmatprep.mubr.msk.bf16.mxu0 %vm442_vm2, %v2799_v48  ;;  %v2822_v48 = vrot.slane %v5905_v4, 3  ;;  %v3187_v4 = vadd.s32 16, %v6490_v43 }
 0x128   : > { %v1571_v10 = vsel %vm1486_vm1, %v1561_v36, %v1570_v40  ;;  %v6903_v40 = vadd.s32 168, %v6490_v43  ;;  %v8418_v36 = vmov 0 }
 0x129   : > { %v2823_v29 = vsel %vm2788_vm6, %v2820_v46, %v2822_v48 }
 0x12c   : > { %4900 = vmatmul.mubr.msk.bf16.gmra.mrb[28].mxu1 %vm442_vm2, %v6294_v54  ;;  %v1534_v54 = vrot.slane %v8270_v20, 1  ;;  %v2808_v20 = vrot.slane %v5789_v18, 3 }
 0x12d   : > { %4903 = vmatprep.mubr.msk.bf16.mxu1 %vm442_vm2, %v1248_v23  ;;  %v2825_v23 = vsel %vm2788_vm6, %v2822_v48, %v2824_v38  ;;  %v3337_v48 = vshrl.u32 %v6553_v53, 4 }
 0x12e   : > { %5080 = vmatmul.mubr.msk.bf16.gmra.mrb[8].mxu0 %vm442_vm2, %v2801_v42  ;;  %v1536_v49 = vor.u32 %v1535_v6, %v1534_v54  ;;  %v2809_v1 = vsel %vm2788_vm6, %v2806_v58, %v2808_v20  ;;  %v2811_v18 = vsel %vm2788_vm6, %v2808_v20, %v2810_v7  ;;  %v6519_v20 = vadd.s32 56, %v6490_v43 }
 0x12f   : > { %5083 = vmatprep.mubr.msk.bf16.mxu0 %vm442_vm2, %v2803_v0  ;;  %v6493_v37 = vmul.u32.u64.low 3817748708, %v3187_v4  ;;  %v6494_v42 = vmul.u32.u64.high 3817748708, %v3187_v4, %v6493_v37  ;;  %v3188_v0 = vadd.s32 24, %v6490_v43  ;;  %v6523_v7 = vadd.s32 40, %v6490_v43 }
 0x130   : > { %v1537_v16 = vsel %vm1486_vm1, %v1532_v34, %v1536_v49  ;;  %v1541_v52 = vsel %vm1486_vm1, %v1536_v49, %v1540_v33  ;;  %v6498_v60 = vmul.u32.u64.low 3817748708, %v6490_v43  ;;  %v6499_v34 = vmul.u32.u64.high 3817748708, %v6490_v43, %v6498_v60 }
 0x131   : > { %v6505_v58 = vmul.u32.u64.low 3817748708, %v3186_v12  ;;  %v6506_v54 = vmul.u32.u64.high 3817748708, %v3186_v12, %v6505_v58  ;;  %v3249_v6 = vshrl.u32 %v6494_v42, 4  ;;  %v6623_v42 = vadd.s32 96, %v6490_v43 }
 0x132   : > { %v3227_v59 = vshrl.u32 %v6499_v34, 4  ;;  %v6544_v30 = vmul.u32.u64.low 3817748708, %v6519_v20  ;;  %v6545_v45 = vmul.u32.u64.high 3817748708, %v6519_v20, %v6544_v30  ;;  %v6633_v58 = vadd.s32 120, %v6490_v43 }
 0x133   : > { %v3250_v62 = vmul.u32 18, %v3249_v6 }
 0x134   : > { %4904 = vmatmul.mubr.msk.bf16.gmra.mrb[32].mxu1 %vm442_vm2, %v1250_v56  ;;  %v6502_v9 = vmul.u32.u64.low 3817748708, %v3188_v0  ;;  %v6503_v56 = vmul.u32.u64.high 3817748708, %v3188_v0, %v6502_v9 }
 0x135   : > { %4931 = vmatprep.mubr.msk.bf16.mxu1 %vm442_vm2, %v1533_v39  ;;  %v3191_v39 = vadd.s32 48, %v6490_v43  ;;  %v6528_v57 = vsub.s32 %v3187_v4, %v3250_v62  ;;  %v8285_v4 = vmov 0 }
 0x136   : > { %5084 = vmatmul.mubr.msk.bf16.gmra.mrb[12].mxu0 %vm442_vm2, %v2805_v22  ;;  %v3260_v22 = vshrl.u32 %v6503_v56, 4  ;;  %v3338_v56 = vmul.u32 18, %v3337_v48 }
 0x137   : > { %5087 = vmatprep.mubr.msk.bf16.mxu0 %vm442_vm2, %v2807_v25  ;;  %v3228_v25 = vmul.u32 18, %v3227_v59  ;;  %v6515_v49 = vmul.u32.u64.low 3817748708, %v3191_v39  ;;  %v6516_v33 = vmul.u32.u64.high 3817748708, %v3191_v39, %v6515_v49  ;;  %vm3619_vm7 = vcmp.ne.s32.totalorder %v6528_v57, 0 }
 0x138   : > { %vm3655_vm8 = vcmp.lt.s32.totalorder %v6528_v57, 0  ;;  %v6569_v35 = vadd.s32 18, %v6528_v57  ;;  %v6650_v49 = vadd.s32 104, %v6490_v43 }
 0x139   : > { %v6541_v2 = vsub.s32 %v6490_v43, %v3228_v25  ;;  %v3293_v51 = vshrl.u32 %v6516_v33, 4  ;;  %vm6573_vm11 = vmand %vm3655_vm8, %vm3619_vm7 }
 0x13b   : > { %vm3617_vm9 = vcmp.ne.s32.totalorder %v6541_v2, 0  ;;  %vm3653_vm10 = vcmp.lt.s32.totalorder %v6541_v2, 0  ;;  %v6582_v50 = vadd.s32 18, %v6541_v2 }
 0x13c   : > { %4932 = vmatmul.mubr.msk.bf16.vlgmr.msra.gmra.mrb[20].mxu1 %vm442_vm2, %v1537_v16  ;;  %v3238_v16 = vshrl.u32 %v6506_v54, 4  ;;  %vm6587_vm13 = vmand %vm3653_vm10, %vm3617_vm9 }
 0x13d   : > { %4935 = vmatprep.mubr.msk.bf16.mxu1 %vm442_vm2, %v1541_v52  ;;  %v6531_v52 = vmul.u32.u64.low 3817748708, %v6512_v21  ;;  %v6532_v26 = vmul.u32.u64.high 3817748708, %v6512_v21, %v6531_v52 }
 0x13e   : > { %5088 = vmatmul.mubr.msk.bf16.gmra.mrb[16].mxu0 %vm442_vm2, %v2809_v1  ;;  %v3261_v1 = vmul.u32 18, %v3260_v22  ;;  %v6646_v22 = vmul.u32.u64.low 3817748708, %v6623_v42  ;;  %v6647_v25 = vmul.u32.u64.high 3817748708, %v6623_v42, %v6646_v22  ;;  %v6664_v52 = vsub.s32 %v6526_v41, %v3338_v56 }
 0x13f   : > { %5091 = vmatprep.mubr.msk.bf16.mxu0 %vm442_vm2, %v2811_v18  ;;  %v6538_v18 = vadd.s32 88, %v6490_v43  ;;  %v3271_v17 = vshrl.u32 %v6532_v26, 4 }
 0x140   : > { %8291 = vst [vmem:[#allocation7_spill] sm:$0xff] %v6664_v52 }
 0x144   : > { %4936 = vmatmul.mubr.msk.bf16.gmra.mrb[24].mxu1 %vm442_vm2, %v1545_v32  ;;  %v6548_v32 = vmul.u32.u64.low 3817748708, %v6523_v7  ;;  %v6549_v24 = vmul.u32.u64.high 3817748708, %v6523_v7, %v6548_v32 }
 0x145   : > { %4939 = vmatprep.mubr.msk.bf16.mxu1 %vm442_vm2, %v1549_v13  ;;  %v3239_v13 = vmul.u32 18, %v3238_v16  ;;  %v6684_v32 = vadd.s32 144, %v6490_v43 }
 0x146   : > { %5092 = vmatmul.mubr.msk.bf16.gmra.mrb[20].mxu0 %vm442_vm2, %v2813_v19  ;;  %v6561_v19 = vsub.s32 %v3188_v0, %v3261_v1  ;;  %v6667_v26 = vmul.u32.u64.low 3817748708, %v6633_v58  ;;  %v6668_v1 = vmul.u32.u64.high 3817748708, %v6633_v58, %v6667_v26 }
 0x147   : > { %5095 = vmatprep.mubr.msk.bf16.mxu0 %vm442_vm2, %v2815_v5  ;;  %v6564_v5 = vmul.u32.u64.low 3817748708, %v6538_v18  ;;  %v6565_v55 = vmul.u32.u64.high 3817748708, %v6538_v18, %v6564_v5  ;;  %v6585_v28 = vsub.s32 %v3186_v12, %v3239_v13  ;;  %v8299_v13 = vmov 0 }
 0x148   : > { %vm3620_vm12 = vcmp.ne.s32.totalorder %v6561_v19, 0  ;;  %vm3656_vm14 = vcmp.lt.s32.totalorder %v6561_v19, 0  ;;  %v6601_v46 = vadd.s32 18, %v6561_v19  ;;  %v3359_v5 = vshrl.u32 %v6647_v25, 4 }
 0x149   : > { %vm6616_vm15 = vmand %vm3656_vm14, %vm3620_vm12  ;;  %vm3618_vm0 = vcmp.ne.s32.totalorder %v6585_v28, 0  ;;  %v3348_v37 = vshrl.u32 %v6565_v55, 4  ;;  %vm3654_vm1 = vcmp.lt.s32.totalorder %v6585_v28, 0  ;;  %v6640_v6 = vadd.s32 18, %v6585_v28 }
 0x14a   : > { %v8286_v4 = vsel %vm6616_vm15, 4294967295, %v8285_v4  ;;  %vm6690_vm6 = vmand %vm3654_vm1, %vm3618_vm0  ;;  %vm3663_vm1 = vcmp.lt.s32.totalorder %v6664_v52, 0 }
 0x14b   : > { %v3349_v62 = vmul.u32 18, %v3348_v37 }
 0x14c   : > { %4940 = vmatmul.mubr.msk.bf16.gmra.mrb[28].mxu1 %vm442_vm2, %v1553_v61  ;;  %v6579_v61 = vadd.s32 72, %v6490_v43 }
 0x14d   : > { %4943 = vmatprep.mubr.msk.bf16.mxu1 %vm442_vm2, %v1562_v47  ;;  %v3294_v47 = vmul.u32 18, %v3293_v51  ;;  %v6734_v55 = vmul.u32.u64.low 3817748708, %v6684_v32  ;;  %v6735_v51 = vmul.u32.u64.high 3817748708, %v6684_v32, %v6734_v55 }
 0x14e   : > { %5096 = vmatmul.mubr.msk.bf16.gmra.mrb[24].mxu0 %vm442_vm2, %v2817_v15  ;;  %v3304_v15 = vshrl.u32 %v6545_v45, 4  ;;  %v6677_v45 = vsub.s32 %v6538_v18, %v3349_v62  ;;  %v6698_v18 = vadd.s32 128, %v6490_v43  ;;  %v3360_v62 = vmul.u32 18, %v3359_v5 }
 0x14f   : > { %5099 = vmatprep.mubr.msk.bf16.mxu0 %vm442_vm2, %v2819_v31  ;;  %v6594_v31 = vadd.s32 112, %v6490_v43  ;;  %v6625_v0 = vsub.s32 %v3191_v39, %v3294_v47 }
 0x150   : > { %v3305_v60 = vmul.u32 18, %v3304_v15  ;;  %8293 = vst [vmem:[#allocation9_spill] sm:$0xff] %v6677_v45  ;;  %vm3628_vm14 = vcmp.ne.s32.totalorder %v6677_v45, 0  ;;  %v6854_v55 = vsub.s32 %v6623_v42, %v3360_v62  ;;  %v6868_v62 = vadd.s32 176, %v6490_v43 }
 0x151   : > { %8287 = vst [vmem:[#allocation4_spill] sm:$0xff] %v6625_v0  ;;  %v6628_v34 = vmul.u32.u64.low 3817748708, %v6594_v31  ;;  %v6629_v12 = vmul.u32.u64.high 3817748708, %v6594_v31, %v6628_v34  ;;  %vm3659_vm3 = vcmp.lt.s32.totalorder %v6625_v0, 0  ;;  %v6655_v33 = vadd.s32 18, %v6625_v0 }
 0x152   : > { %v6658_v16 = vsub.s32 %v6519_v20, %v3305_v60  ;;  %v8315_v60 = vmov 0  ;;  %8323 = vst [vmem:[#allocation21_spill] sm:$0xff] %v6854_v55 }
 0x154   : > { %4944 = vmatmul.mubr.msk.bf16.gmra.mrb[32].mxu1 %vm442_vm2, %v1571_v10  ;;  %v3282_v10 = vshrl.u32 %v6549_v24, 4  ;;  %8289 = vst [vmem:[#allocation2_spill] sm:$0xff] %v6658_v16  ;;  %v8294_v24 = vmov 0  ;;  %vm3624_vm7 = vcmp.ne.s32.totalorder %v6658_v16, 0  ;;  %vm3660_vm8 = vcmp.lt.s32.totalorder %v6658_v16, 0 }
 0x155   : > { %v8295_v24 = vsel %vm6690_vm6, 4294967295, %v8294_v24  ;;  %vm6727_vm15 = vmand %vm3660_vm8, %vm3624_vm7  ;;  %v6747_v48 = vadd.s32 18, %v6658_v16  ;;  %vm8310_vm7 = vcmp.ne.s32.totalorder %v6664_v52, 0 }
 0x156   : > { %5100 = vmatmul.mubr.msk.bf16.gmra.mrb[28].mxu0 %vm442_vm2, %v2821_v44  ;;  %v3272_v44 = vmul.u32 18, %v3271_v17  ;;  %v3283_v9 = vmul.u32 18, %v3282_v10  ;;  %v8305_v17 = vmov 0  ;;  %vm6756_vm8 = vmand %vm3663_vm1, %vm8310_vm7  ;;  %vm4219_vm7 = vcmask 256000  }
 0x157   : > { %5103 = vmatprep.mubr.msk.bf16.mxu0 %vm442_vm2, %v2823_v29  ;;  %v3315_v29 = vshrl.u32 %v6558_v27, 4  ;;  %v8302_v27 = vmov 0  ;;  %v6743_v15 = vmul.u32.u64.low 3817748708, %v6698_v18  ;;  %v6744_v10 = vmul.u32.u64.high 3817748708, %v6698_v18, %v6743_v15  ;;  %8308 = vst [vmem:[#allocation17_spill] sm:$0xff] %v6747_v48 }
 0x158   : > { %v6643_v59 = vsub.s32 %v6512_v21, %v3272_v44  ;;  %v6661_v21 = vsub.s32 %v6523_v7, %v3283_v9  ;;  %v6680_v7 = vmul.u32.u64.low 3817748708, %v6650_v49  ;;  %v6681_v41 = vmul.u32.u64.high 3817748708, %v6650_v49, %v6680_v7 }
 0x159   : > { %v3316_v39 = vmul.u32 18, %v3315_v29  ;;  %v8303_v27 = vsel %vm6727_vm15, 4294967295, %v8302_v27  ;;  %v8311_v29 = vmov 0  ;;  %v3403_v25 = vshrl.u32 %v6744_v10, 4 }
 0x15a   : > { %8288 = vst [vmem:[#allocation3_spill] sm:$0xff] %v6643_v59  ;;  %8290 = vst [vmem:[#allocation8_spill] sm:$0xff] %v6661_v21  ;;  %vm3621_vm4 = vcmp.ne.s32.totalorder %v6643_v59, 0  ;;  %vm3657_vm5 = vcmp.lt.s32.totalorder %v6643_v59, 0  ;;  %v6709_v53 = vadd.s32 18, %v6643_v59  ;;  %vm3622_vm10 = vcmp.ne.s32.totalorder %v6661_v21, 0 }
 0x15b   : > { %v6673_v30 = vsub.s32 %v6535_v3, %v3316_v39  ;;  %v3381_v3 = vshrl.u32 %v6629_v12, 4  ;;  %vm3658_vm12 = vcmp.lt.s32.totalorder %v6661_v21, 0  ;;  %vm6718_vm0 = vmand %vm3657_vm5, %vm3621_vm4  ;;  %8304 = vst [vmem:[#allocation16_spill] sm:$0xff] %v8303_v27  ;;  %vm3664_vm5 = vcmp.lt.s32.totalorder %v6677_v45, 0 }
 0x15c   : > { %8298 = vst [vmem:[#allocation12_spill] sm:$0xff] %v6709_v53  ;;  %v8300_v13 = vsel %vm6718_vm0, 4294967295, %v8299_v13  ;;  %vm6737_vm4 = vmand %vm3658_vm12, %vm3622_vm10  ;;  %v6750_v44 = vadd.s32 18, %v6661_v21  ;;  %v8312_v29 = vsel %vm6756_vm8, 4294967295, %v8311_v29  ;;  %v6780_v12 = vadd.s32 18, %v6677_v45 }
 0x15d   : > { %8292 = vst [vmem:[#allocation11_spill] sm:$0xff] %v6673_v30  ;;  %8301 = vst [vmem:[#allocation10_spill] sm:$0xff] %v8300_v13  ;;  %v8306_v17 = vsel %vm6737_vm4, 4294967295, %v8305_v17  ;;  %v3382_v47 = vmul.u32 18, %v3381_v3  ;;  %v6777_v34 = vadd.s32 18, %v6673_v30  ;;  %vm8179_vm12 = vcmask 257024  }
 0x15e   : > { %5104 = vmatmul.mubr.msk.bf16.gmra.mrb[32].mxu0 %vm442_vm2, %v2825_v23  ;;  %v6607_v38 = vmul.u32.u64.low 3817748708, %v6579_v61  ;;  %v6608_v23 = vmul.u32.u64.high 3817748708, %v6579_v61, %v6607_v38  ;;  %vm3623_vm2 = vcmp.ne.s32.totalorder %v6625_v0, 0  ;;  %8307 = vst [vmem:[#allocation13_spill] sm:$0xff] %v8306_v17  ;;  %8309 = vst [vmem:[#allocation15_spill] sm:$0xff] %v6750_v44  ;;  %v8320_v39 = vmov 0 }
 0x15f   : > { %vm6704_vm9 = vmand %vm3659_vm3, %vm3623_vm2  ;;  %vm3625_vm2 = vcmp.ne.s32.totalorder %v6673_v30, 0  ;;  %vm3661_vm3 = vcmp.lt.s32.totalorder %v6673_v30, 0  ;;  %8313 = vst [vmem:[#allocation5_spill] sm:$0xff] %v8312_v29  ;;  %v6761_v38 = vadd.s32 18, %v6664_v52  ;;  %v3370_v22 = vshrl.u32 %v6681_v41, 4 }
 0x160   : > { %v3326_v20 = vshrl.u32 %v6608_v23, 4  ;;  %v8297_v14 = vsel %vm6704_vm9, 4294967295, %v8296_v14  ;;  %v3392_v23 = vshrl.u32 %v6668_v1, 4  ;;  %vm6772_vm10 = vmand %vm3661_vm3, %vm3625_vm2  ;;  %8318 = vst [vmem:[#allocation18_spill] sm:$0xff] %v6777_v34  ;;  %v6812_v26 = vsub.s32 %v6594_v31, %v3382_v47 }
 0x161   : > { %8314 = vst [vmem:[#allocation14_spill] sm:$0xff] %v6761_v38  ;;  %v8316_v60 = vsel %vm6772_vm10, 4294967295, %v8315_v60  ;;  %8319 = vst [vmem:[#allocation19_spill] sm:$0xff] %v6780_v12  ;;  %v6815_v1 = vadd.s32 152, %v6490_v43  ;;  %v3371_v41 = vmul.u32 18, %v3370_v22  ;;  %v3425_v47 = vshrl.u32 %v6735_v51, 4 }
 0x162   : > { %v3327_v11 = vmul.u32 18, %v3326_v20  ;;  %8317 = vst [vmem:[#allocation6_spill] sm:$0xff] %v8316_v60  ;;  %vm6793_vm1 = vmand %vm3664_vm5, %vm3628_vm14  ;;  %v3393_v3 = vmul.u32 18, %v3392_v23  ;;  %v6847_v23 = vadd.s32 136, %v6490_v43  ;;  %v6882_v54 = vadd.s32 18, %v6812_v26 }
 0x163   : > { %v8321_v39 = vsel %vm6793_vm1, 4294967295, %v8320_v39  ;;  %v6860_v56 = vmul.u32.u64.low 3817748708, %v6815_v1  ;;  %v6861_v37 = vmul.u32.u64.high 3817748708, %v6815_v1, %v6860_v56  ;;  %v3426_v63 = vmul.u32 18, %v3425_v47 }
 0x164   : > { %v6783_v9 = vsub.s32 %v6579_v61, %v3327_v11  ;;  %8322 = vst [vmem:[#allocation20_spill] sm:$0xff] %v8321_v39  ;;  %v5538_v11 = vmov 0.0|0.0   ;;  %v6865_v42 = vsub.s32 %v6633_v58, %v3393_v3  ;;  %v6879_v56 = vadd.s32 160, %v6490_v43 }
 0x165   : > { %4216 = vst.msk [vmem:[%s6803_s9 + $0x9c] sm:$0xf] %vm8179_vm12, %v5538_v11  ;;  %v4487_v7 = vcombine.low %v5538_v11, %v5538_v11  ;;  %v4488_v51 = vcombine.high %v5538_v11, %v5538_v11  ;;  %v6875_v10 = vmul.u32.u64.low 3817748708, %v6847_v23  ;;  %v6876_v22 = vmul.u32.u64.high 3817748708, %v6847_v23, %v6875_v10 }
 0x166   : > { %v6844_v15 = vadd.s32 18, %v6783_v9  ;;  %vm3626_vm14 = vcmp.ne.s32.totalorder %v6783_v9, 0  ;;  %vm3662_vm2 = vcmp.lt.s32.totalorder %v6783_v9, 0  ;;  %8324 = vst [vmem:[#allocation22_spill] sm:$0xff] %v6865_v42  ;;  %v6887_v58 = vadd.s32 184, %v6490_v43 }
 0x167   : > { %4177 = vst.msk [vmem:[%s6803_s9] sm:$0xf] %vm8179_vm12, %v4487_v7  ;;  %4217 = vst.msk [vmem:[%s6803_s9 + $0xa0] sm:$0xf] %vm8179_vm12, %v4487_v7  ;;  %v6897_v11 = vadd.s32 18, %v6854_v55  ;;  %v6900_v10 = vsub.s32 %v6650_v49, %v3371_v41  ;;  %v3404_v12 = vmul.u32 18, %v3403_v25  ;;  %v6935_v52 = vsub.s32 %v6684_v32, %v3426_v63 }
 0x168   : > { %4178 = vst.msk [vmem:[%s6803_s9 + $0x4] sm:$0xf] %vm8179_vm12, %v4488_v51  ;;  %4218 = vst.msk [vmem:[%s6803_s9 + $0xa4] sm:$0xf] %vm8179_vm12, %v4488_v51  ;;  %v6916_v49 = vmul.u32.u64.low 3817748708, %v6879_v56  ;;  %v6917_v41 = vmul.u32.u64.high 3817748708, %v6879_v56, %v6916_v49 }
 0x169   : > { %4220 = vst.msk [vmem:[%s6803_s9 + $0xa8] sm:$0x7] %vm4219_vm7, %v4487_v7  ;;  %8326 = vst [vmem:[#allocation24_spill] sm:$0xff] %v6897_v11  ;;  %v6909_v51 = vmul.u32.u64.low 3817748708, %v6868_v62  ;;  %v6910_v7 = vmul.u32.u64.high 3817748708, %v6868_v62, %v6909_v51  ;;  %v6920_v47 = vadd.s32 208, %v6490_v43 }
 0x16a   : > { %8327 = vst [vmem:[#allocation25_spill] sm:$0xff] %v6900_v10  ;;  %v6925_v34 = vmul.u32.u64.low 3817748708, %v6887_v58  ;;  %v6926_v25 = vmul.u32.u64.high 3817748708, %v6887_v58, %v6925_v34  ;;  %v6929_v60 = vadd.s32 192, %v6490_v43  ;;  %v6932_v51 = vadd.s32 216, %v6490_v43  ;;  %8331 = vst [vmem:[#allocation29_spill] sm:$0xff] %v6935_v52 }
 0x16b   : > { %v3436_v49 = vshrl.u32 %v6861_v37, 4  ;;  %v6939_v38 = vmul.u32.u64.low 3817748708, %v6903_v40  ;;  %v6940_v29 = vmul.u32.u64.high 3817748708, %v6903_v40, %v6939_v38  ;;  %v6947_v34 = vsub.s32 %v6698_v18, %v3404_v12  ;;  %vm6956_vm7 = vmand %vm3662_vm2, %vm3626_vm14 }
 0x16c   : > { %v8334_v63 = vmov 0  ;;  %v3414_v32 = vshrl.u32 %v6876_v22, 4  ;;  %v6963_v38 = vmul.u32.u64.low 3817748708, %v6920_v47  ;;  %v6964_v37 = vmul.u32.u64.high 3817748708, %v6920_v47, %v6963_v38 }
 0x16d   : > { %8333 = vst [vmem:[#allocation31_spill] sm:$0xff] %v6947_v34  ;;  %v8335_v63 = vsel %vm6956_vm7, 4294967295, %v8334_v63  ;;  %vm8336_vm12 = vcmp.ne.s32.totalorder %v6812_v26, 0  ;;  %vm8337_vm5 = vcmp.lt.s32.totalorder %v6812_v26, 0  ;;  %v8338_v18 = vmov 0 }
 0x16e   : > { %vm6970_vm1 = vmand %vm8337_vm5, %vm8336_vm12  ;;  %vm8341_vm14 = vcmp.ne.s32.totalorder %v6854_v55, 0  ;;  %vm8342_vm2 = vcmp.lt.s32.totalorder %v6854_v55, 0  ;;  %v8343_v38 = vmov 0  ;;  %v6993_v44 = vadd.s32 18, %v6900_v10 }
 0x16f   : > { %v8339_v18 = vsel %vm6970_vm1, 4294967295, %v8338_v18  ;;  %vm6988_vm3 = vmand %vm8342_vm2, %vm8341_vm14  ;;  %vm8347_vm10 = vcmp.ne.s32.totalorder %v6865_v42, 0  ;;  %vm8348_vm8 = vcmp.lt.s32.totalorder %v6865_v42, 0  ;;  %vm3633_vm14 = vcmp.ne.s32.totalorder %v6947_v34, 0 }
 0x170   : > { %v8344_v38 = vsel %vm6988_vm3, 4294967295, %v8343_v38  ;;  %8345 = vst [vmem:[#allocation33_spill] sm:$0xff] %v6993_v44  ;;  %vm7003_vm4 = vmand %vm8348_vm8, %vm8347_vm10  ;;  %v7013_v48 = vadd.s32 240, %v6490_v43  ;;  %vm8353_vm2 = vcmp.ne.s32.totalorder %v6900_v10, 0  ;;  %vm8354_vm5 = vcmp.lt.s32.totalorder %v6900_v10, 0 }
 0x171   : > { %vm7021_vm12 = vmand %vm8354_vm5, %vm8353_vm2  ;;  %vm3669_vm8 = vcmp.lt.s32.totalorder %v6947_v34, 0  ;;  %v3415_v27 = vmul.u32 18, %v3414_v32  ;;  %v3469_v59 = vshrl.u32 %v6910_v7, 4  ;;  %v7039_v0 = vadd.s32 18, %v6935_v52 }
 0x172   : > { %v3480_v32 = vshrl.u32 %v6926_v25, 4  ;;  %vm8359_vm10 = vcmp.ne.s32.totalorder %v6935_v52, 0  ;;  %vm8360_vm5 = vcmp.lt.s32.totalorder %v6935_v52, 0  ;;  %v7055_v13 = vadd.s32 18, %v6947_v34 }
 0x173   : > { %8358 = vst [vmem:[#allocation38_spill] sm:$0xff] %v7039_v0  ;;  %vm7050_vm2 = vmand %vm8360_vm5, %vm8359_vm10  ;;  %v3458_v25 = vshrl.u32 %v6940_v29, 4  ;;  %v8366_v11 = vmov 0  ;;  %v3470_v7 = vmul.u32 18, %v3469_v59 }
 0x174   : > { %8364 = vst [vmem:[#allocation40_spill] sm:$0xff] %v7055_v13  ;;  %vm7073_vm10 = vmand %vm3669_vm8, %vm3633_vm14  ;;  %v3481_v10 = vmul.u32 18, %v3480_v32 }
 0x175   : > { %v8367_v11 = vsel %vm7073_vm10, 4294967295, %v8366_v11 }
 0x176   : > { %8368 = vst [vmem:[#allocation42_spill] sm:$0xff] %v8367_v11 }
 0x1c7   : > { %v6805_v61 = vpop.f32.mrb[0].mxu1 }
 0x1c8   : > { %v6817_v20 = vpop.f32.mrb[1].mxu1 }
 0x1c9   : > { %v6833_v5 = vpop.f32.mrb[2].mxu1 }
 0x1ca   : > { %v6849_v31 = vpop.f32.mrb[3].mxu1 }
 0x1cf   : > { %v6894_v3 = vpop.f32.mrb[4].mxu1 }
 0x1d0   : > { %8325 = vst [vmem:[#allocation23_spill] sm:$0xff] %v6894_v3  ;;  %v6905_v45 = vpop.f32.mrb[5].mxu1  ;;  %v6979_v3 = vmul.u32.u64.low 3817748708, %v6932_v51  ;;  %v6980_v21 = vmul.u32.u64.high 3817748708, %v6932_v51, %v6979_v3 }
 0x1d1   : > { %8328 = vst [vmem:[#allocation26_spill] sm:$0xff] %v6905_v45  ;;  %v6912_v39 = vpop.f32.mrb[6].mxu1  ;;  %v6975_v12 = vmul.u32.u64.low 3817748708, %v6929_v60  ;;  %v6976_v45 = vmul.u32.u64.high 3817748708, %v6929_v60, %v6975_v12  ;;  %v8349_v3 = vmov 0 }
 0x1d2   : > { %8329 = vst [vmem:[#allocation27_spill] sm:$0xff] %v6912_v39  ;;  %v6922_v30 = vpop.f32.mrb[7].mxu1  ;;  %v6950_v39 = vadd.s32 200, %v6490_v43  ;;  %v3437_v12 = vmul.u32 18, %v3436_v49  ;;  %v8350_v3 = vsel %vm7003_vm4, 4294967295, %v8349_v3 }
 0x1d3   : > { %8330 = vst [vmem:[#allocation28_spill] sm:$0xff] %v6922_v30  ;;  %v6943_v30 = vadd.s32 18, %v6865_v42  ;;  %8351 = vst [vmem:[#allocation35_spill] sm:$0xff] %v8350_v3  ;;  %v3491_v44 = vshrl.u32 %v6976_v45, 4 }
 0x1d5   : > { %8332 = vst [vmem:[#allocation30_spill] sm:$0xff] %v6943_v30  ;;  %v3524_v30 = vshrl.u32 %v6980_v21, 4  ;;  %v3492_v34 = vmul.u32 18, %v3491_v44 }
 0x1d7   : > { %v6982_v22 = vpop.f32.mrb[8].mxu1  ;;  %v3525_v13 = vmul.u32 18, %v3524_v30  ;;  %v7158_v30 = vsub.s32 %v6929_v60, %v3492_v34  ;;  %v7177_v60 = vadd.s32 272, %v6490_v43 }
 0x1d8   : > { %8340 = vst [vmem:[#allocation32_spill] sm:$0xff] %v6982_v22  ;;  %v6997_v17 = vpop.f32.mrb[9].mxu1  ;;  %v7009_v22 = vmul.u32.u64.low 3817748708, %v6950_v39  ;;  %v7010_v16 = vmul.u32.u64.high 3817748708, %v6950_v39, %v7009_v22 }
 0x1d9   : > { %8346 = vst [vmem:[#allocation34_spill] sm:$0xff] %v6997_v17  ;;  %v7015_v49 = vpop.f32.mrb[10].mxu1  ;;  %v8355_v17 = vmov 0  ;;  %v3447_v22 = vshrl.u32 %v6917_v41, 4  ;;  %v8361_v41 = vmov 0  ;;  %8380 = vst [vmem:[#allocation50_spill] sm:$0xff] %v7158_v30  ;;  %v7161_v44 = vsub.s32 %v6932_v51, %v3525_v13 }
 0x1da   : > { %8352 = vst [vmem:[#allocation36_spill] sm:$0xff] %v7015_v49  ;;  %v8356_v17 = vsel %vm7021_vm12, 4294967295, %v8355_v17  ;;  %v7028_v53 = vpop.f32.mrb[11].mxu1  ;;  %v8362_v41 = vsel %vm7050_vm2, 4294967295, %v8361_v41  ;;  %v7058_v49 = vsub.s32 %v6815_v1, %v3437_v12  ;;  %v7082_v12 = vsub.s32 %v6847_v23, %v3415_v27 }
 0x1db   : > { %8357 = vst [vmem:[#allocation37_spill] sm:$0xff] %v8356_v17  ;;  %8363 = vst [vmem:[#allocation39_spill] sm:$0xff] %v8362_v41  ;;  %v7078_v29 = vmul.u32.u64.low 3817748708, %v7013_v48  ;;  %v7079_v1 = vmul.u32.u64.high 3817748708, %v7013_v48, %v7078_v29  ;;  %v3448_v42 = vmul.u32 18, %v3447_v22  ;;  %v3513_v17 = vshrl.u32 %v6964_v37, 4 }
 0x1dc   : > { %8365 = vst [vmem:[#allocation41_spill] sm:$0xff] %v7058_v49  ;;  %8369 = vst [vmem:[#allocation43_spill] sm:$0xff] %v7082_v12  ;;  %v3459_v27 = vmul.u32 18, %v3458_v25  ;;  %v7099_v23 = vadd.s32 224, %v6490_v43  ;;  %v7105_v45 = vadd.s32 18, %v7058_v49  ;;  %v3502_v21 = vshrl.u32 %v7010_v16, 4 }
 0x1dd   : > { %v7109_v22 = vadd.s32 248, %v6490_v43  ;;  %v7115_v25 = vsub.s32 %v6868_v62, %v3470_v7  ;;  %v7118_v29 = vsub.s32 %v6879_v56, %v3448_v42  ;;  %v3514_v59 = vmul.u32 18, %v3513_v17  ;;  %8381 = vst [vmem:[#allocation51_spill] sm:$0xff] %v7161_v44 }
 0x1de   : > { %v7124_v16 = vsub.s32 %v6887_v58, %v3481_v10  ;;  %v7127_v11 = vsub.s32 %v6903_v40, %v3459_v27  ;;  %v7130_v52 = vmul.u32.u64.low 3817748708, %v7099_v23  ;;  %v7131_v62 = vmul.u32.u64.high 3817748708, %v7099_v23, %v7130_v52 }
 0x1df   : > { %v7091_v3 = vpop.f32.mrb[12].mxu1  ;;  %8373 = vst [vmem:[#allocation47_spill] sm:$0xff] %v7118_v29  ;;  %v7134_v42 = vadd.s32 232, %v6490_v43  ;;  %v3503_v17 = vmul.u32 18, %v3502_v21  ;;  %v3557_v56 = vshrl.u32 %v7079_v1, 4  ;;  %vm3639_vm8 = vcmp.ne.s32.totalorder %v7115_v25, 0 }
 0x1e0   : > { %8370 = vst [vmem:[#allocation44_spill] sm:$0xff] %v7091_v3  ;;  %v7101_v37 = vpop.f32.mrb[13].mxu1  ;;  %v7138_v7 = vmul.u32.u64.low 3817748708, %v7109_v22  ;;  %v7139_v0 = vmul.u32.u64.high 3817748708, %v7109_v22, %v7138_v7  ;;  %v7145_v40 = vsub.s32 %v6920_v47, %v3514_v59  ;;  %vm8376_vm10 = vcmp.ne.s32.totalorder %v7058_v49, 0 }
 0x1e1   : > { %8371 = vst [vmem:[#allocation45_spill] sm:$0xff] %v7101_v37  ;;  %v7111_v32 = vpop.f32.mrb[14].mxu1  ;;  %vm8377_vm2 = vcmp.lt.s32.totalorder %v7058_v49, 0  ;;  %vm8383_vm14 = vcmp.ne.s32.totalorder %v7082_v12, 0  ;;  %vm8384_vm5 = vcmp.lt.s32.totalorder %v7082_v12, 0  ;;  %vm8388_vm1 = vcmp.lt.s32.totalorder %v7115_v25, 0 }
 0x1e2   : > { %8372 = vst [vmem:[#allocation46_spill] sm:$0xff] %v7111_v32  ;;  %v7120_v55 = vpop.f32.mrb[15].mxu1  ;;  %8375 = vst [vmem:[#allocation49_spill] sm:$0xff] %v7145_v40  ;;  %v8389_v47 = vmov 0  ;;  %v7190_v51 = vsub.s32 %v6950_v39, %v3503_v17  ;;  %v3558_v34 = vmul.u32 18, %v3557_v56  ;;  %v7199_v21 = vadd.s32 18, %v7082_v12 }
 0x1e3   : > { %8374 = vst [vmem:[#allocation48_spill] sm:$0xff] %v7120_v55  ;;  %vm7151_vm12 = vmand %vm8377_vm2, %vm8376_vm10  ;;  %vm3676_vm10 = vcmp.lt.s32.totalorder %v7124_v16, 0  ;;  %v7193_v1 = vmul.u32.u64.low 3817748708, %v7134_v42  ;;  %v7194_v59 = vmul.u32.u64.high 3817748708, %v7134_v42, %v7193_v1  ;;  %v7202_v7 = vadd.s32 18, %v7115_v25 }
 0x1e4   : > { %vm7169_vm2 = vmand %vm8384_vm5, %vm8383_vm14  ;;  %8391 = vst [vmem:[#allocation54_spill] sm:$0xff] %v7190_v51  ;;  %vm8395_vm14 = vcmp.lt.s32.totalorder %v7118_v29, 0  ;;  %v8396_v39 = vmov 0  ;;  %vm3643_vm5 = vcmp.ne.s32.totalorder %v7145_v40, 0  ;;  %vm3679_vm4 = vcmp.lt.s32.totalorder %v7145_v40, 0 }
 0x1e5   : > { %vm7185_vm7 = vmand %vm8388_vm1, %vm3639_vm8  ;;  %8393 = vst [vmem:[#allocation56_spill] sm:$0xff] %v7199_v21  ;;  %vm8394_vm1 = vcmp.ne.s32.totalorder %v7118_v29, 0  ;;  %v7217_v56 = vadd.s32 18, %v7118_v29  ;;  %vm8399_vm3 = vcmp.ne.s32.totalorder %v7124_v16, 0  ;;  %vm8402_vm9 = vcmp.ne.s32.totalorder %v7127_v11, 0 }
 0x1e6   : > { %v8390_v47 = vsel %vm7185_vm7, 4294967295, %v8389_v47  ;;  %vm7208_vm8 = vmand %vm8395_vm14, %vm8394_vm1  ;;  %vm3641_vm1 = vcmp.ne.s32.totalorder %v7158_v30, 0  ;;  %vm3677_vm14 = vcmp.lt.s32.totalorder %v7158_v30, 0  ;;  %vm8403_vm6 = vcmp.lt.s32.totalorder %v7127_v11, 0 }
 0x1e7   : > { %v7163_v58 = vpop.f32.mrb[16].mxu1  ;;  %v8397_v39 = vsel %vm7208_vm8, 4294967295, %v8396_v39  ;;  %vm7223_vm15 = vmand %vm3676_vm10, %vm8399_vm3  ;;  %vm3680_vm7 = vcmp.lt.s32.totalorder %v7161_v44, 0  ;;  %v8406_v41 = vmov 0  ;;  %vm3642_vm10 = vcmp.ne.s32.totalorder %v7190_v51, 0 }
 0x1e8   : > { %8382 = vst [vmem:[#allocation52_spill] sm:$0xff] %v7163_v58  ;;  %v7179_v13 = vpop.f32.mrb[17].mxu1  ;;  %vm7234_vm8 = vmand %vm8403_vm6, %vm8402_vm9  ;;  %vm3678_vm0 = vcmp.lt.s32.totalorder %v7190_v51, 0  ;;  %v7251_v55 = vsub.s32 %v7013_v48, %v3558_v34  ;;  %v3568_v32 = vshrl.u32 %v7139_v0, 4  ;;  %v7262_v37 = vadd.s32 18, %v7127_v11 }
 0x1e9   : > { %8387 = vst [vmem:[#allocation53_spill] sm:$0xff] %v7179_v13  ;;  %v7196_v27 = vpop.f32.mrb[18].mxu1  ;;  %v7241_v13 = vmul.u32.u64.low 3817748708, %v7177_v60  ;;  %v7242_v58 = vmul.u32.u64.high 3817748708, %v7177_v60, %v7241_v13  ;;  %vm7244_vm3 = vmand %vm3679_vm4, %vm3643_vm5  ;;  %v7265_v3 = vadd.s32 18, %v7145_v40  ;;  %v8410_v0 = vmov 0 }
 0x1ea   : > { %8392 = vst [vmem:[#allocation55_spill] sm:$0xff] %v7196_v27  ;;  %v7214_v17 = vpop.f32.mrb[19].mxu1  ;;  %v3535_v27 = vshrl.u32 %v7131_v62, 4  ;;  %v8407_v41 = vsel %vm7244_vm3, 4294967295, %v8406_v41  ;;  %8408 = vst [vmem:[#allocation58_spill] sm:$0xff] %v7251_v55  ;;  %v7259_v13 = vadd.s32 18, %v7124_v16  ;;  %v8413_v48 = vsel %vm6573_vm11, %v6569_v35, %v6528_v57 }
 0x1eb   : > { %8398 = vst [vmem:[#allocation57_spill] sm:$0xff] %v7214_v17  ;;  %v8404_v17 = vmov 0  ;;  %8409 = vst [vmem:[#allocation59_spill] sm:$0xff] %v7265_v3  ;;  %vm7280_vm9 = vcmp.lt.s32.totalorder %v8413_v48, 16  ;;  %v7289_v49 = vadd.s32 18, %v7158_v30  ;;  %vm8417_vm4 = vcmp.ne.s32.totalorder %v7161_v44, 0 }
 0x1ec   : > { %v8405_v17 = vsel %vm7234_vm8, 4294967295, %v8404_v17  ;;  %vm7271_vm6 = vmand %vm3677_vm14, %vm3641_vm1  ;;  %v7300_v57 = vadd.s32 18, %v7161_v44  ;;  %v7303_v35 = vadd.s32 18, %v7190_v51  ;;  %v8423_v48 = vsel %vm6587_vm13, %v6582_v50, %v6541_v2 }
 0x1ed   : > { %v8411_v0 = vsel %vm7271_vm6, 4294967295, %v8410_v0  ;;  %8416 = vst [vmem:[#allocation61_spill] sm:$0xff] %v7289_v49  ;;  %vm7295_vm5 = vmand %vm3680_vm7, %vm8417_vm4  ;;  %vm7310_vm11 = vcmp.lt.s32.totalorder %v8423_v48, 16  ;;  %v8428_v2 = vmov 0  ;;  %v3536_v50 = vmul.u32 18, %v3535_v27 }
 0x1ee   : > { %8412 = vst [vmem:[#allocation60_spill] sm:$0xff] %v8411_v0  ;;  %v8419_v36 = vsel %vm7295_vm5, 4294967295, %v8418_v36  ;;  %8421 = vst [vmem:[#allocation63_spill] sm:$0xff] %v7300_v57  ;;  %vm8431_vm13 = vnez %v8286_v4  ;;  %vm3647_vm1 = vcmp.ne.s32.totalorder %v7251_v55, 0  ;;  %v3569_v21 = vmul.u32 18, %v3568_v32 }
 0x1ef   : > { %8420 = vst [vmem:[#allocation62_spill] sm:$0xff] %v8419_v36  ;;  %8422 = vst [vmem:[#allocation64_spill] sm:$0xff] %v7303_v35  ;;  %v8432_v48 = vsel %vm8431_vm13, %v6601_v46, %v6561_v19  ;;  %v3546_v29 = vshrl.u32 %v7194_v59, 4  ;;  %v7372_v32 = vld [vmem:[%s8137_s2] ss:$0 sm:$0xff]  ;;  %v8441_v59 = vmov 0 }
 0x1f0   : > { %vm7326_vm14 = vmand %vm3678_vm0, %vm3642_vm10  ;;  %vm7338_vm4 = vcmp.lt.s32.totalorder %v8432_v48, 16  ;;  %vm3683_vm0 = vcmp.lt.s32.totalorder %v7251_v55, 0  ;;  %vm8435_vm10 = vnez %v8295_v24  ;;  %v7387_v24 = vadd.s32 18, %v7251_v55  ;;  %v8583_v52 = vld [vmem:[#allocation52_spill] sm:$0xff] }
 0x1f1   : > { %v8429_v2 = vsel %vm7326_vm14, 4294967295, %v8428_v2  ;;  %v8436_v27 = vsel %vm8435_vm10, %v6640_v6, %v6585_v28  ;;  %v7367_v28 = vadd.s32 280, %v6490_v43  ;;  %v5073_v6 = vpop.f32.mrb[0].mxu0  ;;  %vm7394_vm10 = vmand %vm3683_vm0, %vm3647_vm1  ;;  %v7399_v48 = vsub.s32 %v7099_v23, %v3536_v50 }
 0x1f2   : > { %8430 = vst [vmem:[#allocation65_spill] sm:$0xff] %v8429_v2  ;;  %vm7350_vm7 = vcmp.lt.s32.totalorder %v8436_v27, 16  ;;  %8440 = vst [vmem:[#allocation67_spill] sm:$0xff] %v7387_v24  ;;  %v5111_v46 = vadd.f32 %v5073_v6, %v6805_v61  ;;  %v2926_v19 = vpop.f32.mrb[1].mxu0  ;;  %v8442_v59 = vsel %vm7394_vm10, 4294967295, %v8441_v59  ;;  %v7407_v61 = vsub.s32 %v7109_v22, %v3569_v21  ;;  %v8445_v22 = vld [vmem:[#allocation4_spill] sm:$0xff] }
 0x1f3   : > { %8439 = vst [vmem:[#allocation66_spill] sm:$0xff] %v7367_v28  ;;  %8443 = vst [vmem:[#allocation68_spill] sm:$0xff] %v8442_v59  ;;  %v7402_v2 = vmul.u32.u64.low 3817748708, %v7331_v8  ;;  %v7403_v27 = vmul.u32.u64.high 3817748708, %v7331_v8, %v7402_v2  ;;  %v5112_v51 = vadd.f32 %v2926_v19, %v6817_v20  ;;  %v5074_v35 = vpop.f32.mrb[2].mxu0  ;;  %v3547_v6 = vmul.u32 18, %v3546_v29 }
 0x1f4   : > { %v3601_v44 = vshrl.u32 %v7242_v58, 4  ;;  %v3114_v57 = vadd.f32 %v5111_v46, %v7372_v32  ;;  %v5113_v36 = vadd.f32 %v5074_v35, %v6833_v5  ;;  %v2929_v30 = vpop.f32.mrb[3].mxu0  ;;  %vm8444_vm1 = vnez %v8297_v14  ;;  %v8451_v14 = vld [vmem:[#allocation12_spill] sm:$0xff]  ;;  %v8452_v35 = vld [vmem:[#allocation3_spill] sm:$0xff] }
 0x1f5   : > { %v7413_v23 = vmul.u32.u64.low 3817748708, %v7367_v28  ;;  %v7414_v50 = vmul.u32.u64.high 3817748708, %v7367_v28, %v7413_v23  ;;  %v3112_v2 = vadd.f32 %v5112_v51, %v7372_v32  ;;  %v5114_v20 = vadd.f32 %v2929_v30, %v6849_v31  ;;  %v8449_v30 = vld [vmem:[#allocation10_spill] sm:$0xff] }
 0x1f6   : > { %v8446_v29 = vsel %vm8444_vm1, %v6655_v33, %v8445_v22  ;;  %v7433_v21 = vadd.s32 264, %v6490_v43  ;;  %v3150_v51 = vmax.f32 %v3114_v57, 0.0  ;;  %v3115_v31 = vadd.f32 %v5113_v36, %v7372_v32  ;;  %v8456_v22 = vld [vmem:[#allocation16_spill] sm:$0xff] }
 0x1f7   : > { %vm7424_vm0 = vcmp.lt.s32.totalorder %v8446_v29, 16  ;;  %vm8450_vm13 = vnez %v8449_v30  ;;  %v3148_v46 = vmax.f32 %v3112_v2, 0.0  ;;  %v3113_v43 = vadd.f32 %v5114_v20, %v7372_v32  ;;  %v8458_v29 = vld [vmem:[#allocation17_spill] sm:$0xff]  ;;  %v8459_v30 = vld [vmem:[#allocation2_spill] sm:$0xff] }
 0x1f8   : > { %v8453_v33 = vsel %vm8450_vm13, %v8451_v14, %v8452_v35  ;;  %v7449_v57 = vadd.s32 18, %v7399_v48  ;;  %v3835_v36 = vsel %vm7280_vm9, %v3150_v51, 0.0  ;;  %v3151_v23 = vmax.f32 %v3115_v31, 0.0  ;;  %v8463_v31 = vld [vmem:[#allocation13_spill] sm:$0xff] }
 0x1f9   : > { %vm7441_vm1 = vcmp.lt.s32.totalorder %v8453_v33, 16  ;;  %vm8457_vm13 = vnez %v8456_v22  ;;  %v7465_v2 = vadd.s32 18, %v7407_v61  ;;  %v3833_v20 = vsel %vm7310_vm11, %v3148_v46, 0.0  ;;  %v5077_v51 = vpop.f32.mrb[4].mxu0  ;;  %v8465_v33 = vld [vmem:[#allocation15_spill] sm:$0xff]  ;;  %v8466_v22 = vld [vmem:[#allocation8_spill] sm:$0xff] }
 0x1fa   : > { %v8460_v14 = vsel %vm8457_vm13, %v8458_v29, %v8459_v30  ;;  %v3149_v34 = vmax.f32 %v3113_v43, 0.0  ;;  %vm8464_vm9 = vnez %v8463_v31  ;;  %v7479_v30 = vsub.s32 %v7134_v42, %v3547_v6  ;;  %v8470_v46 = vld [vmem:[#allocation23_spill] sm:$0xff]  ;;  %v2942_v24 = vpop.f32.mrb[5].mxu0 }
 0x1fb   : > { %vm7459_vm14 = vcmp.lt.s32.totalorder %v8460_v14, 16  ;;  %v8467_v5 = vsel %vm8464_vm9, %v8465_v33, %v8466_v22  ;;  %v3602_v14 = vmul.u32 18, %v3601_v44  ;;  %v3906_v55 = vrot.slane %v3833_v20, 5  ;;  %v8471_v33 = vld [vmem:[#allocation26_spill] sm:$0xff]  ;;  %v5078_v49 = vpop.f32.mrb[6].mxu0  ;;  %v8473_v6 = vld [vmem:[#allocation27_spill] sm:$0xff] }
 0x1fc   : > { %vm7474_vm13 = vcmp.lt.s32.totalorder %v8467_v5, 16  ;;  %v3836_v62 = vsel %vm7338_vm4, %v3151_v23, 0.0  ;;  %v5115_v43 = vadd.f32 %v5077_v51, %v8470_v46  ;;  %v3579_v31 = vshrl.u32 %v7403_v27, 4  ;;  %v2945_v20 = vpop.f32.mrb[7].mxu0  ;;  %v8483_v46 = vld [vmem:[#allocation7_spill] sm:$0xff] }
 0x1fd   : > { %v3909_v59 = vrot.slane %v3835_v36, 5  ;;  %v3911_v28 = vrot.slane %v3836_v62, 5  ;;  %v3834_v5 = vsel %vm7350_vm7, %v3149_v34, 0.0  ;;  %v5116_v22 = vadd.f32 %v2942_v24, %v8471_v33  ;;  %v8479_v34 = vld [vmem:[#allocation28_spill] sm:$0xff]  ;;  %v8480_v62 = vld [vmem:[#allocation5_spill] sm:$0xff] }
 0x1fe   : > { %vm8472_vm11 = vcmask 1042432   ;;  %v3907_v44 = vrot.slane %v3834_v5, 5  ;;  %v3118_v12 = vadd.f32 %v5115_v43, %v7372_v32  ;;  %v5117_v23 = vadd.f32 %v5078_v49, %v8473_v6  ;;  %v8482_v49 = vld [vmem:[#allocation14_spill] sm:$0xff] }
 0x1ff   : > { %v4014_v42 = vsel %vm8472_vm11, 0.0, %v3906_v55  ;;  %vm8474_vm4 = vcmp.ne.s32.totalorder %v7399_v48, 0  ;;  %vm8475_vm9 = vcmp.lt.s32.totalorder %v7399_v48, 0  ;;  %vm8478_vm7 = vmmov %vm8472_vm11  ;;  %v3116_v36 = vadd.f32 %v5116_v22, %v7372_v32 }
 0x200   : > { %vm7495_vm5 = vmand %vm8475_vm9, %vm8474_vm4  ;;  %v4529_v4 = vpack.c.bf16 %v4014_v42, %v4014_v42  ;;  %v3912_v24 = vsel %vm8478_vm7, %v3909_v59, %v3911_v28  ;;  %v5118_v51 = vadd.f32 %v2945_v20, %v8479_v34  ;;  %vm8481_vm11 = vnez %v8480_v62  ;;  %v8492_v34 = vld [vmem:[#allocation6_spill] sm:$0xff] }
 0x201   : > { %v8484_v43 = vsel %vm8481_vm11, %v8482_v49, %v8483_v46  ;;  %vm8487_vm4 = vcmp.ne.s32.totalorder %v7407_v61, 0  ;;  %vm8488_vm9 = vcmp.lt.s32.totalorder %v7407_v61, 0  ;;  %v4532_v22 = vpack.c.bf16 %v3912_v24, %v3912_v24  ;;  %vm8491_vm3 = vmmov %vm8478_vm7  ;;  %v8494_v62 = vld [vmem:[#allocation18_spill] sm:$0xff]  ;;  %v8495_v49 = vld [vmem:[#allocation11_spill] sm:$0xff] }
 0x202   : > { %vm7507_vm10 = vcmp.lt.s32.totalorder %v8484_v43, 16  ;;  %vm7515_vm6 = vmand %vm8488_vm9, %vm8487_vm4  ;;  %v3908_v42 = vsel %vm8478_vm7, %v3906_v55, %v3907_v44  ;;  %v3910_v6 = vsel %vm8491_vm3, %v3907_v44, %v3909_v59  ;;  %v3154_v20 = vmax.f32 %v3118_v12, 0.0 }
 0x203   : > { %vm8493_vm11 = vnez %v8492_v34  ;;  %vm8499_vm4 = vcmask 257024   ;;  %v4530_v0 = vpack.c.bf16 %v3908_v42, %v3908_v42  ;;  %v4531_v40 = vpack.c.bf16 %v3910_v6, %v3910_v6 }
 0x204   : > { %v8496_v46 = vsel %vm8493_vm11, %v8494_v62, %v8495_v49  ;;  %4179 = vst.msk [vmem:[%s6803_s9 + $0x8] sm:$0xf] %vm8499_vm4, %v4529_v4  ;;  %v3152_v24 = vmax.f32 %v3116_v36, 0.0  ;;  %v3119_v3 = vadd.f32 %v5117_v23, %v7372_v32  ;;  %vm8500_vm9 = vmmov %vm8499_vm4  ;;  %v3839_v55 = vsel %vm7424_vm0, %v3154_v20, 0.0  ;;  %v5081_v4 = vpop.f32.mrb[8].mxu0  ;;  %v8503_v36 = vld [vmem:[#allocation20_spill] sm:$0xff] }
 0x205   : > { %vm7526_vm8 = vcmp.lt.s32.totalorder %v8496_v46, 16  ;;  %4182 = vst.msk [vmem:[%s6803_s9 + $0x14] sm:$0xf] %vm8500_vm9, %v4532_v22  ;;  %v3117_v59 = vadd.f32 %v5118_v51, %v7372_v32  ;;  %v3789_v44 = vsel %vm7495_vm5, %v7449_v57, %v7399_v48  ;;  %v3792_v12 = vsel %vm7515_vm6, %v7465_v2, %v7407_v61  ;;  %vm8501_vm3 = vmmov %vm8499_vm4  ;;  %v8505_v51 = vld [vmem:[#allocation19_spill] sm:$0xff]  ;;  %v8506_v22 = vld [vmem:[#allocation9_spill] sm:$0xff]  ;;  %v2958_v34 = vpop.f32.mrb[9].mxu0 }
 0x206   : > { %4180 = vst.msk [vmem:[%s6803_s9 + $0xc] sm:$0xf] %vm8501_vm3, %v4530_v0  ;;  %vm8502_vm7 = vmmov %vm8501_vm3  ;;  %v3837_v58 = vsel %vm7441_vm1, %v3152_v24, 0.0  ;;  %v3155_v23 = vmax.f32 %v3119_v3, 0.0  ;;  %vm8504_vm0 = vnez %v8503_v36  ;;  %vm3646_vm4 = vcmp.ne.s32.totalorder %v7479_v30, 0  ;;  %v8510_v3 = vld [vmem:[#allocation32_spill] sm:$0xff] }
 0x207   : > { %4181 = vst.msk [vmem:[%s6803_s9 + $0x10] sm:$0xf] %vm8502_vm7, %v4531_v40  ;;  %v8507_v42 = vsel %vm8504_vm0, %v8505_v51, %v8506_v22  ;;  %v7564_v40 = vadd.s32 18, %v7479_v30  ;;  %v3913_v0 = vrot.slane %v3837_v58, 5  ;;  %v3153_v19 = vmax.f32 %v3117_v59, 0.0  ;;  %v8515_v59 = vld [vmem:[#allocation34_spill] sm:$0xff] }
 0x208   : > { %vm7557_vm11 = vcmp.lt.s32.totalorder %v8507_v42, 16  ;;  %v5119_v20 = vadd.f32 %v5081_v4, %v8510_v3  ;;  %vm8511_vm1 = vnez %v8335_v63  ;;  %v7577_v46 = vsub.s32 %v7177_v60, %v3602_v14  ;;  %v5082_v4 = vpop.f32.mrb[10].mxu0  ;;  %v8563_v49 = vld [vmem:[#allocation42_spill] sm:$0xff] }
 0x209   : > { %v8512_v62 = vsel %vm8511_vm1, %v6844_v15, %v6783_v9  ;;  %v3917_v24 = vrot.slane %v3839_v55, 5  ;;  %v3840_v58 = vsel %vm7459_vm14, %v3155_v23, 0.0  ;;  %v5120_v36 = vadd.f32 %v2958_v34, %v8515_v59  ;;  %v2961_v60 = vpop.f32.mrb[11].mxu0  ;;  %v8517_v23 = vld [vmem:[#allocation36_spill] sm:$0xff]  ;;  %v8525_v34 = vld [vmem:[#allocation21_spill] sm:$0xff] }
 0x20a   : > { %vm7572_vm3 = vcmp.lt.s32.totalorder %v8512_v62, 16  ;;  %v7582_v51 = vmul.u32 18, %v3579_v31  ;;  %vm8516_vm7 = vcmask 1042432   ;;  %v3919_v9 = vrot.slane %v3840_v58, 5 }
 0x20b   : > { %v3914_v63 = vsel %vm8516_vm7, %v3911_v28, %v3913_v0  ;;  %v3838_v15 = vsel %vm7474_vm13, %v3153_v19, 0.0  ;;  %v3122_v22 = vadd.f32 %v5119_v20, %v7372_v32  ;;  %v3120_v35 = vadd.f32 %v5120_v36, %v7372_v32  ;;  %vm8522_vm13 = vmmov %vm8516_vm7  ;;  %v8524_v20 = vld [vmem:[#allocation24_spill] sm:$0xff]  ;;  %v8578_v28 = vld [vmem:[#allocation41_spill] sm:$0xff] }
 0x20c   : > { %v4533_v14 = vpack.c.bf16 %v3914_v63, %v3914_v63  ;;  %v3915_v55 = vrot.slane %v3838_v15, 5  ;;  %v5121_v42 = vadd.f32 %v5082_v4, %v8517_v23  ;;  %vm8518_vm14 = vnez %v8339_v18 }
 0x20d   : > { %v8519_v31 = vsel %vm8518_vm14, %v6882_v54, %v6812_v26  ;;  %v3920_v29 = vsel %vm8522_vm13, %v3917_v24, %v3919_v9  ;;  %v3158_v19 = vmax.f32 %v3122_v22, 0.0  ;;  %v5122_v3 = vadd.f32 %v2961_v60, %v7028_v53  ;;  %vm8529_vm14 = vmmov %vm8500_vm9  ;;  %v5085_v60 = vpop.f32.mrb[12].mxu0 }
 0x20e   : > { %vm7595_vm0 = vcmp.lt.s32.totalorder %v8519_v31, 16  ;;  %vm8523_vm1 = vnez %v8344_v38  ;;  %v3612_v54 = vshrl.u32 %v7414_v50, 4  ;;  %4183 = vst.msk [vmem:[%s6803_s9 + $0x18] sm:$0xf] %vm8529_vm14, %v4533_v14  ;;  %v4536_v26 = vpack.c.bf16 %v3920_v29, %v3920_v29  ;;  %vm8530_vm9 = vmmov %vm8522_vm13  ;;  %v8532_v14 = vld [vmem:[#allocation35_spill] sm:$0xff]  ;;  %v8541_v31 = vld [vmem:[#allocation44_spill] sm:$0xff] }
 0x20f   : > { %v8526_v62 = vsel %vm8523_vm1, %v8524_v20, %v8525_v34  ;;  %v3916_v58 = vsel %vm8522_vm13, %v3913_v0, %v3915_v55  ;;  %v3918_v53 = vsel %vm8530_vm9, %v3915_v55, %v3917_v24  ;;  %v3156_v59 = vmax.f32 %v3120_v35, 0.0  ;;  %vm8531_vm1 = vmmov %vm8529_vm14  ;;  %v8534_v0 = vld [vmem:[#allocation30_spill] sm:$0xff]  ;;  %v8542_v34 = vld [vmem:[#allocation45_spill] sm:$0xff] }
 0x210   : > { %vm7606_vm7 = vcmp.lt.s32.totalorder %v8526_v62, 16  ;;  %v4534_v38 = vpack.c.bf16 %v3916_v58, %v3916_v58  ;;  %v4535_v36 = vpack.c.bf16 %v3918_v53, %v3918_v53  ;;  %v3843_v4 = vsel %vm7507_vm10, %v3158_v19, 0.0  ;;  %4186 = vst.msk [vmem:[%s6803_s9 + $0x24] sm:$0xf] %vm8531_vm1, %v4536_v26  ;;  %v8535_v24 = vld [vmem:[#allocation22_spill] sm:$0xff]  ;;  %vm8539_vm10 = vmmov %vm8531_vm1  ;;  %v2974_v19 = vpop.f32.mrb[13].mxu0 }
 0x211   : > { %v3123_v63 = vadd.f32 %v5121_v42, %v7372_v32  ;;  %v3841_v15 = vsel %vm7526_vm8, %v3156_v59, 0.0  ;;  %v3121_v22 = vadd.f32 %v5122_v3, %v7372_v32  ;;  %vm8533_vm14 = vnez %v8532_v14  ;;  %vm8540_vm8 = vmmov %vm8531_vm1  ;;  %v5086_v26 = vpop.f32.mrb[14].mxu0  ;;  %v8543_v58 = vld [vmem:[#allocation37_spill] sm:$0xff] }
 0x212   : > { %v8536_v55 = vsel %vm8533_vm14, %v8534_v0, %v8535_v24  ;;  %v7633_v5 = vmul.u32.u64.low 3817748708, %v7433_v21  ;;  %v7634_v23 = vmul.u32.u64.high 3817748708, %v7433_v21, %v7633_v5  ;;  %4184 = vst.msk [vmem:[%s6803_s9 + $0x1c] sm:$0xf] %vm8539_vm10, %v4534_v38  ;;  %v3921_v43 = vrot.slane %v3841_v15, 5  ;;  %v8545_v53 = vld [vmem:[#allocation33_spill] sm:$0xff] }
 0x213   : > { %vm7628_vm9 = vcmp.lt.s32.totalorder %v8536_v55, 16  ;;  %4185 = vst.msk [vmem:[%s6803_s9 + $0x20] sm:$0xf] %vm8540_vm8, %v4535_v36  ;;  %v3159_v42 = vmax.f32 %v3123_v63, 0.0  ;;  %v5123_v29 = vadd.f32 %v5085_v60, %v8541_v31  ;;  %v3925_v3 = vrot.slane %v3843_v4, 5  ;;  %v8546_v59 = vld [vmem:[#allocation25_spill] sm:$0xff]  ;;  %vm8550_vm8 = vmmov %vm8522_vm13 }
 0x214   : > { %v3157_v20 = vmax.f32 %v3121_v22, 0.0  ;;  %v5124_v62 = vadd.f32 %v2974_v19, %v8542_v34  ;;  %vm8544_vm1 = vnez %v8543_v58  ;;  %v3922_v36 = vsel %vm8550_vm8, %v3919_v9, %v3921_v43  ;;  %v8551_v15 = vld [vmem:[#allocation46_spill] sm:$0xff]  ;;  %v2977_v60 = vpop.f32.mrb[15].mxu0  ;;  %v7672_v34 = vpop.f32.mrb[20].mxu1 }
 0x215   : > { %v8547_v14 = vsel %vm8544_vm1, %v8545_v53, %v8546_v59  ;;  %v3844_v4 = vsel %vm7557_vm11, %v3159_v42, 0.0  ;;  %v3126_v63 = vadd.f32 %v5123_v29, %v7372_v32  ;;  %v5125_v22 = vadd.f32 %v5086_v26, %v8551_v15  ;;  %v8555_v29 = vld [vmem:[#allocation48_spill] sm:$0xff]  ;;  %v8556_v26 = vld [vmem:[#allocation39_spill] sm:$0xff]  ;;  %v8558_v58 = vld [vmem:[#allocation38_spill] sm:$0xff] }
 0x216   : > { %vm7649_vm14 = vcmp.lt.s32.totalorder %v8547_v14, 16  ;;  %vm8552_vm1 = vcmp.lt.s32.totalorder %v7479_v30, 0  ;;  %v4537_v24 = vpack.c.bf16 %v3922_v36, %v3922_v36  ;;  %v3927_v55 = vrot.slane %v3844_v4, 5  ;;  %v8559_v53 = vld [vmem:[#allocation29_spill] sm:$0xff] }
 0x217   : > { %vm7663_vm13 = vmand %vm8552_vm1, %vm3646_vm4  ;;  %v3842_v6 = vsel %vm7572_vm3, %v3157_v20, 0.0  ;;  %v3124_v9 = vadd.f32 %v5124_v62, %v7372_v32  ;;  %v3162_v42 = vmax.f32 %v3126_v63, 0.0  ;;  %v3127_v31 = vadd.f32 %v5125_v22, %v7372_v32  ;;  %v8565_v20 = vld [vmem:[#allocation40_spill] sm:$0xff]  ;;  %v8566_v62 = vld [vmem:[#allocation31_spill] sm:$0xff]  ;;  %v7695_v22 = vpop.f32.mrb[21].mxu1 }
 0x218   : > { %v3923_v5 = vrot.slane %v3842_v6, 5  ;;  %v5126_v19 = vadd.f32 %v2977_v60, %v8555_v29  ;;  %vm8557_vm11 = vnez %v8556_v26  ;;  %vm8564_vm3 = vnez %v8563_v49  ;;  %vm8570_vm1 = vmmov %vm8539_vm10 }
 0x219   : > { %v8560_v59 = vsel %vm8557_vm11, %v8558_v58, %v8559_v53  ;;  %v8567_v36 = vsel %vm8564_vm3, %v8565_v20, %v8566_v62  ;;  %4187 = vst.msk [vmem:[%s6803_s9 + $0x28] sm:$0xf] %vm8570_vm1, %v4537_v24  ;;  %vm8571_vm10 = vcmask 1042432   ;;  %v3160_v15 = vmax.f32 %v3124_v9, 0.0  ;;  %v7708_v9 = vpop.f32.mrb[22].mxu1 }
 0x21a   : > { %vm7679_vm4 = vcmp.lt.s32.totalorder %v8560_v59, 16  ;;  %vm7688_vm8 = vcmp.lt.s32.totalorder %v8567_v36, 16  ;;  %v3928_v63 = vsel %vm8571_vm10, %v3925_v3, %v3927_v55  ;;  %v3790_v60 = vsel %vm7663_vm13, %v7564_v40, %v7479_v30  ;;  %vm8572_vm11 = vmmov %vm8571_vm10  ;;  %v7729_v20 = vpop.f32.mrb[23].mxu1 }
 0x21b   : > { %v7702_v6 = vadd.s32 18, %v7577_v46  ;;  %v4540_v29 = vpack.c.bf16 %v3928_v63, %v3928_v63  ;;  %v3924_v26 = vsel %vm8572_vm11, %v3921_v43, %v3923_v5  ;;  %vm8573_vm3 = vmmov %vm8571_vm10  ;;  %v3847_v24 = vsel %vm7595_vm0, %v3162_v42, 0.0  ;;  %v8619_v42 = vld [vmem:[#allocation49_spill] sm:$0xff] }
 0x21c   : > { %v3926_v58 = vsel %vm8573_vm3, %v3923_v5, %v3925_v3  ;;  %vm8574_vm10 = vcmp.ne.s32.totalorder %v7577_v46, 0  ;;  %vm8575_vm1 = vcmp.lt.s32.totalorder %v7577_v46, 0  ;;  %v4538_v59 = vpack.c.bf16 %v3924_v26, %v3924_v26  ;;  %v5089_v3 = vpop.f32.mrb[16].mxu0 }
 0x21d   : > { %vm7714_vm6 = vmand %vm8575_vm1, %vm8574_vm10  ;;  %v4539_v49 = vpack.c.bf16 %v3926_v58, %v3926_v58  ;;  %v3845_v43 = vsel %vm7606_vm7, %v3160_v15, 0.0  ;;  %v8579_v5 = vsel %vm7151_vm12, %v7105_v45, %v8578_v28  ;;  %v7733_v62 = vsub.s32 %v7331_v8, %v7582_v51  ;;  %v2990_v26 = vpop.f32.mrb[17].mxu0  ;;  %v8584_v45 = vld [vmem:[#allocation56_spill] sm:$0xff]  ;;  %v8585_v58 = vld [vmem:[#allocation43_spill] sm:$0xff] }
 0x21e   : > { %vm7725_vm0 = vcmp.lt.s32.totalorder %v8579_v5, 16  ;;  %vm8582_vm11 = vcmask 257024   ;;  %v3929_v18 = vrot.slane %v3845_v43, 5  ;;  %v3163_v36 = vmax.f32 %v3127_v31, 0.0  ;;  %v8591_v51 = vld [vmem:[#allocation53_spill] sm:$0xff]  ;;  %v8623_v5 = vld [vmem:[#allocation60_spill] sm:$0xff] }
 0x21f   : > { %4190 = vst.msk [vmem:[%s6803_s9 + $0x34] sm:$0xf] %vm8582_vm11, %v4540_v29  ;;  %v3125_v63 = vadd.f32 %v5126_v19, %v7372_v32  ;;  %v5127_v15 = vadd.f32 %v5089_v3, %v8583_v52  ;;  %v8586_v28 = vsel %vm7169_vm2, %v8584_v45, %v8585_v58  ;;  %vm8589_vm7 = vmmov %vm8582_vm11  ;;  %v3933_v8 = vrot.slane %v3847_v24, 5  ;;  %v5090_v19 = vpop.f32.mrb[18].mxu0  ;;  %v8593_v58 = vld [vmem:[#allocation55_spill] sm:$0xff] }
 0x220   : > { %vm7744_vm12 = vcmp.lt.s32.totalorder %v8586_v28, 16  ;;  %4188 = vst.msk [vmem:[%s6803_s9 + $0x2c] sm:$0xf] %vm8589_vm7, %v4538_v59  ;;  %vm8590_vm3 = vmmov %vm8589_vm7  ;;  %v5128_v31 = vadd.f32 %v2990_v26, %v8591_v51  ;;  %v7759_v29 = vmul.u32 18, %v3612_v54  ;;  %vm8592_vm2 = vcmask 1042432   ;;  %v2993_v3 = vpop.f32.mrb[19].mxu0 }
 0x221   : > { %4189 = vst.msk [vmem:[%s6803_s9 + $0x30] sm:$0xf] %vm8590_vm3, %v4539_v49  ;;  %v3930_v43 = vsel %vm8592_vm2, %v3927_v55, %v3929_v18  ;;  %v3848_v59 = vsel %vm7628_vm9, %v3163_v36, 0.0  ;;  %v3161_v49 = vmax.f32 %v3125_v63, 0.0  ;;  %v3130_v24 = vadd.f32 %v5127_v15, %v7372_v32  ;;  %v8594_v51 = vld [vmem:[#allocation57_spill] sm:$0xff]  ;;  %v7770_v55 = vpop.f32.mrb[24].mxu1  ;;  %vm8599_vm11 = vmmov %vm8590_vm3 }
 0x222   : > { %v4541_v52 = vpack.c.bf16 %v3930_v43, %v3930_v43  ;;  %v3935_v26 = vrot.slane %v3848_v59, 5  ;;  %v3128_v45 = vadd.f32 %v5128_v31, %v7372_v32  ;;  %v5129_v28 = vadd.f32 %v5090_v19, %v8593_v58  ;;  %vm8600_vm7 = vmmov %vm8592_vm2  ;;  %v7786_v19 = vpop.f32.mrb[25].mxu1  ;;  %v5093_v1 = vpop.f32.mrb[20].mxu0 }
 0x223   : > { %v3846_v50 = vsel %vm7649_vm14, %v3161_v49, 0.0  ;;  %v3166_v54 = vmax.f32 %v3130_v24, 0.0  ;;  %v5130_v10 = vadd.f32 %v2993_v3, %v8594_v51  ;;  %vm8595_vm9 = vnez %v8390_v47  ;;  %v7798_v49 = vpop.f32.mrb[26].mxu1 }
 0x224   : > { %v8596_v35 = vsel %vm8595_vm9, %v7202_v7, %v7115_v25  ;;  %vm3649_vm1 = vcmp.ne.s32.totalorder %v7733_v62, 0  ;;  %4191 = vst.msk [vmem:[%s6803_s9 + $0x38] sm:$0xf] %vm8599_vm11, %v4541_v52  ;;  %v3936_v38 = vsel %vm8600_vm7, %v3933_v8, %v3935_v26  ;;  %v3931_v63 = vrot.slane %v3846_v50, 5  ;;  %v8602_v25 = vld [vmem:[#allocation47_spill] sm:$0xff]  ;;  %vm8609_vm11 = vmmov %vm8600_vm7 }
 0x225   : > { %vm7777_vm10 = vcmp.lt.s32.totalorder %v8596_v35, 16  ;;  %v3164_v15 = vmax.f32 %v3128_v45, 0.0  ;;  %v3131_v31 = vadd.f32 %v5129_v28, %v7372_v32  ;;  %vm8601_vm14 = vnez %v8397_v39 }
 0x226   : > { %v8603_v47 = vsel %vm8601_vm14, %v7217_v56, %v8602_v25  ;;  %v4544_v43 = vpack.c.bf16 %v3936_v38, %v3936_v38  ;;  %v3129_v59 = vadd.f32 %v5130_v10, %v7372_v32  ;;  %v8606_v24 = vsel %vm7223_vm15, %v7259_v13, %v7124_v16  ;;  %v7819_v13 = vpop.f32.mrb[27].mxu1 }
 0x227   : > { %vm7793_vm3 = vcmp.lt.s32.totalorder %v8603_v47, 16  ;;  %vm7805_vm2 = vcmp.lt.s32.totalorder %v8606_v24, 16  ;;  %vm3685_vm9 = vcmp.lt.s32.totalorder %v7733_v62, 0  ;;  %v7811_v39 = vadd.s32 18, %v7733_v62 }
 0x228   : > { %v3932_v56 = vsel %vm8609_vm11, %v3929_v18, %v3931_v63  ;;  %v3934_v10 = vsel %vm8600_vm7, %v3931_v63, %v3933_v8  ;;  %v3851_v52 = vsel %vm7679_vm4, %v3166_v54, 0.0  ;;  %v3849_v16 = vsel %vm7688_vm8, %v3164_v15, 0.0  ;;  %v3006_v18 = vpop.f32.mrb[21].mxu0 }
 0x229   : > { %vm8610_vm15 = vcmask 257024   ;;  %v4542_v45 = vpack.c.bf16 %v3932_v56, %v3932_v56  ;;  %v4543_v58 = vpack.c.bf16 %v3934_v10, %v3934_v10  ;;  %v3937_v28 = vrot.slane %v3849_v16, 5  ;;  %v5094_v54 = vpop.f32.mrb[22].mxu0  ;;  %v8625_v10 = vld [vmem:[#allocation61_spill] sm:$0xff] }
 0x22a   : > { %4194 = vst.msk [vmem:[%s6803_s9 + $0x44] sm:$0xf] %vm8610_vm15, %v4544_v43  ;;  %v3167_v50 = vmax.f32 %v3131_v31, 0.0  ;;  %v3165_v51 = vmax.f32 %v3129_v59, 0.0  ;;  %v5131_v8 = vadd.f32 %v5093_v1, %v7672_v34  ;;  %v5132_v14 = vadd.f32 %v3006_v18, %v7695_v22  ;;  %vm8615_vm14 = vmmov %vm8610_vm15  ;;  %v7849_v59 = vpop.f32.mrb[28].mxu1 }
 0x22b   : > { %vm8611_vm4 = vnez %v8405_v17  ;;  %v3590_v38 = vshrl.u32 %v7634_v23, 4  ;;  %4192 = vst.msk [vmem:[%s6803_s9 + $0x3c] sm:$0xf] %vm8615_vm14, %v4542_v45  ;;  %vm8616_vm11 = vmmov %vm8615_vm14  ;;  %v3941_v63 = vrot.slane %v3851_v52, 5  ;;  %v3938_v34 = vsel %vm8600_vm7, %v3935_v26, %v3937_v28  ;;  %v8626_v52 = vld [vmem:[#allocation50_spill] sm:$0xff]  ;;  %v7872_v45 = vpop.f32.mrb[29].mxu1 }
 0x22c   : > { %v8612_v4 = vsel %vm8611_vm4, %v7262_v37, %v7127_v11  ;;  %4193 = vst.msk [vmem:[%s6803_s9 + $0x40] sm:$0xf] %vm8616_vm11, %v4543_v58  ;;  %v3852_v17 = vsel %vm7725_vm0, %v3167_v50, 0.0  ;;  %v5133_v22 = vadd.f32 %v5094_v54, %v7708_v9  ;;  %v3009_v11 = vpop.f32.mrb[23].mxu0  ;;  %v4545_v37 = vpack.c.bf16 %v3938_v34, %v3938_v34  ;;  %v8618_v9 = vld [vmem:[#allocation59_spill] sm:$0xff]  ;;  %vm8630_vm14 = vmmov %vm8616_vm11  ;;  %v8634_v50 = vld [vmem:[#allocation66_spill] sm:$0xff] }
 0x22d   : > { %vm7830_vm8 = vcmp.lt.s32.totalorder %v8612_v4, 16  ;;  %v3943_v15 = vrot.slane %v3852_v17, 5  ;;  %v3850_v31 = vsel %vm7744_vm12, %v3165_v51, 0.0  ;;  %v3134_v23 = vadd.f32 %v5131_v8, %v7372_v32  ;;  %vm8631_vm11 = vmmov %vm8600_vm7  ;;  %v7888_v34 = vpop.f32.mrb[30].mxu1 }
 0x22e   : > { %v3939_v25 = vrot.slane %v3850_v31, 5  ;;  %v3132_v47 = vadd.f32 %v5132_v14, %v7372_v32  ;;  %v3135_v43 = vadd.f32 %v5133_v22, %v7372_v32  ;;  %v5134_v26 = vadd.f32 %v3009_v11, %v7729_v20  ;;  %4195 = vst.msk [vmem:[%s6803_s9 + $0x48] sm:$0xf] %vm8630_vm14, %v4545_v37  ;;  %vm7878_vm7 = vmand %vm3685_vm9, %vm3649_vm1  ;;  %v5097_v31 = vpop.f32.mrb[24].mxu0 }
 0x22f   : > { %vm8617_vm0 = vnez %v8407_v41  ;;  %vm8624_vm12 = vnez %v8623_v5  ;;  %v3944_v41 = vsel %vm8631_vm11, %v3941_v63, %v3943_v15  ;;  %v3170_v20 = vmax.f32 %v3134_v23, 0.0  ;;  %v8640_v23 = vld [vmem:[#allocation51_spill] sm:$0xff]  ;;  %v8647_v5 = vld [vmem:[#allocation54_spill] sm:$0xff] }
 0x230   : > { %v8620_v24 = vsel %vm8617_vm0, %v8618_v9, %v8619_v42  ;;  %v8627_v16 = vsel %vm8624_vm12, %v8625_v10, %v8626_v52  ;;  %v7884_v18 = vsub.s32 %v8634_v50, %v7759_v29  ;;  %v3591_v51 = vmul.u32 18, %v3590_v38  ;;  %vm8635_vm0 = vmmov %vm8631_vm11  ;;  %v8637_v29 = vld [vmem:[#allocation62_spill] sm:$0xff]  ;;  %v8639_v38 = vld [vmem:[#allocation63_spill] sm:$0xff] }
 0x231   : > { %vm7856_vm15 = vcmp.lt.s32.totalorder %v8620_v24, 16  ;;  %vm7865_vm4 = vcmp.lt.s32.totalorder %v8627_v16, 16  ;;  %v4548_v8 = vpack.c.bf16 %v3944_v41, %v3944_v41  ;;  %v3940_v14 = vsel %vm8635_vm0, %v3937_v28, %v3939_v25  ;;  %vm8636_vm12 = vmmov %vm8635_vm0  ;;  %v8644_v42 = vld [vmem:[#allocation65_spill] sm:$0xff]  ;;  %v8646_v24 = vld [vmem:[#allocation64_spill] sm:$0xff] }
 0x232   : > { %v3942_v54 = vsel %vm8636_vm12, %v3939_v25, %v3941_v63  ;;  %v3168_v4 = vmax.f32 %v3132_v47, 0.0  ;;  %v4546_v17 = vpack.c.bf16 %v3940_v14, %v3940_v14  ;;  %v3855_v11 = vsel %vm7777_vm10, %v3170_v20, 0.0  ;;  %v7901_v63 = vpop.f32.mrb[31].mxu1 }
 0x233   : > { %v4547_v22 = vpack.c.bf16 %v3942_v54, %v3942_v54  ;;  %v3171_v37 = vmax.f32 %v3135_v43, 0.0  ;;  %vm8638_vm1 = vnez %v8637_v29  ;;  %4198 = vst.msk [vmem:[%s6803_s9 + $0x54] sm:$0xf] %vm8630_vm14, %v4548_v8  ;;  %v3133_v36 = vadd.f32 %v5134_v26, %v7372_v32  ;;  %v3022_v43 = vpop.f32.mrb[25].mxu0 }
 0x234   : > { %v8641_v9 = vsel %vm8638_vm1, %v8639_v38, %v8640_v23  ;;  %v3853_v25 = vsel %vm7793_vm3, %v3168_v4, 0.0  ;;  %v5135_v47 = vadd.f32 %v5097_v31, %v7770_v55  ;;  %vm8645_vm10 = vnez %v8644_v42  ;;  %vm8651_vm3 = vmmov %vm8630_vm14  ;;  %v5098_v20 = vpop.f32.mrb[26].mxu0  ;;  %v8654_v38 = vld [vmem:[#allocation68_spill] sm:$0xff]  ;;  %v8657_v23 = vld [vmem:[#allocation58_spill] sm:$0xff] }
 0x235   : > { %vm7897_vm9 = vcmp.lt.s32.totalorder %v8641_v9, 16  ;;  %v8648_v10 = vsel %vm8645_vm10, %v8646_v24, %v8647_v5  ;;  %v3793_v7 = vsel %vm7878_vm7, %v7811_v39, %v7733_v62  ;;  %4196 = vst.msk [vmem:[%s6803_s9 + $0x4c] sm:$0xf] %vm8651_vm3, %v4546_v17  ;;  %vm8652_vm0 = vmmov %vm8651_vm3  ;;  %v3949_v55 = vrot.slane %v3855_v11, 5  ;;  %v3025_v4 = vpop.f32.mrb[27].mxu0 }
 0x236   : > { %vm7914_vm11 = vcmp.lt.s32.totalorder %v8648_v10, 16  ;;  %4197 = vst.msk [vmem:[%s6803_s9 + $0x50] sm:$0xf] %vm8652_vm0, %v4547_v22  ;;  %v3945_v26 = vrot.slane %v3853_v25, 5  ;;  %v3856_v16 = vsel %vm7805_vm2, %v3171_v37, 0.0  ;;  %v5136_v41 = vadd.f32 %v3022_v43, %v7786_v19  ;;  %vm8653_vm2 = vmmov %vm8636_vm12 }
 0x237   : > { %v3951_v50 = vrot.slane %v3856_v16, 5  ;;  %v3169_v8 = vmax.f32 %v3133_v36, 0.0  ;;  %v3138_v14 = vadd.f32 %v5135_v47, %v7372_v32  ;;  %v5137_v54 = vadd.f32 %v5098_v20, %v7798_v49  ;;  %v7940_v49 = vpop.f32.mrb[32].mxu1  ;;  %vm8663_vm10 = vmmov %vm8652_vm0 }
 0x238   : > { %v3946_v31 = vsel %vm8636_vm12, %v3943_v15, %v3945_v26  ;;  %v3136_v17 = vadd.f32 %v5136_v41, %v7372_v32  ;;  %v5138_v22 = vadd.f32 %v3025_v4, %v7819_v13  ;;  %v7935_v3 = vsub.s32 %v7433_v21, %v3591_v51  ;;  %v8656_v15 = vld [vmem:[#allocation67_spill] sm:$0xff]  ;;  %v7952_v35 = vpop.f32.mrb[33].mxu1 }
 0x239   : > { %v4549_v11 = vpack.c.bf16 %v3946_v31, %v3946_v31  ;;  %v3952_v19 = vsel %vm8653_vm2, %v3949_v55, %v3951_v50  ;;  %v3854_v37 = vsel %vm7830_vm8, %v3169_v8, 0.0  ;;  %v3174_v29 = vmax.f32 %v3138_v14, 0.0  ;;  %v7966_v42 = vpop.f32.mrb[34].mxu1  ;;  %vm8667_vm2 = vmmov %vm8663_vm10 }
 0x23a   : > { %vm8655_vm1 = vnez %v8654_v38  ;;  %v4552_v21 = vpack.c.bf16 %v3952_v19, %v3952_v19  ;;  %v3947_v51 = vrot.slane %v3854_v37, 5  ;;  %v3172_v25 = vmax.f32 %v3136_v17, 0.0  ;;  %vm8672_vm3 = vmmov %vm8667_vm2 }
 0x23b   : > { %v8658_v9 = vsel %vm8655_vm1, %v8656_v15, %v8657_v23  ;;  %v3139_v36 = vadd.f32 %v5137_v54, %v7372_v32  ;;  %vm7959_vm8 = vcmp.lt.s32.totalorder %v3789_v44, 16  ;;  %4199 = vst.msk [vmem:[%s6803_s9 + $0x58] sm:$0xf] %vm8663_vm10, %v4549_v11  ;;  %v3137_v43 = vadd.f32 %v5138_v22, %v7372_v32  ;;  %v5101_v44 = vpop.f32.mrb[28].mxu0 }
 0x23c   : > { %vm7947_vm14 = vcmp.lt.s32.totalorder %v8658_v9, 16  ;;  %vm7973_vm0 = vcmp.lt.s32.totalorder %v3792_v12, 16  ;;  %vm3652_vm5 = vcmp.ne.s32.totalorder %v7884_v18, 0  ;;  %vm3688_vm12 = vcmp.lt.s32.totalorder %v7884_v18, 0  ;;  %4202 = vst.msk [vmem:[%s6803_s9 + $0x64] sm:$0xf] %vm8667_vm2, %v4552_v21 }
 0x23d   : > { %v7980_v48 = vadd.s32 18, %v7884_v18  ;;  %vm8668_vm1 = vcmask 1042432   ;;  %v3859_v61 = vsel %vm7856_vm15, %v3174_v29, 0.0  ;;  %v3857_v2 = vsel %vm7865_vm4, %v3172_v25, 0.0  ;;  %v7990_v12 = vpop.f32.mrb[35].mxu1  ;;  %v3038_v41 = vpop.f32.mrb[29].mxu0 }
 0x23e   : > { %v3948_v57 = vsel %vm8668_vm1, %v3945_v26, %v3947_v51  ;;  %vm8669_vm10 = vmmov %vm8668_vm1  ;;  %v3953_v10 = vrot.slane %v3857_v2, 5  ;;  %v3175_v16 = vmax.f32 %v3139_v36, 0.0  ;;  %v3173_v20 = vmax.f32 %v3137_v43, 0.0  ;;  %v5102_v56 = vpop.f32.mrb[30].mxu0 }
 0x23f   : > { %v3950_v33 = vsel %vm8669_vm10, %v3947_v51, %v3949_v55  ;;  %v4550_v24 = vpack.c.bf16 %v3948_v57, %v3948_v57  ;;  %v5139_v26 = vadd.f32 %v5101_v44, %v7849_v59  ;;  %v5140_v55 = vadd.f32 %v3038_v41, %v7872_v45  ;;  %v3041_v30 = vpop.f32.mrb[31].mxu0  ;;  %vm8679_vm10 = vmmov %vm8668_vm1 }
 0x240   : > { %v4551_v5 = vpack.c.bf16 %v3950_v33, %v3950_v33  ;;  %vm7999_vm15 = vcmp.lt.s32.totalorder %v3790_v60, 16  ;;  %vm3650_vm4 = vcmp.ne.s32.totalorder %v7935_v3, 0  ;;  %v3957_v59 = vrot.slane %v3859_v61, 5  ;;  %v5105_v29 = vpop.f32.mrb[32].mxu0 }
 0x241   : > { %4200 = vst.msk [vmem:[%s6803_s9 + $0x5c] sm:$0xf] %vm8672_vm3, %v4550_v24  ;;  %v3954_v45 = vsel %vm8668_vm1, %v3951_v50, %v3953_v10  ;;  %v3860_v0 = vsel %vm7897_vm9, %v3175_v16, 0.0  ;;  %v5141_v8 = vadd.f32 %v5102_v56, %v7888_v34  ;;  %v3858_v14 = vsel %vm7914_vm11, %v3173_v20, 0.0  ;;  %vm8678_vm11 = vmmov %vm8667_vm2  ;;  %v3054_v9 = vpop.f32.mrb[33].mxu0 }
 0x242   : > { %4201 = vst.msk [vmem:[%s6803_s9 + $0x60] sm:$0xf] %vm8667_vm2, %v4551_v5  ;;  %v4553_v40 = vpack.c.bf16 %v3954_v45, %v3954_v45  ;;  %v3959_v60 = vrot.slane %v3860_v0, 5  ;;  %v3142_v54 = vadd.f32 %v5139_v26, %v7372_v32  ;;  %v3955_v4 = vrot.slane %v3858_v14, 5  ;;  %vm8682_vm3 = vmmov %vm8668_vm1 }
 0x243   : > { %v3140_v31 = vadd.f32 %v5140_v55, %v7372_v32  ;;  %v3143_v17 = vadd.f32 %v5141_v8, %v7372_v32  ;;  %v5142_v50 = vadd.f32 %v3041_v30, %v7901_v63  ;;  %v8673_v34 = vsel %vm7714_vm6, %v7702_v6, %v7577_v46  ;;  %vm8043_vm6 = vmand %vm3688_vm12, %vm3652_vm5 }
 0x244   : > { %vm8023_vm13 = vcmp.lt.s32.totalorder %v8673_v34, 16  ;;  %vm8032_vm9 = vcmp.lt.s32.totalorder %v3793_v7, 16  ;;  %4203 = vst.msk [vmem:[%s6803_s9 + $0x68] sm:$0xf] %vm8678_vm11, %v4553_v40  ;;  %v3960_v53 = vsel %vm8679_vm10, %v3957_v59, %v3959_v60  ;;  %v3178_v63 = vmax.f32 %v3142_v54, 0.0  ;;  %vm8683_vm2 = vmmov %vm8668_vm1 }
 0x245   : > { %vm3686_vm7 = vcmp.lt.s32.totalorder %v7935_v3, 0  ;;  %v3758_v6 = vadd.s32 18, %v7935_v3  ;;  %v4556_v62 = vpack.c.bf16 %v3960_v53, %v3960_v53  ;;  %v3956_v39 = vsel %vm8682_vm3, %v3953_v10, %v3955_v4  ;;  %vm8684_vm5 = vmmov %vm8678_vm11 }
 0x246   : > { %v3958_v58 = vsel %vm8683_vm2, %v3955_v4, %v3957_v59  ;;  %v3176_v7 = vmax.f32 %v3140_v31, 0.0  ;;  %v4554_v22 = vpack.c.bf16 %v3956_v39, %v3956_v39  ;;  %v3863_v19 = vsel %vm7947_vm14, %v3178_v63, 0.0  ;;  %vm8067_vm14 = vmand %vm3686_vm7, %vm3650_vm4 }
 0x247   : > { %v4555_v11 = vpack.c.bf16 %v3958_v58, %v3958_v58  ;;  %v3179_v37 = vmax.f32 %v3143_v17, 0.0  ;;  %4206 = vst.msk [vmem:[%s6803_s9 + $0x74] sm:$0xf] %vm8684_vm5, %v4556_v62  ;;  %v3141_v15 = vadd.f32 %v5142_v50, %v7372_v32  ;;  %v5143_v23 = vadd.f32 %v5105_v29, %v7940_v49  ;;  %vm8687_vm12 = vmmov %vm8684_vm5 }
 0x248   : > { %v3861_v38 = vsel %vm7959_vm8, %v3176_v7, 0.0  ;;  %v3796_v21 = vsel %vm8043_vm6, %v7980_v48, %v7884_v18  ;;  %4204 = vst.msk [vmem:[%s6803_s9 + $0x6c] sm:$0xf] %vm8687_vm12, %v4554_v22  ;;  %vm8688_vm8 = vmmov %vm8684_vm5  ;;  %v3965_v51 = vrot.slane %v3863_v19, 5  ;;  %v5144_v36 = vadd.f32 %v3054_v9, %v7952_v35  ;;  %v5106_v18 = vpop.f32.mrb[34].mxu0 }
 0x249   : > { %4205 = vst.msk [vmem:[%s6803_s9 + $0x70] sm:$0xf] %vm8688_vm8, %v4555_v11  ;;  %v3961_v49 = vrot.slane %v3861_v38, 5  ;;  %v3864_v25 = vsel %vm7973_vm0, %v3179_v37, 0.0  ;;  %v3177_v43 = vmax.f32 %v3141_v15, 0.0  ;;  %v3146_v48 = vadd.f32 %v5143_v23, %v7372_v32  ;;  %v3057_v33 = vpop.f32.mrb[35].mxu0  ;;  %vm8689_vm4 = vmmov %vm8668_vm1 }
 0x24a   : > { %v3967_v47 = vrot.slane %v3864_v25, 5  ;;  %v5145_v57 = vadd.f32 %v5106_v18, %v7966_v42  ;;  %v3144_v2 = vadd.f32 %v5144_v36, %v7372_v32  ;;  %v5146_v44 = vadd.f32 %v3057_v33, %v7990_v12  ;;  %vm8690_vm0 = vmmov %vm8668_vm1 }
 0x24b   : > { %v3962_v61 = vsel %vm8689_vm4, %v3959_v60, %v3961_v49  ;;  %v3794_v35 = vsel %vm8067_vm14, %v3758_v6, %v7935_v3  ;;  %v3862_v5 = vsel %vm7999_vm15, %v3177_v43, 0.0  ;;  %v3182_v10 = vmax.f32 %v3146_v48, 0.0  ;;  %vm8691_vm1 = vmmov %vm8684_vm5 }
 0x24c   : > { %v4557_v27 = vpack.c.bf16 %v3962_v61, %v3962_v61  ;;  %v3968_v24 = vsel %vm8690_vm0, %v3965_v51, %v3967_v47  ;;  %v3963_v16 = vrot.slane %v3862_v5, 5  ;;  %v3180_v41 = vmax.f32 %v3144_v2, 0.0  ;;  %vm8696_vm15 = vmmov %vm8691_vm1 }
 0x24d   : > { %v4560_v42 = vpack.c.bf16 %v3968_v24, %v3968_v24  ;;  %v3147_v20 = vadd.f32 %v5145_v57, %v7372_v32  ;;  %vm8092_vm11 = vcmp.lt.s32.totalorder %v3796_v21, 16  ;;  %v3145_v3 = vadd.f32 %v5146_v44, %v7372_v32  ;;  %vm8697_vm6 = vmmov %vm8690_vm0 }
 0x24e   : > { %4207 = vst.msk [vmem:[%s6803_s9 + $0x78] sm:$0xf] %vm8691_vm1, %v4557_v27  ;;  %vm8097_vm10 = vcmp.lt.s32.totalorder %v3794_v35, 16  ;;  %v3964_v55 = vsel %vm8697_vm6, %v3961_v49, %v3963_v16  ;;  %vm8698_vm7 = vmmov %vm8690_vm0  ;;  %v3867_v1 = vsel %vm8023_vm13, %v3182_v10, 0.0  ;;  %v3865_v59 = vsel %vm8032_vm9, %v3180_v41, 0.0 }
 0x24f   : > { %4210 = vst.msk [vmem:[%s6803_s9 + $0x84] sm:$0xf] %vm8696_vm15, %v4560_v42  ;;  %v3966_v56 = vsel %vm8698_vm7, %v3963_v16, %v3965_v51  ;;  %v4558_v45 = vpack.c.bf16 %v3964_v55, %v3964_v55  ;;  %v3969_v32 = vrot.slane %v3865_v59, 5  ;;  %v3183_v8 = vmax.f32 %v3147_v20, 0.0  ;;  %vm8699_vm3 = vmmov %vm8691_vm1 }
 0x250   : > { %v4559_v0 = vpack.c.bf16 %v3966_v56, %v3966_v56  ;;  %v3181_v30 = vmax.f32 %v3145_v3, 0.0  ;;  %vm8700_vm2 = vmmov %vm8691_vm1  ;;  %v3973_v14 = vrot.slane %v3867_v1, 5 }
 0x251   : > { %4208 = vst.msk [vmem:[%s6803_s9 + $0x7c] sm:$0xf] %vm8699_vm3, %v4558_v45  ;;  %vm8701_vm5 = vmmov %vm8690_vm0  ;;  %v3868_v60 = vsel %vm8092_vm11, %v3183_v8, 0.0 }
 0x252   : > { %4209 = vst.msk [vmem:[%s6803_s9 + $0x80] sm:$0xf] %vm8700_vm2, %v4559_v0  ;;  %v3970_v40 = vsel %vm8701_vm5, %v3967_v47, %v3969_v32  ;;  %v3975_v4 = vrot.slane %v3868_v60, 5  ;;  %v3866_v31 = vsel %vm8097_vm10, %v3181_v30, 0.0  ;;  %vm8702_vm13 = vmmov %vm8691_vm1 }
 0x253   : > { %v4561_v54 = vpack.c.bf16 %v3970_v40, %v3970_v40  ;;  %v3971_v17 = vrot.slane %v3866_v31, 5  ;;  %vm8703_vm9 = vmmov %vm8690_vm0 }
 0x254   : > { %v3976_v50 = vsel %vm8703_vm9, %v3973_v14, %v3975_v4  ;;  %vm8704_vm14 = vmmov %vm8690_vm0 }
 0x255   : > { %4211 = vst.msk [vmem:[%s6803_s9 + $0x88] sm:$0xf] %vm8702_vm13, %v4561_v54  ;;  %v4015_v34 = vsel %vm8704_vm14, %v3975_v4, 0.0  ;;  %v4564_v28 = vpack.c.bf16 %v3976_v50, %v3976_v50  ;;  %vm8705_vm12 = vmmov %vm8690_vm0 }
 0x256   : > { %v4565_v52 = vpack.c.bf16 %v4015_v34, %v4015_v34  ;;  %v3972_v53 = vsel %vm8705_vm12, %v3969_v32, %v3971_v17  ;;  %vm8706_vm8 = vmmov %vm8690_vm0 }
 0x257   : > { %v3974_v63 = vsel %vm8706_vm8, %v3971_v17, %v3973_v14  ;;  %v4562_v46 = vpack.c.bf16 %v3972_v53, %v3972_v53  ;;  %vm8707_vm4 = vmmov %vm8691_vm1 }
 0x258   : > { %v4563_v6 = vpack.c.bf16 %v3974_v63, %v3974_v63  ;;  %4214 = vst.msk [vmem:[%s6803_s9 + $0x94] sm:$0xf] %vm8707_vm4, %v4564_v28  ;;  %vm8708_vm0 = vmmov %vm8691_vm1 }
 0x259   : > { %4215 = vst.msk [vmem:[%s6803_s9 + $0x98] sm:$0xf] %vm8708_vm0, %v4565_v52  ;;  %vm8709_vm1 = vmmov %vm8708_vm0 }
 0x25a   : > { %4212 = vst.msk [vmem:[%s6803_s9 + $0x8c] sm:$0xf] %vm8709_vm1, %v4562_v46  ;;  %vm8710_vm11 = vmmov %vm8708_vm0 }
 0x25b   : > { %4213 = vst.msk [vmem:[%s6803_s9 + $0x90] sm:$0xf] %vm8710_vm11, %v4563_v6 }
 0x25c PF: > { %s13_s12 = sadd.s32 1, %s5536_s12  }
 0x25d   : > { %p10_p4 = scmp.ge.s32.totalorder %s13_s12, 4  }
 0x25f   :  { %12 = sbr.rel (!%p10_p4) target bundleno = 1 (0x1), region = 62 }

</bundles_post_ra>
